<compile_context>
chip_gen: v7x
topology: tpu7x:2x2x1
jax: 0.10.0
libtpu: 0.0.40
codegen_flags: <defaults>
</compile_context>

<pallas_src>
import functools

import jax
import jax.numpy as jnp
from jax.experimental import pallas as pl
from jax.experimental.pallas import tpu as pltpu


def linformer_kernel(x_ref, wqT_ref, bq_ref, wkT_ref, bk_ref, wvT_ref, bv_ref,
                     e_ref, f_ref, woT_ref, bo_ref, o_ref,
                     klow_ref, vlow_ref, oslab_ref,
                     *, num_heads, head_dim):
    Bt, D, C = x_ref.shape
    kdim = e_ref.shape[0]
    cdt = x_ref.dtype                       # bf16 compute dtype for MXU operands

    xm = x_ref[...].reshape(Bt * D, C)      # (Bt*D, C) bf16
    e = e_ref[...]
    f = f_ref[...]

    # ---- K branch: project, then Linformer-compress into a resident VMEM
    # slab.  E is shared across the batch and is never broadcast/materialized
    # Bt times; the full-width f32 K is dead before V is produced.
    k = jnp.dot(xm, wkT_ref[...], preferred_element_type=jnp.float32) + bk_ref[...]
    k3 = k.reshape(Bt, D, C).astype(cdt)
    for i in range(Bt):                     # small static unroll over batch block
        klow_ref[i] = jnp.dot(e, k3[i],
                              preferred_element_type=jnp.float32).astype(cdt)

    # ---- V branch ----
    v = jnp.dot(xm, wvT_ref[...], preferred_element_type=jnp.float32) + bv_ref[...]
    v3 = v.reshape(Bt, D, C).astype(cdt)
    for i in range(Bt):
        vlow_ref[i] = jnp.dot(f, v3[i],
                              preferred_element_type=jnp.float32).astype(cdt)

    # ---- Q: attention scale already folded into WqT / bq in the wrapper ----
    q = jnp.dot(xm, wqT_ref[...], preferred_element_type=jnp.float32) + bq_ref[...]
    q3 = q.reshape(Bt, D, C).astype(cdt)

    k_low = klow_ref[...]                   # (Bt, kdim, C) bf16
    v_low = vlow_ref[...]                   # (Bt, kdim, C) bf16

    # Per-head attention against the compressed K/V.  Each head writes its
    # output directly into a resident VMEM slab (no concat, bounded liveness).
    # TODO(synk): for configs with head_dim < 128, grouping heads per matmul
    # (head axis as a batch dim) could further fill the MXU contraction dim.
    for h in range(num_heads):              # static, unrolled
        lo = h * head_dim
        hi = lo + head_dim
        qh = q3[:, :, lo:hi]                # (Bt, D, hd)
        klh = k_low[:, :, lo:hi]            # (Bt, kdim, hd)
        vlh = v_low[:, :, lo:hi]            # (Bt, kdim, hd)

        s = jnp.einsum('bqd,bkd->bqk', qh, klh,
                       preferred_element_type=jnp.float32)   # (Bt, D, kdim) f32
        s = s - jnp.max(s, axis=-1, keepdims=True)
        p = jnp.exp(s)
        denom = jnp.sum(p, axis=-1, keepdims=True)
        attn = (p * pl.reciprocal(denom, approx=True)).astype(cdt)
        oh = jnp.einsum('bqk,bkd->bqd', attn, vlh,
                        preferred_element_type=jnp.float32)
        oslab_ref[:, :, lo:hi] = oh.astype(oslab_ref.dtype)

    # Single full-width output projection from the slab.
    out_heads = oslab_ref[...].reshape(Bt * D, C)
    o = jnp.dot(out_heads, woT_ref[...], preferred_element_type=jnp.float32) + bo_ref[...]
    o_ref[...] = o.reshape(Bt, D, C).astype(o_ref.dtype)
    # TODO(synk): optional boolean `mask` path (masked_fill with -inf before
    # softmax) not implemented; this matches the default mask=None forward.


def _device_tuning():
    """Per-generation VMEM budget / grid preferences."""
    kind = ""
    try:
        kind = jax.devices()[0].device_kind.lower()
    except Exception:
        pass
    if "v5" in kind or "v6" in kind:
        # v5e/v6e: 128 MiB physical VMEM, single TensorCore per chip -> take
        # the biggest block that fits; no need for >=2 grid steps.
        return dict(vmem_limit=100 * 1024 * 1024, budget=88 * 1024 * 1024,
                    prefer_even_grid=False, target_rows=512)
    # v7x (and unknown, conservatively): 64 MiB physical per TC, 2 TCs/chip
    # -> tighter budget, prefer an even number of grid steps.
    return dict(vmem_limit=48 * 1024 * 1024, budget=40 * 1024 * 1024,
                prefer_even_grid=True, target_rows=256)


def _pick_block_b(B, D, C, kdim, out_bytes, tune):
    """VMEM-budget-driven batch block, generation aware."""
    # Fixed footprint: single-buffered weights + E/F + biases.
    fixed = 4 * C * C * 2 + 2 * kdim * C * 2 + 4 * C * 4

    def footprint(bb):
        per_b = (2 * D * C * 2            # x block, double-buffered bf16
                 + 2 * D * C * out_bytes  # output block, double-buffered
                 + D * C * (4 + 2)        # one full-width f32 proj + bf16 copy
                 + D * C * 6              # q (f32 + bf16) live through head loop
                 + D * C * 2              # per-head output slab (bf16)
                 + 2 * kdim * C * 2       # k_low / v_low slabs (bf16)
                 + 3 * D * kdim * 4)      # per-head scores / probs (f32)
        return fixed + bb * per_b

    divisors = [d for d in range(1, B + 1) if B % d == 0]
    fits = [d for d in divisors if footprint(d) <= tune["budget"]] or [1]
    if tune["prefer_even_grid"]:
        even = [d for d in fits if (B // d) % 2 == 0]
        if even:
            fits = even
    # Smallest block that already gives a large-enough matmul M (keeps grid
    # parallelism / VMEM low); otherwise the largest block that fits.
    good = [d for d in fits if d * D >= tune["target_rows"]]
    return min(good) if good else max(fits)


def linformer_self_attention(x, params, num_heads, compute_dtype=jnp.bfloat16,
                             out_dtype=None):
    B, D, C = x.shape
    assert C % num_heads == 0
    head_dim = C // num_heads
    scale = head_dim ** (-0.5)
    wq, bq, wk, bk, wv, bv, E, F, wo, bo = params
    kdim = E.shape[0]
    # As in the PyTorch reference, E/F (k, embed_dim) act on the sequence
    # axis, so the module only type-checks when seq_len == embed_dim.
    assert D == C, "LinformerSelfAttention requires seq_len == embed_dim"
    # bf16 output halves HBM writeback / VMEM if downstream accepts it; keep
    # the module's dtype by default for parity with the PyTorch forward.
    out_dtype = x.dtype if out_dtype is None else out_dtype

    # Pre-transpose projection weights in the wrapper (free layout plumbing,
    # no in-kernel XLU transposes), fold the attention scale into Wq/bq once,
    # and cast MXU operands to bf16.
    wqT = (wq.T * scale).astype(compute_dtype)
    wkT = wk.T.astype(compute_dtype)
    wvT = wv.T.astype(compute_dtype)
    woT = wo.T.astype(compute_dtype)
    e_c = E.astype(compute_dtype)
    f_c = F.astype(compute_dtype)
    x_c = x.astype(compute_dtype)
    # Biases stay f32 (added to f32 accumulators); keep them 2-D.
    bq2 = (bq * scale).reshape(1, C).astype(jnp.float32)
    bk2 = bk.reshape(1, C).astype(jnp.float32)
    bv2 = bv.reshape(1, C).astype(jnp.float32)
    bo2 = bo.reshape(1, C).astype(jnp.float32)

    tune = _device_tuning()
    out_bytes = jnp.dtype(out_dtype).itemsize
    block_b = _pick_block_b(B, D, C, kdim, out_bytes, tune)
    grid = (B // block_b,)

    kernel = functools.partial(linformer_kernel, num_heads=num_heads,
                               head_dim=head_dim)

    flops = 8 * B * D * C * C + 8 * B * D * kdim * C
    transcendentals = B * num_heads * D * (kdim + 1)
    bytes_accessed = (B * D * C * (2 + out_bytes)            # x (bf16) + out
                      + (4 * C * C + 2 * kdim * C) * 2       # bf16 weights
                      + 4 * C * 4)                           # f32 biases

    args = (x_c, wqT, bq2, wkT, bk2, wvT, bv2, e_c, f_c, woT, bo2)

    def build(single_buffer_consts):
        def const_spec(shape):
            idx = lambda b: (0,) * len(shape)
            if single_buffer_consts:
                try:
                    # Constant-index blocks never re-DMA; single-buffer them
                    # to save VMEM (critical headroom on v7x's 64 MiB).
                    return pl.BlockSpec(shape, idx, pipeline_mode=pl.Buffered(1))
                except TypeError:
                    pass
            return pl.BlockSpec(shape, idx)

        return pl.pallas_call(
            kernel,
            out_shape=jax.ShapeDtypeStruct((B, D, C), out_dtype),
            grid=grid,
            in_specs=[
                pl.BlockSpec((block_b, D, C), lambda b: (b, 0, 0)),   # x
                const_spec((C, C)), const_spec((1, C)),               # WqT, bq
                const_spec((C, C)), const_spec((1, C)),               # WkT, bk
                const_spec((C, C)), const_spec((1, C)),               # WvT, bv
                const_spec((kdim, C)), const_spec((kdim, C)),         # E, F
                const_spec((C, C)), const_spec((1, C)),               # WoT, bo
            ],
            out_specs=pl.BlockSpec((block_b, D, C), lambda b: (b, 0, 0)),
            scratch_shapes=[
                pltpu.VMEM((block_b, kdim, C), compute_dtype),   # k_low slab
                pltpu.VMEM((block_b, kdim, C), compute_dtype),   # v_low slab
                pltpu.VMEM((block_b, D, C), compute_dtype),      # per-head out slab
            ],
            compiler_params=pltpu.CompilerParams(
                dimension_semantics=("parallel",),
                vmem_limit_bytes=tune["vmem_limit"],
            ),
            cost_estimate=pl.CostEstimate(
                flops=int(flops),
                transcendentals=int(transcendentals),
                bytes_accessed=int(bytes_accessed)),
        )

    try:
        return build(True)(*args)
    except Exception:
        # Fallback: identical kernel without pipeline_mode on the constant
        # specs, in case this JAX version rejects pl.Buffered at this level.
        return build(False)(*args)


def linformer_reference(x, params, num_heads):
    """Plain-JAX (f32) transcription of the PyTorch forward (mask=None)."""
    wq, bq, wk, bk, wv, bv, E, F, wo, bo = params
    B, D, C = x.shape
    hd = C // num_heads
    scale = hd ** (-0.5)

    q = x @ wq.T + bq
    k = x @ wk.T + bk
    v = x @ wv.T + bv

    def split_heads(t):
        return t.reshape(B, D, num_heads, hd).transpose(0, 2, 1, 3).reshape(
            B * num_heads, D, hd)

    q, k, v = split_heads(q), split_heads(k), split_heads(v)
    k = jnp.einsum('ke,bed->bkd', E, k)
    v = jnp.einsum('ke,bed->bkd', F, v)
    scores = jnp.einsum('bqd,bkd->bqk', q, k) * scale
    attn = jax.nn.softmax(scores, axis=-1)
    out = jnp.einsum('bqk,bkd->bqd', attn, v)
    out = out.reshape(B, num_heads, D, hd).transpose(0, 2, 1, 3).reshape(B, D, C)
    return out @ wo.T + bo


if __name__ == "__main__":
    # Small config: embed_dim=32, num_heads=4, k=8, seq_len D == embed_dim = 32.
    B, D, C = 2, 32, 32
    num_heads = 4
    kdim = 8

    key = jax.random.PRNGKey(0)
    keys = jax.random.split(key, 12)

    def lin_w(kk):
        return jax.random.normal(kk, (C, C), jnp.float32) * 0.05

    def lin_b(kk):
        return jax.random.normal(kk, (C,), jnp.float32) * 0.05

    wq, bq = lin_w(keys[0]), lin_b(keys[1])
    wk, bk = lin_w(keys[2]), lin_b(keys[3])
    wv, bv = lin_w(keys[4]), lin_b(keys[5])
    wo, bo = lin_w(keys[6]), lin_b(keys[7])
    E = jax.random.normal(keys[8], (kdim, C), jnp.float32) * 0.02
    F = jax.random.normal(keys[9], (kdim, C), jnp.float32) * 0.02
    params = (wq, bq, wk, bk, wv, bv, E, F, wo, bo)

    x = jax.random.normal(keys[10], (B, D, C), jnp.float32)

    out = linformer_self_attention(x, params, num_heads)
    out = jax.block_until_ready(out)

    ref = linformer_reference(x, params, num_heads)
    assert out.shape == (B, D, C)
    # bf16 MXU operands + approx reciprocal => looser tolerance than pure f32.
    assert jnp.allclose(out, ref, rtol=2e-2, atol=2e-2), (
        f"max abs err {jnp.max(jnp.abs(out - ref))}")

    print("KERNEL_OK")
</pallas_src>

<mosaic_0001>
module attributes {stable_mosaic.version = 11 : i64} {
  func.func @linformer_kernel(%arg0: i32, %arg1: memref<1x32x32xbf16, #tpu.memory_space<vmem>>, %arg2: memref<32x32xbf16, #tpu.memory_space<vmem>>, %arg3: memref<1x32xf32, #tpu.memory_space<vmem>>, %arg4: memref<32x32xbf16, #tpu.memory_space<vmem>>, %arg5: memref<1x32xf32, #tpu.memory_space<vmem>>, %arg6: memref<32x32xbf16, #tpu.memory_space<vmem>>, %arg7: memref<1x32xf32, #tpu.memory_space<vmem>>, %arg8: memref<8x32xbf16, #tpu.memory_space<vmem>>, %arg9: memref<8x32xbf16, #tpu.memory_space<vmem>>, %arg10: memref<32x32xbf16, #tpu.memory_space<vmem>>, %arg11: memref<1x32xf32, #tpu.memory_space<vmem>>, %arg12: memref<1x32x32xf32, #tpu.memory_space<vmem>>, %arg13: memref<1x8x32xbf16, #tpu.memory_space<vmem>>, %arg14: memref<1x8x32xbf16, #tpu.memory_space<vmem>>, %arg15: memref<1x32x32xbf16, #tpu.memory_space<vmem>>) attributes {dimension_semantics = [#tpu.dimension_semantics<parallel>], iteration_bounds = array<i64: 2>, scalar_prefetch = 0 : i64, scratch_operands = 3 : i64, tpu.core_type = #tpu.core_type<tc>, window_params = [{transform_indices = @transform_0, window_bounds = array<i64: 1, 32, 32>}, {pipeline_mode = #tpu.pipeline_mode<synchronous>, transform_indices = @transform_1, window_bounds = array<i64: 32, 32>}, {pipeline_mode = #tpu.pipeline_mode<synchronous>, transform_indices = @transform_2, window_bounds = array<i64: 1, 32>}, {pipeline_mode = #tpu.pipeline_mode<synchronous>, transform_indices = @transform_3, window_bounds = array<i64: 32, 32>}, {pipeline_mode = #tpu.pipeline_mode<synchronous>, transform_indices = @transform_4, window_bounds = array<i64: 1, 32>}, {pipeline_mode = #tpu.pipeline_mode<synchronous>, transform_indices = @transform_5, window_bounds = array<i64: 32, 32>}, {pipeline_mode = #tpu.pipeline_mode<synchronous>, transform_indices = @transform_6, window_bounds = array<i64: 1, 32>}, {pipeline_mode = #tpu.pipeline_mode<synchronous>, transform_indices = @transform_7, window_bounds = array<i64: 8, 32>}, {pipeline_mode = #tpu.pipeline_mode<synchronous>, transform_indices = @transform_8, window_bounds = array<i64: 8, 32>}, {pipeline_mode = #tpu.pipeline_mode<synchronous>, transform_indices = @transform_9, window_bounds = array<i64: 32, 32>}, {pipeline_mode = #tpu.pipeline_mode<synchronous>, transform_indices = @transform_10, window_bounds = array<i64: 1, 32>}, {transform_indices = @transform_11, window_bounds = array<i64: 1, 32, 32>}]} {
    %c0 = arith.constant 0 : index
    %c0_0 = arith.constant 0 : index
    %c0_1 = arith.constant 0 : index
    %0 = vector.load %arg1[%c0, %c0_0, %c0_1] : memref<1x32x32xbf16, #tpu.memory_space<vmem>>, vector<1x32x32xbf16>
    %1 = vector.shape_cast %0 : vector<1x32x32xbf16> to vector<32x32xbf16>
    %c0_2 = arith.constant 0 : index
    %c0_3 = arith.constant 0 : index
    %2 = vector.load %arg8[%c0_2, %c0_3] : memref<8x32xbf16, #tpu.memory_space<vmem>>, vector<8x32xbf16>
    %c0_4 = arith.constant 0 : index
    %c0_5 = arith.constant 0 : index
    %3 = vector.load %arg9[%c0_4, %c0_5] : memref<8x32xbf16, #tpu.memory_space<vmem>>, vector<8x32xbf16>
    %c0_6 = arith.constant 0 : index
    %c0_7 = arith.constant 0 : index
    %4 = vector.load %arg4[%c0_6, %c0_7] : memref<32x32xbf16, #tpu.memory_space<vmem>>, vector<32x32xbf16>
    %cst = arith.constant dense<0.000000e+00> : vector<32x32xf32>
    %5 = tpu.matmul %1, %4, %cst {dimension_numbers = #tpu.dot_dimension_numbers<[1], [0], [0], [1], [0, 0, 1, 1], [], []>} : vector<32x32xbf16>, vector<32x32xbf16>, vector<32x32xf32> -> vector<32x32xf32>
    %c0_8 = arith.constant 0 : index
    %c0_9 = arith.constant 0 : index
    %6 = vector.load %arg5[%c0_8, %c0_9] : memref<1x32xf32, #tpu.memory_space<vmem>>, vector<1x32xf32>
    %7 = vector.broadcast %6 : vector<1x32xf32> to vector<32x32xf32>
    %8 = arith.addf %5, %7 : vector<32x32xf32>
    %9 = vector.shape_cast %8 : vector<32x32xf32> to vector<1x32x32xf32>
    %10 = arith.truncf %9 : vector<1x32x32xf32> to vector<1x32x32xbf16>
    %11 = vector.shape_cast %10 : vector<1x32x32xbf16> to vector<32x32xbf16>
    %cst_10 = arith.constant dense<0.000000e+00> : vector<8x32xf32>
    %12 = tpu.matmul %2, %11, %cst_10 {dimension_numbers = #tpu.dot_dimension_numbers<[1], [0], [0], [1], [0, 0, 1, 1], [], []>} : vector<8x32xbf16>, vector<32x32xbf16>, vector<8x32xf32> -> vector<8x32xf32>
    %13 = arith.truncf %12 : vector<8x32xf32> to vector<8x32xbf16>
    %c0_11 = arith.constant 0 : index
    %c0_12 = arith.constant 0 : index
    %c0_13 = arith.constant 0 : index
    %14 = vector.load %arg13[%c0_11, %c0_12, %c0_13] : memref<1x8x32xbf16, #tpu.memory_space<vmem>>, vector<1x8x32xbf16>
    %15 = vector.shape_cast %14 : vector<1x8x32xbf16> to vector<8x32xbf16>
    %16 = vector.shape_cast %13 : vector<8x32xbf16> to vector<1x8x32xbf16>
    tpu.vector_store %arg13[%c0_11, %c0_12, %c0_13], %16 {strides = array<i32>} : memref<1x8x32xbf16, #tpu.memory_space<vmem>>, vector<1x8x32xbf16>,
    %c0_14 = arith.constant 0 : index
    %c0_15 = arith.constant 0 : index
    %17 = vector.load %arg6[%c0_14, %c0_15] : memref<32x32xbf16, #tpu.memory_space<vmem>>, vector<32x32xbf16>
    %cst_16 = arith.constant dense<0.000000e+00> : vector<32x32xf32>
    %18 = tpu.matmul %1, %17, %cst_16 {dimension_numbers = #tpu.dot_dimension_numbers<[1], [0], [0], [1], [0, 0, 1, 1], [], []>} : vector<32x32xbf16>, vector<32x32xbf16>, vector<32x32xf32> -> vector<32x32xf32>
    %c0_17 = arith.constant 0 : index
    %c0_18 = arith.constant 0 : index
    %19 = vector.load %arg7[%c0_17, %c0_18] : memref<1x32xf32, #tpu.memory_space<vmem>>, vector<1x32xf32>
    %20 = vector.broadcast %19 : vector<1x32xf32> to vector<32x32xf32>
    %21 = arith.addf %18, %20 : vector<32x32xf32>
    %22 = vector.shape_cast %21 : vector<32x32xf32> to vector<1x32x32xf32>
    %23 = arith.truncf %22 : vector<1x32x32xf32> to vector<1x32x32xbf16>
    %24 = vector.shape_cast %23 : vector<1x32x32xbf16> to vector<32x32xbf16>
    %cst_19 = arith.constant dense<0.000000e+00> : vector<8x32xf32>
    %25 = tpu.matmul %3, %24, %cst_19 {dimension_numbers = #tpu.dot_dimension_numbers<[1], [0], [0], [1], [0, 0, 1, 1], [], []>} : vector<8x32xbf16>, vector<32x32xbf16>, vector<8x32xf32> -> vector<8x32xf32>
    %26 = arith.truncf %25 : vector<8x32xf32> to vector<8x32xbf16>
    %c0_20 = arith.constant 0 : index
    %c0_21 = arith.constant 0 : index
    %c0_22 = arith.constant 0 : index
    %27 = vector.load %arg14[%c0_20, %c0_21, %c0_22] : memref<1x8x32xbf16, #tpu.memory_space<vmem>>, vector<1x8x32xbf16>
    %28 = vector.shape_cast %27 : vector<1x8x32xbf16> to vector<8x32xbf16>
    %29 = vector.shape_cast %26 : vector<8x32xbf16> to vector<1x8x32xbf16>
    tpu.vector_store %arg14[%c0_20, %c0_21, %c0_22], %29 {strides = array<i32>} : memref<1x8x32xbf16, #tpu.memory_space<vmem>>, vector<1x8x32xbf16>,
    %c0_23 = arith.constant 0 : index
    %c0_24 = arith.constant 0 : index
    %30 = vector.load %arg2[%c0_23, %c0_24] : memref<32x32xbf16, #tpu.memory_space<vmem>>, vector<32x32xbf16>
    %cst_25 = arith.constant dense<0.000000e+00> : vector<32x32xf32>
    %31 = tpu.matmul %1, %30, %cst_25 {dimension_numbers = #tpu.dot_dimension_numbers<[1], [0], [0], [1], [0, 0, 1, 1], [], []>} : vector<32x32xbf16>, vector<32x32xbf16>, vector<32x32xf32> -> vector<32x32xf32>
    %c0_26 = arith.constant 0 : index
    %c0_27 = arith.constant 0 : index
    %32 = vector.load %arg3[%c0_26, %c0_27] : memref<1x32xf32, #tpu.memory_space<vmem>>, vector<1x32xf32>
    %33 = vector.broadcast %32 : vector<1x32xf32> to vector<32x32xf32>
    %34 = arith.addf %31, %33 : vector<32x32xf32>
    %35 = vector.shape_cast %34 : vector<32x32xf32> to vector<1x32x32xf32>
    %36 = arith.truncf %35 : vector<1x32x32xf32> to vector<1x32x32xbf16>
    %c0_28 = arith.constant 0 : index
    %c0_29 = arith.constant 0 : index
    %c0_30 = arith.constant 0 : index
    %37 = vector.load %arg13[%c0_28, %c0_29, %c0_30] : memref<1x8x32xbf16, #tpu.memory_space<vmem>>, vector<1x8x32xbf16>
    %c0_31 = arith.constant 0 : index
    %c0_32 = arith.constant 0 : index
    %c0_33 = arith.constant 0 : index
    %38 = vector.load %arg14[%c0_31, %c0_32, %c0_33] : memref<1x8x32xbf16, #tpu.memory_space<vmem>>, vector<1x8x32xbf16>
    %39 = vector.extract_strided_slice %36 {offsets = [0, 0, 0], sizes = [1, 32, 8], strides = [1, 1, 1]} : vector<1x32x32xbf16> to vector<1x32x8xbf16>
    %40 = vector.extract_strided_slice %37 {offsets = [0, 0, 0], sizes = [1, 8, 8], strides = [1, 1, 1]} : vector<1x8x32xbf16> to vector<1x8x8xbf16>
    %41 = vector.extract_strided_slice %38 {offsets = [0, 0, 0], sizes = [1, 8, 8], strides = [1, 1, 1]} : vector<1x8x32xbf16> to vector<1x8x8xbf16>
    "tpu.trace_start"() <{level = 10 : i32, message = "bqd,bkd->bqk"}> : () -> ()
    %cst_34 = arith.constant dense<0.000000e+00> : vector<1x32x8xf32>
    %42 = tpu.matmul %39, %40, %cst_34 {dimension_numbers = #tpu.dot_dimension_numbers<[2], [2], [1], [1], [0, 0, 0, 1, 1, 1], [0], [0]>} : vector<1x32x8xbf16>, vector<1x8x8xbf16>, vector<1x32x8xf32> -> vector<1x32x8xf32>
    "tpu.trace_stop"() : () -> ()
    %cst_35 = arith.constant dense<0xFF800000> : vector<1x32xf32>
    %43 = vector.multi_reduction <maximumf>, %42, %cst_35 [2] : vector<1x32x8xf32> to vector<1x32xf32>
    %44 = vector.shape_cast %43 : vector<1x32xf32> to vector<1x32x1xf32>
    %45 = vector.broadcast %44 : vector<1x32x1xf32> to vector<1x32x8xf32>
    %46 = arith.subf %42, %45 : vector<1x32x8xf32>
    %47 = math.exp %46 : vector<1x32x8xf32>
    %cst_36 = arith.constant dense<0.000000e+00> : vector<1x32xf32>
    %48 = vector.multi_reduction <add>, %47, %cst_36 [2] : vector<1x32x8xf32> to vector<1x32xf32>
    %49 = vector.shape_cast %48 : vector<1x32xf32> to vector<1x32x1xf32>
    %50 = tpu.reciprocal %49 {approx = true} : vector<1x32x1xf32> -> vector<1x32x1xf32>
    %51 = vector.broadcast %50 : vector<1x32x1xf32> to vector<1x32x8xf32>
    %52 = arith.mulf %47, %51 : vector<1x32x8xf32>
    %53 = arith.truncf %52 : vector<1x32x8xf32> to vector<1x32x8xbf16>
    "tpu.trace_start"() <{level = 10 : i32, message = "bqk,bkd->bqd"}> : () -> ()
    %cst_37 = arith.constant dense<0.000000e+00> : vector<1x32x8xf32>
    %54 = tpu.matmul %53, %41, %cst_37 {dimension_numbers = #tpu.dot_dimension_numbers<[2], [1], [1], [2], [0, 0, 0, 1, 1, 2], [0], [0]>} : vector<1x32x8xbf16>, vector<1x8x8xbf16>, vector<1x32x8xf32> -> vector<1x32x8xf32>
    "tpu.trace_stop"() : () -> ()
    %55 = arith.truncf %54 : vector<1x32x8xf32> to vector<1x32x8xbf16>
    %c0_38 = arith.constant 0 : index
    %c0_39 = arith.constant 0 : index
    %c0_40 = arith.constant 0 : index
    %56 = vector.load %arg15[%c0_38, %c0_39, %c0_40] : memref<1x32x32xbf16, #tpu.memory_space<vmem>>, vector<1x32x8xbf16>
    tpu.vector_store %arg15[%c0_38, %c0_39, %c0_40], %55 {strides = array<i32>} : memref<1x32x32xbf16, #tpu.memory_space<vmem>>, vector<1x32x8xbf16>,
    %57 = vector.extract_strided_slice %36 {offsets = [0, 0, 8], sizes = [1, 32, 8], strides = [1, 1, 1]} : vector<1x32x32xbf16> to vector<1x32x8xbf16>
    %58 = vector.extract_strided_slice %37 {offsets = [0, 0, 8], sizes = [1, 8, 8], strides = [1, 1, 1]} : vector<1x8x32xbf16> to vector<1x8x8xbf16>
    %59 = vector.extract_strided_slice %38 {offsets = [0, 0, 8], sizes = [1, 8, 8], strides = [1, 1, 1]} : vector<1x8x32xbf16> to vector<1x8x8xbf16>
    "tpu.trace_start"() <{level = 10 : i32, message = "bqd,bkd->bqk"}> : () -> ()
    %cst_41 = arith.constant dense<0.000000e+00> : vector<1x32x8xf32>
    %60 = tpu.matmul %57, %58, %cst_41 {dimension_numbers = #tpu.dot_dimension_numbers<[2], [2], [1], [1], [0, 0, 0, 1, 1, 1], [0], [0]>} : vector<1x32x8xbf16>, vector<1x8x8xbf16>, vector<1x32x8xf32> -> vector<1x32x8xf32>
    "tpu.trace_stop"() : () -> ()
    %cst_42 = arith.constant dense<0xFF800000> : vector<1x32xf32>
    %61 = vector.multi_reduction <maximumf>, %60, %cst_42 [2] : vector<1x32x8xf32> to vector<1x32xf32>
    %62 = vector.shape_cast %61 : vector<1x32xf32> to vector<1x32x1xf32>
    %63 = vector.broadcast %62 : vector<1x32x1xf32> to vector<1x32x8xf32>
    %64 = arith.subf %60, %63 : vector<1x32x8xf32>
    %65 = math.exp %64 : vector<1x32x8xf32>
    %cst_43 = arith.constant dense<0.000000e+00> : vector<1x32xf32>
    %66 = vector.multi_reduction <add>, %65, %cst_43 [2] : vector<1x32x8xf32> to vector<1x32xf32>
    %67 = vector.shape_cast %66 : vector<1x32xf32> to vector<1x32x1xf32>
    %68 = tpu.reciprocal %67 {approx = true} : vector<1x32x1xf32> -> vector<1x32x1xf32>
    %69 = vector.broadcast %68 : vector<1x32x1xf32> to vector<1x32x8xf32>
    %70 = arith.mulf %65, %69 : vector<1x32x8xf32>
    %71 = arith.truncf %70 : vector<1x32x8xf32> to vector<1x32x8xbf16>
    "tpu.trace_start"() <{level = 10 : i32, message = "bqk,bkd->bqd"}> : () -> ()
    %cst_44 = arith.constant dense<0.000000e+00> : vector<1x32x8xf32>
    %72 = tpu.matmul %71, %59, %cst_44 {dimension_numbers = #tpu.dot_dimension_numbers<[2], [1], [1], [2], [0, 0, 0, 1, 1, 2], [0], [0]>} : vector<1x32x8xbf16>, vector<1x8x8xbf16>, vector<1x32x8xf32> -> vector<1x32x8xf32>
    "tpu.trace_stop"() : () -> ()
    %73 = arith.truncf %72 : vector<1x32x8xf32> to vector<1x32x8xbf16>
    %c0_45 = arith.constant 0 : index
    %c0_46 = arith.constant 0 : index
    %c8 = arith.constant 8 : index
    %74 = vector.load %arg15[%c0_45, %c0_46, %c8] : memref<1x32x32xbf16, #tpu.memory_space<vmem>>, vector<1x32x8xbf16>
    tpu.vector_store %arg15[%c0_45, %c0_46, %c8], %73 {strides = array<i32>} : memref<1x32x32xbf16, #tpu.memory_space<vmem>>, vector<1x32x8xbf16>,
    %75 = vector.extract_strided_slice %36 {offsets = [0, 0, 16], sizes = [1, 32, 8], strides = [1, 1, 1]} : vector<1x32x32xbf16> to vector<1x32x8xbf16>
    %76 = vector.extract_strided_slice %37 {offsets = [0, 0, 16], sizes = [1, 8, 8], strides = [1, 1, 1]} : vector<1x8x32xbf16> to vector<1x8x8xbf16>
    %77 = vector.extract_strided_slice %38 {offsets = [0, 0, 16], sizes = [1, 8, 8], strides = [1, 1, 1]} : vector<1x8x32xbf16> to vector<1x8x8xbf16>
    "tpu.trace_start"() <{level = 10 : i32, message = "bqd,bkd->bqk"}> : () -> ()
    %cst_47 = arith.constant dense<0.000000e+00> : vector<1x32x8xf32>
    %78 = tpu.matmul %75, %76, %cst_47 {dimension_numbers = #tpu.dot_dimension_numbers<[2], [2], [1], [1], [0, 0, 0, 1, 1, 1], [0], [0]>} : vector<1x32x8xbf16>, vector<1x8x8xbf16>, vector<1x32x8xf32> -> vector<1x32x8xf32>
    "tpu.trace_stop"() : () -> ()
    %cst_48 = arith.constant dense<0xFF800000> : vector<1x32xf32>
    %79 = vector.multi_reduction <maximumf>, %78, %cst_48 [2] : vector<1x32x8xf32> to vector<1x32xf32>
    %80 = vector.shape_cast %79 : vector<1x32xf32> to vector<1x32x1xf32>
    %81 = vector.broadcast %80 : vector<1x32x1xf32> to vector<1x32x8xf32>
    %82 = arith.subf %78, %81 : vector<1x32x8xf32>
    %83 = math.exp %82 : vector<1x32x8xf32>
    %cst_49 = arith.constant dense<0.000000e+00> : vector<1x32xf32>
    %84 = vector.multi_reduction <add>, %83, %cst_49 [2] : vector<1x32x8xf32> to vector<1x32xf32>
    %85 = vector.shape_cast %84 : vector<1x32xf32> to vector<1x32x1xf32>
    %86 = tpu.reciprocal %85 {approx = true} : vector<1x32x1xf32> -> vector<1x32x1xf32>
    %87 = vector.broadcast %86 : vector<1x32x1xf32> to vector<1x32x8xf32>
    %88 = arith.mulf %83, %87 : vector<1x32x8xf32>
    %89 = arith.truncf %88 : vector<1x32x8xf32> to vector<1x32x8xbf16>
    "tpu.trace_start"() <{level = 10 : i32, message = "bqk,bkd->bqd"}> : () -> ()
    %cst_50 = arith.constant dense<0.000000e+00> : vector<1x32x8xf32>
    %90 = tpu.matmul %89, %77, %cst_50 {dimension_numbers = #tpu.dot_dimension_numbers<[2], [1], [1], [2], [0, 0, 0, 1, 1, 2], [0], [0]>} : vector<1x32x8xbf16>, vector<1x8x8xbf16>, vector<1x32x8xf32> -> vector<1x32x8xf32>
    "tpu.trace_stop"() : () -> ()
    %91 = arith.truncf %90 : vector<1x32x8xf32> to vector<1x32x8xbf16>
    %c0_51 = arith.constant 0 : index
    %c0_52 = arith.constant 0 : index
    %c16 = arith.constant 16 : index
    %92 = vector.load %arg15[%c0_51, %c0_52, %c16] : memref<1x32x32xbf16, #tpu.memory_space<vmem>>, vector<1x32x8xbf16>
    tpu.vector_store %arg15[%c0_51, %c0_52, %c16], %91 {strides = array<i32>} : memref<1x32x32xbf16, #tpu.memory_space<vmem>>, vector<1x32x8xbf16>,
    %93 = vector.extract_strided_slice %36 {offsets = [0, 0, 24], sizes = [1, 32, 8], strides = [1, 1, 1]} : vector<1x32x32xbf16> to vector<1x32x8xbf16>
    %94 = vector.extract_strided_slice %37 {offsets = [0, 0, 24], sizes = [1, 8, 8], strides = [1, 1, 1]} : vector<1x8x32xbf16> to vector<1x8x8xbf16>
    %95 = vector.extract_strided_slice %38 {offsets = [0, 0, 24], sizes = [1, 8, 8], strides = [1, 1, 1]} : vector<1x8x32xbf16> to vector<1x8x8xbf16>
    "tpu.trace_start"() <{level = 10 : i32, message = "bqd,bkd->bqk"}> : () -> ()
    %cst_53 = arith.constant dense<0.000000e+00> : vector<1x32x8xf32>
    %96 = tpu.matmul %93, %94, %cst_53 {dimension_numbers = #tpu.dot_dimension_numbers<[2], [2], [1], [1], [0, 0, 0, 1, 1, 1], [0], [0]>} : vector<1x32x8xbf16>, vector<1x8x8xbf16>, vector<1x32x8xf32> -> vector<1x32x8xf32>
    "tpu.trace_stop"() : () -> ()
    %cst_54 = arith.constant dense<0xFF800000> : vector<1x32xf32>
    %97 = vector.multi_reduction <maximumf>, %96, %cst_54 [2] : vector<1x32x8xf32> to vector<1x32xf32>
    %98 = vector.shape_cast %97 : vector<1x32xf32> to vector<1x32x1xf32>
    %99 = vector.broadcast %98 : vector<1x32x1xf32> to vector<1x32x8xf32>
    %100 = arith.subf %96, %99 : vector<1x32x8xf32>
    %101 = math.exp %100 : vector<1x32x8xf32>
    %cst_55 = arith.constant dense<0.000000e+00> : vector<1x32xf32>
    %102 = vector.multi_reduction <add>, %101, %cst_55 [2] : vector<1x32x8xf32> to vector<1x32xf32>
    %103 = vector.shape_cast %102 : vector<1x32xf32> to vector<1x32x1xf32>
    %104 = tpu.reciprocal %103 {approx = true} : vector<1x32x1xf32> -> vector<1x32x1xf32>
    %105 = vector.broadcast %104 : vector<1x32x1xf32> to vector<1x32x8xf32>
    %106 = arith.mulf %101, %105 : vector<1x32x8xf32>
    %107 = arith.truncf %106 : vector<1x32x8xf32> to vector<1x32x8xbf16>
    "tpu.trace_start"() <{level = 10 : i32, message = "bqk,bkd->bqd"}> : () -> ()
    %cst_56 = arith.constant dense<0.000000e+00> : vector<1x32x8xf32>
    %108 = tpu.matmul %107, %95, %cst_56 {dimension_numbers = #tpu.dot_dimension_numbers<[2], [1], [1], [2], [0, 0, 0, 1, 1, 2], [0], [0]>} : vector<1x32x8xbf16>, vector<1x8x8xbf16>, vector<1x32x8xf32> -> vector<1x32x8xf32>
    "tpu.trace_stop"() : () -> ()
    %109 = arith.truncf %108 : vector<1x32x8xf32> to vector<1x32x8xbf16>
    %c0_57 = arith.constant 0 : index
    %c0_58 = arith.constant 0 : index
    %c24 = arith.constant 24 : index
    %110 = vector.load %arg15[%c0_57, %c0_58, %c24] : memref<1x32x32xbf16, #tpu.memory_space<vmem>>, vector<1x32x8xbf16>
    tpu.vector_store %arg15[%c0_57, %c0_58, %c24], %109 {strides = array<i32>} : memref<1x32x32xbf16, #tpu.memory_space<vmem>>, vector<1x32x8xbf16>,
    %c0_59 = arith.constant 0 : index
    %c0_60 = arith.constant 0 : index
    %c0_61 = arith.constant 0 : index
    %111 = vector.load %arg15[%c0_59, %c0_60, %c0_61] : memref<1x32x32xbf16, #tpu.memory_space<vmem>>, vector<1x32x32xbf16>
    %112 = vector.shape_cast %111 : vector<1x32x32xbf16> to vector<32x32xbf16>
    %c0_62 = arith.constant 0 : index
    %c0_63 = arith.constant 0 : index
    %113 = vector.load %arg10[%c0_62, %c0_63] : memref<32x32xbf16, #tpu.memory_space<vmem>>, vector<32x32xbf16>
    %cst_64 = arith.constant dense<0.000000e+00> : vector<32x32xf32>
    %114 = tpu.matmul %112, %113, %cst_64 {dimension_numbers = #tpu.dot_dimension_numbers<[1], [0], [0], [1], [0, 0, 1, 1], [], []>} : vector<32x32xbf16>, vector<32x32xbf16>, vector<32x32xf32> -> vector<32x32xf32>
    %c0_65 = arith.constant 0 : index
    %c0_66 = arith.constant 0 : index
    %115 = vector.load %arg11[%c0_65, %c0_66] : memref<1x32xf32, #tpu.memory_space<vmem>>, vector<1x32xf32>
    %116 = vector.broadcast %115 : vector<1x32xf32> to vector<32x32xf32>
    %117 = arith.addf %114, %116 : vector<32x32xf32>
    %118 = vector.shape_cast %117 : vector<32x32xf32> to vector<1x32x32xf32>
    %c0_67 = arith.constant 0 : index
    %c0_68 = arith.constant 0 : index
    %c0_69 = arith.constant 0 : index
    %119 = vector.load %arg12[%c0_67, %c0_68, %c0_69] : memref<1x32x32xf32, #tpu.memory_space<vmem>>, vector<1x32x32xf32>
    tpu.vector_store %arg12[%c0_67, %c0_68, %c0_69], %118 {strides = array<i32>} : memref<1x32x32xf32, #tpu.memory_space<vmem>>, vector<1x32x32xf32>,
    return
  }
  func.func @transform_0(%arg0: i32) -> (i32, i32, i32) {
    %c0_i32 = arith.constant 0 : i32
    %c0_i32_0 = arith.constant 0 : i32
    %c0_i32_1 = arith.constant 0 : i32
    return %arg0, %c0_i32, %c0_i32_0 : i32, i32, i32
  }
  func.func @transform_1(%arg0: i32) -> (i32, i32) {
    %c0_i32 = arith.constant 0 : i32
    %c0_i32_0 = arith.constant 0 : i32
    %c0_i32_1 = arith.constant 0 : i32
    return %c0_i32, %c0_i32_0 : i32, i32
  }
  func.func @transform_2(%arg0: i32) -> (i32, i32) {
    %c0_i32 = arith.constant 0 : i32
    %c0_i32_0 = arith.constant 0 : i32
    %c0_i32_1 = arith.constant 0 : i32
    return %c0_i32, %c0_i32_0 : i32, i32
  }
  func.func @transform_3(%arg0: i32) -> (i32, i32) {
    %c0_i32 = arith.constant 0 : i32
    %c0_i32_0 = arith.constant 0 : i32
    %c0_i32_1 = arith.constant 0 : i32
    return %c0_i32, %c0_i32_0 : i32, i32
  }
  func.func @transform_4(%arg0: i32) -> (i32, i32) {
    %c0_i32 = arith.constant 0 : i32
    %c0_i32_0 = arith.constant 0 : i32
    %c0_i32_1 = arith.constant 0 : i32
    return %c0_i32, %c0_i32_0 : i32, i32
  }
  func.func @transform_5(%arg0: i32) -> (i32, i32) {
    %c0_i32 = arith.constant 0 : i32
    %c0_i32_0 = arith.constant 0 : i32
    %c0_i32_1 = arith.constant 0 : i32
    return %c0_i32, %c0_i32_0 : i32, i32
  }
  func.func @transform_6(%arg0: i32) -> (i32, i32) {
    %c0_i32 = arith.constant 0 : i32
    %c0_i32_0 = arith.constant 0 : i32
    %c0_i32_1 = arith.constant 0 : i32
    return %c0_i32, %c0_i32_0 : i32, i32
  }
  func.func @transform_7(%arg0: i32) -> (i32, i32) {
    %c0_i32 = arith.constant 0 : i32
    %c0_i32_0 = arith.constant 0 : i32
    %c0_i32_1 = arith.constant 0 : i32
    return %c0_i32, %c0_i32_0 : i32, i32
  }
  func.func @transform_8(%arg0: i32) -> (i32, i32) {
    %c0_i32 = arith.constant 0 : i32
    %c0_i32_0 = arith.constant 0 : i32
    %c0_i32_1 = arith.constant 0 : i32
    return %c0_i32, %c0_i32_0 : i32, i32
  }
  func.func @transform_9(%arg0: i32) -> (i32, i32) {
    %c0_i32 = arith.constant 0 : i32
    %c0_i32_0 = arith.constant 0 : i32
    %c0_i32_1 = arith.constant 0 : i32
    return %c0_i32, %c0_i32_0 : i32, i32
  }
  func.func @transform_10(%arg0: i32) -> (i32, i32) {
    %c0_i32 = arith.constant 0 : i32
    %c0_i32_0 = arith.constant 0 : i32
    %c0_i32_1 = arith.constant 0 : i32
    return %c0_i32, %c0_i32_0 : i32, i32
  }
  func.func @transform_11(%arg0: i32) -> (i32, i32, i32) {
    %c0_i32 = arith.constant 0 : i32
    %c0_i32_0 = arith.constant 0 : i32
    %c0_i32_1 = arith.constant 0 : i32
    return %arg0, %c0_i32, %c0_i32_0 : i32, i32, i32
  }
}

module attributes {stable_mosaic.version = 11 : i64} {
  func.func @linformer_kernel(%arg0: i32, %arg1: memref<1x32x32xbf16, #tpu.memory_space<vmem>>, %arg2: memref<32x32xbf16, #tpu.memory_space<vmem>>, %arg3: memref<1x32xf32, #tpu.memory_space<vmem>>, %arg4: memref<32x32xbf16, #tpu.memory_space<vmem>>, %arg5: memref<1x32xf32, #tpu.memory_space<vmem>>, %arg6: memref<32x32xbf16, #tpu.memory_space<vmem>>, %arg7: memref<1x32xf32, #tpu.memory_space<vmem>>, %arg8: memref<8x32xbf16, #tpu.memory_space<vmem>>, %arg9: memref<8x32xbf16, #tpu.memory_space<vmem>>, %arg10: memref<32x32xbf16, #tpu.memory_space<vmem>>, %arg11: memref<1x32xf32, #tpu.memory_space<vmem>>, %arg12: memref<1x32x32xf32, #tpu.memory_space<vmem>>, %arg13: memref<1x8x32xbf16, #tpu.memory_space<vmem>>, %arg14: memref<1x8x32xbf16, #tpu.memory_space<vmem>>, %arg15: memref<1x32x32xbf16, #tpu.memory_space<vmem>>) attributes {dimension_semantics = [#tpu.dimension_semantics<parallel>], iteration_bounds = array<i64: 2>, scalar_prefetch = 0 : i64, scratch_operands = 3 : i64, tpu.core_type = #tpu.core_type<tc>, window_params = [{transform_indices = @transform_0, window_bounds = array<i64: 1, 32, 32>}, {pipeline_mode = #tpu.pipeline_mode<synchronous>, transform_indices = @transform_1, window_bounds = array<i64: 32, 32>}, {pipeline_mode = #tpu.pipeline_mode<synchronous>, transform_indices = @transform_2, window_bounds = array<i64: 1, 32>}, {pipeline_mode = #tpu.pipeline_mode<synchronous>, transform_indices = @transform_3, window_bounds = array<i64: 32, 32>}, {pipeline_mode = #tpu.pipeline_mode<synchronous>, transform_indices = @transform_4, window_bounds = array<i64: 1, 32>}, {pipeline_mode = #tpu.pipeline_mode<synchronous>, transform_indices = @transform_5, window_bounds = array<i64: 32, 32>}, {pipeline_mode = #tpu.pipeline_mode<synchronous>, transform_indices = @transform_6, window_bounds = array<i64: 1, 32>}, {pipeline_mode = #tpu.pipeline_mode<synchronous>, transform_indices = @transform_7, window_bounds = array<i64: 8, 32>}, {pipeline_mode = #tpu.pipeline_mode<synchronous>, transform_indices = @transform_8, window_bounds = array<i64: 8, 32>}, {pipeline_mode = #tpu.pipeline_mode<synchronous>, transform_indices = @transform_9, window_bounds = array<i64: 32, 32>}, {pipeline_mode = #tpu.pipeline_mode<synchronous>, transform_indices = @transform_10, window_bounds = array<i64: 1, 32>}, {transform_indices = @transform_11, window_bounds = array<i64: 1, 32, 32>}]} {
    %c0 = arith.constant 0 : index
    %c0_0 = arith.constant 0 : index
    %c0_1 = arith.constant 0 : index
    %0 = vector.load %arg1[%c0, %c0_0, %c0_1] : memref<1x32x32xbf16, #tpu.memory_space<vmem>>, vector<1x32x32xbf16>
    %1 = vector.shape_cast %0 : vector<1x32x32xbf16> to vector<32x32xbf16>
    %c0_2 = arith.constant 0 : index
    %c0_3 = arith.constant 0 : index
    %2 = vector.load %arg8[%c0_2, %c0_3] : memref<8x32xbf16, #tpu.memory_space<vmem>>, vector<8x32xbf16>
    %c0_4 = arith.constant 0 : index
    %c0_5 = arith.constant 0 : index
    %3 = vector.load %arg9[%c0_4, %c0_5] : memref<8x32xbf16, #tpu.memory_space<vmem>>, vector<8x32xbf16>
    %c0_6 = arith.constant 0 : index
    %c0_7 = arith.constant 0 : index
    %4 = vector.load %arg4[%c0_6, %c0_7] : memref<32x32xbf16, #tpu.memory_space<vmem>>, vector<32x32xbf16>
    %cst = arith.constant dense<0.000000e+00> : vector<32x32xf32>
    %5 = tpu.matmul %1, %4, %cst {dimension_numbers = #tpu.dot_dimension_numbers<[1], [0], [0], [1], [0, 0, 1, 1], [], []>} : vector<32x32xbf16>, vector<32x32xbf16>, vector<32x32xf32> -> vector<32x32xf32>
    %c0_8 = arith.constant 0 : index
    %c0_9 = arith.constant 0 : index
    %6 = vector.load %arg5[%c0_8, %c0_9] : memref<1x32xf32, #tpu.memory_space<vmem>>, vector<1x32xf32>
    %7 = vector.broadcast %6 : vector<1x32xf32> to vector<32x32xf32>
    %8 = arith.addf %5, %7 : vector<32x32xf32>
    %9 = vector.shape_cast %8 : vector<32x32xf32> to vector<1x32x32xf32>
    %10 = arith.truncf %9 : vector<1x32x32xf32> to vector<1x32x32xbf16>
    %11 = vector.shape_cast %10 : vector<1x32x32xbf16> to vector<32x32xbf16>
    %cst_10 = arith.constant dense<0.000000e+00> : vector<8x32xf32>
    %12 = tpu.matmul %2, %11, %cst_10 {dimension_numbers = #tpu.dot_dimension_numbers<[1], [0], [0], [1], [0, 0, 1, 1], [], []>} : vector<8x32xbf16>, vector<32x32xbf16>, vector<8x32xf32> -> vector<8x32xf32>
    %13 = arith.truncf %12 : vector<8x32xf32> to vector<8x32xbf16>
    %c0_11 = arith.constant 0 : index
    %c0_12 = arith.constant 0 : index
    %c0_13 = arith.constant 0 : index
    %14 = vector.load %arg13[%c0_11, %c0_12, %c0_13] : memref<1x8x32xbf16, #tpu.memory_space<vmem>>, vector<1x8x32xbf16>
    %15 = vector.shape_cast %14 : vector<1x8x32xbf16> to vector<8x32xbf16>
    %16 = vector.shape_cast %13 : vector<8x32xbf16> to vector<1x8x32xbf16>
    tpu.vector_store %arg13[%c0_11, %c0_12, %c0_13], %16 {strides = array<i32>} : memref<1x8x32xbf16, #tpu.memory_space<vmem>>, vector<1x8x32xbf16>,
    %c0_14 = arith.constant 0 : index
    %c0_15 = arith.constant 0 : index
    %17 = vector.load %arg6[%c0_14, %c0_15] : memref<32x32xbf16, #tpu.memory_space<vmem>>, vector<32x32xbf16>
    %cst_16 = arith.constant dense<0.000000e+00> : vector<32x32xf32>
    %18 = tpu.matmul %1, %17, %cst_16 {dimension_numbers = #tpu.dot_dimension_numbers<[1], [0], [0], [1], [0, 0, 1, 1], [], []>} : vector<32x32xbf16>, vector<32x32xbf16>, vector<32x32xf32> -> vector<32x32xf32>
    %c0_17 = arith.constant 0 : index
    %c0_18 = arith.constant 0 : index
    %19 = vector.load %arg7[%c0_17, %c0_18] : memref<1x32xf32, #tpu.memory_space<vmem>>, vector<1x32xf32>
    %20 = vector.broadcast %19 : vector<1x32xf32> to vector<32x32xf32>
    %21 = arith.addf %18, %20 : vector<32x32xf32>
    %22 = vector.shape_cast %21 : vector<32x32xf32> to vector<1x32x32xf32>
    %23 = arith.truncf %22 : vector<1x32x32xf32> to vector<1x32x32xbf16>
    %24 = vector.shape_cast %23 : vector<1x32x32xbf16> to vector<32x32xbf16>
    %cst_19 = arith.constant dense<0.000000e+00> : vector<8x32xf32>
    %25 = tpu.matmul %3, %24, %cst_19 {dimension_numbers = #tpu.dot_dimension_numbers<[1], [0], [0], [1], [0, 0, 1, 1], [], []>} : vector<8x32xbf16>, vector<32x32xbf16>, vector<8x32xf32> -> vector<8x32xf32>
    %26 = arith.truncf %25 : vector<8x32xf32> to vector<8x32xbf16>
    %c0_20 = arith.constant 0 : index
    %c0_21 = arith.constant 0 : index
    %c0_22 = arith.constant 0 : index
    %27 = vector.load %arg14[%c0_20, %c0_21, %c0_22] : memref<1x8x32xbf16, #tpu.memory_space<vmem>>, vector<1x8x32xbf16>
    %28 = vector.shape_cast %27 : vector<1x8x32xbf16> to vector<8x32xbf16>
    %29 = vector.shape_cast %26 : vector<8x32xbf16> to vector<1x8x32xbf16>
    tpu.vector_store %arg14[%c0_20, %c0_21, %c0_22], %29 {strides = array<i32>} : memref<1x8x32xbf16, #tpu.memory_space<vmem>>, vector<1x8x32xbf16>,
    %c0_23 = arith.constant 0 : index
    %c0_24 = arith.constant 0 : index
    %30 = vector.load %arg2[%c0_23, %c0_24] : memref<32x32xbf16, #tpu.memory_space<vmem>>, vector<32x32xbf16>
    %cst_25 = arith.constant dense<0.000000e+00> : vector<32x32xf32>
    %31 = tpu.matmul %1, %30, %cst_25 {dimension_numbers = #tpu.dot_dimension_numbers<[1], [0], [0], [1], [0, 0, 1, 1], [], []>} : vector<32x32xbf16>, vector<32x32xbf16>, vector<32x32xf32> -> vector<32x32xf32>
    %c0_26 = arith.constant 0 : index
    %c0_27 = arith.constant 0 : index
    %32 = vector.load %arg3[%c0_26, %c0_27] : memref<1x32xf32, #tpu.memory_space<vmem>>, vector<1x32xf32>
    %33 = vector.broadcast %32 : vector<1x32xf32> to vector<32x32xf32>
    %34 = arith.addf %31, %33 : vector<32x32xf32>
    %35 = vector.shape_cast %34 : vector<32x32xf32> to vector<1x32x32xf32>
    %36 = arith.truncf %35 : vector<1x32x32xf32> to vector<1x32x32xbf16>
    %c0_28 = arith.constant 0 : index
    %c0_29 = arith.constant 0 : index
    %c0_30 = arith.constant 0 : index
    %37 = vector.load %arg13[%c0_28, %c0_29, %c0_30] : memref<1x8x32xbf16, #tpu.memory_space<vmem>>, vector<1x8x32xbf16>
    %c0_31 = arith.constant 0 : index
    %c0_32 = arith.constant 0 : index
    %c0_33 = arith.constant 0 : index
    %38 = vector.load %arg14[%c0_31, %c0_32, %c0_33] : memref<1x8x32xbf16, #tpu.memory_space<vmem>>, vector<1x8x32xbf16>
    %39 = vector.extract_strided_slice %36 {offsets = [0, 0, 0], sizes = [1, 32, 8], strides = [1, 1, 1]} : vector<1x32x32xbf16> to vector<1x32x8xbf16>
    %40 = vector.extract_strided_slice %37 {offsets = [0, 0, 0], sizes = [1, 8, 8], strides = [1, 1, 1]} : vector<1x8x32xbf16> to vector<1x8x8xbf16>
    %41 = vector.extract_strided_slice %38 {offsets = [0, 0, 0], sizes = [1, 8, 8], strides = [1, 1, 1]} : vector<1x8x32xbf16> to vector<1x8x8xbf16>
    "tpu.trace_start"() <{level = 10 : i32, message = "bqd,bkd->bqk"}> : () -> ()
    %cst_34 = arith.constant dense<0.000000e+00> : vector<1x32x8xf32>
    %42 = tpu.matmul %39, %40, %cst_34 {dimension_numbers = #tpu.dot_dimension_numbers<[2], [2], [1], [1], [0, 0, 0, 1, 1, 1], [0], [0]>} : vector<1x32x8xbf16>, vector<1x8x8xbf16>, vector<1x32x8xf32> -> vector<1x32x8xf32>
    "tpu.trace_stop"() : () -> ()
    %cst_35 = arith.constant dense<0xFF800000> : vector<1x32xf32>
    %43 = vector.multi_reduction <maximumf>, %42, %cst_35 [2] : vector<1x32x8xf32> to vector<1x32xf32>
    %44 = vector.shape_cast %43 : vector<1x32xf32> to vector<1x32x1xf32>
    %45 = vector.broadcast %44 : vector<1x32x1xf32> to vector<1x32x8xf32>
    %46 = arith.subf %42, %45 : vector<1x32x8xf32>
    %47 = math.exp %46 : vector<1x32x8xf32>
    %cst_36 = arith.constant dense<0.000000e+00> : vector<1x32xf32>
    %48 = vector.multi_reduction <add>, %47, %cst_36 [2] : vector<1x32x8xf32> to vector<1x32xf32>
    %49 = vector.shape_cast %48 : vector<1x32xf32> to vector<1x32x1xf32>
    %50 = tpu.reciprocal %49 {approx = true} : vector<1x32x1xf32> -> vector<1x32x1xf32>
    %51 = vector.broadcast %50 : vector<1x32x1xf32> to vector<1x32x8xf32>
    %52 = arith.mulf %47, %51 : vector<1x32x8xf32>
    %53 = arith.truncf %52 : vector<1x32x8xf32> to vector<1x32x8xbf16>
    "tpu.trace_start"() <{level = 10 : i32, message = "bqk,bkd->bqd"}> : () -> ()
    %cst_37 = arith.constant dense<0.000000e+00> : vector<1x32x8xf32>
    %54 = tpu.matmul %53, %41, %cst_37 {dimension_numbers = #tpu.dot_dimension_numbers<[2], [1], [1], [2], [0, 0, 0, 1, 1, 2], [0], [0]>} : vector<1x32x8xbf16>, vector<1x8x8xbf16>, vector<1x32x8xf32> -> vector<1x32x8xf32>
    "tpu.trace_stop"() : () -> ()
    %55 = arith.truncf %54 : vector<1x32x8xf32> to vector<1x32x8xbf16>
    %c0_38 = arith.constant 0 : index
    %c0_39 = arith.constant 0 : index
    %c0_40 = arith.constant 0 : index
    %56 = vector.load %arg15[%c0_38, %c0_39, %c0_40] : memref<1x32x32xbf16, #tpu.memory_space<vmem>>, vector<1x32x8xbf16>
    tpu.vector_store %arg15[%c0_38, %c0_39, %c0_40], %55 {strides = array<i32>} : memref<1x32x32xbf16, #tpu.memory_space<vmem>>, vector<1x32x8xbf16>,
    %57 = vector.extract_strided_slice %36 {offsets = [0, 0, 8], sizes = [1, 32, 8], strides = [1, 1, 1]} : vector<1x32x32xbf16> to vector<1x32x8xbf16>
    %58 = vector.extract_strided_slice %37 {offsets = [0, 0, 8], sizes = [1, 8, 8], strides = [1, 1, 1]} : vector<1x8x32xbf16> to vector<1x8x8xbf16>
    %59 = vector.extract_strided_slice %38 {offsets = [0, 0, 8], sizes = [1, 8, 8], strides = [1, 1, 1]} : vector<1x8x32xbf16> to vector<1x8x8xbf16>
    "tpu.trace_start"() <{level = 10 : i32, message = "bqd,bkd->bqk"}> : () -> ()
    %cst_41 = arith.constant dense<0.000000e+00> : vector<1x32x8xf32>
    %60 = tpu.matmul %57, %58, %cst_41 {dimension_numbers = #tpu.dot_dimension_numbers<[2], [2], [1], [1], [0, 0, 0, 1, 1, 1], [0], [0]>} : vector<1x32x8xbf16>, vector<1x8x8xbf16>, vector<1x32x8xf32> -> vector<1x32x8xf32>
    "tpu.trace_stop"() : () -> ()
    %cst_42 = arith.constant dense<0xFF800000> : vector<1x32xf32>
    %61 = vector.multi_reduction <maximumf>, %60, %cst_42 [2] : vector<1x32x8xf32> to vector<1x32xf32>
    %62 = vector.shape_cast %61 : vector<1x32xf32> to vector<1x32x1xf32>
    %63 = vector.broadcast %62 : vector<1x32x1xf32> to vector<1x32x8xf32>
    %64 = arith.subf %60, %63 : vector<1x32x8xf32>
    %65 = math.exp %64 : vector<1x32x8xf32>
    %cst_43 = arith.constant dense<0.000000e+00> : vector<1x32xf32>
    %66 = vector.multi_reduction <add>, %65, %cst_43 [2] : vector<1x32x8xf32> to vector<1x32xf32>
    %67 = vector.shape_cast %66 : vector<1x32xf32> to vector<1x32x1xf32>
    %68 = tpu.reciprocal %67 {approx = true} : vector<1x32x1xf32> -> vector<1x32x1xf32>
    %69 = vector.broadcast %68 : vector<1x32x1xf32> to vector<1x32x8xf32>
    %70 = arith.mulf %65, %69 : vector<1x32x8xf32>
    %71 = arith.truncf %70 : vector<1x32x8xf32> to vector<1x32x8xbf16>
    "tpu.trace_start"() <{level = 10 : i32, message = "bqk,bkd->bqd"}> : () -> ()
    %cst_44 = arith.constant dense<0.000000e+00> : vector<1x32x8xf32>
    %72 = tpu.matmul %71, %59, %cst_44 {dimension_numbers = #tpu.dot_dimension_numbers<[2], [1], [1], [2], [0, 0, 0, 1, 1, 2], [0], [0]>} : vector<1x32x8xbf16>, vector<1x8x8xbf16>, vector<1x32x8xf32> -> vector<1x32x8xf32>
    "tpu.trace_stop"() : () -> ()
    %73 = arith.truncf %72 : vector<1x32x8xf32> to vector<1x32x8xbf16>
    %c0_45 = arith.constant 0 : index
    %c0_46 = arith.constant 0 : index
    %c8 = arith.constant 8 : index
    %74 = vector.load %arg15[%c0_45, %c0_46, %c8] : memref<1x32x32xbf16, #tpu.memory_space<vmem>>, vector<1x32x8xbf16>
    tpu.vector_store %arg15[%c0_45, %c0_46, %c8], %73 {strides = array<i32>} : memref<1x32x32xbf16, #tpu.memory_space<vmem>>, vector<1x32x8xbf16>,
    %75 = vector.extract_strided_slice %36 {offsets = [0, 0, 16], sizes = [1, 32, 8], strides = [1, 1, 1]} : vector<1x32x32xbf16> to vector<1x32x8xbf16>
    %76 = vector.extract_strided_slice %37 {offsets = [0, 0, 16], sizes = [1, 8, 8], strides = [1, 1, 1]} : vector<1x8x32xbf16> to vector<1x8x8xbf16>
    %77 = vector.extract_strided_slice %38 {offsets = [0, 0, 16], sizes = [1, 8, 8], strides = [1, 1, 1]} : vector<1x8x32xbf16> to vector<1x8x8xbf16>
    "tpu.trace_start"() <{level = 10 : i32, message = "bqd,bkd->bqk"}> : () -> ()
    %cst_47 = arith.constant dense<0.000000e+00> : vector<1x32x8xf32>
    %78 = tpu.matmul %75, %76, %cst_47 {dimension_numbers = #tpu.dot_dimension_numbers<[2], [2], [1], [1], [0, 0, 0, 1, 1, 1], [0], [0]>} : vector<1x32x8xbf16>, vector<1x8x8xbf16>, vector<1x32x8xf32> -> vector<1x32x8xf32>
    "tpu.trace_stop"() : () -> ()
    %cst_48 = arith.constant dense<0xFF800000> : vector<1x32xf32>
    %79 = vector.multi_reduction <maximumf>, %78, %cst_48 [2] : vector<1x32x8xf32> to vector<1x32xf32>
    %80 = vector.shape_cast %79 : vector<1x32xf32> to vector<1x32x1xf32>
    %81 = vector.broadcast %80 : vector<1x32x1xf32> to vector<1x32x8xf32>
    %82 = arith.subf %78, %81 : vector<1x32x8xf32>
    %83 = math.exp %82 : vector<1x32x8xf32>
    %cst_49 = arith.constant dense<0.000000e+00> : vector<1x32xf32>
    %84 = vector.multi_reduction <add>, %83, %cst_49 [2] : vector<1x32x8xf32> to vector<1x32xf32>
    %85 = vector.shape_cast %84 : vector<1x32xf32> to vector<1x32x1xf32>
    %86 = tpu.reciprocal %85 {approx = true} : vector<1x32x1xf32> -> vector<1x32x1xf32>
    %87 = vector.broadcast %86 : vector<1x32x1xf32> to vector<1x32x8xf32>
    %88 = arith.mulf %83, %87 : vector<1x32x8xf32>
    %89 = arith.truncf %88 : vector<1x32x8xf32> to vector<1x32x8xbf16>
    "tpu.trace_start"() <{level = 10 : i32, message = "bqk,bkd->bqd"}> : () -> ()
    %cst_50 = arith.constant dense<0.000000e+00> : vector<1x32x8xf32>
    %90 = tpu.matmul %89, %77, %cst_50 {dimension_numbers = #tpu.dot_dimension_numbers<[2], [1], [1], [2], [0, 0, 0, 1, 1, 2], [0], [0]>} : vector<1x32x8xbf16>, vector<1x8x8xbf16>, vector<1x32x8xf32> -> vector<1x32x8xf32>
    "tpu.trace_stop"() : () -> ()
    %91 = arith.truncf %90 : vector<1x32x8xf32> to vector<1x32x8xbf16>
    %c0_51 = arith.constant 0 : index
    %c0_52 = arith.constant 0 : index
    %c16 = arith.constant 16 : index
    %92 = vector.load %arg15[%c0_51, %c0_52, %c16] : memref<1x32x32xbf16, #tpu.memory_space<vmem>>, vector<1x32x8xbf16>
    tpu.vector_store %arg15[%c0_51, %c0_52, %c16], %91 {strides = array<i32>} : memref<1x32x32xbf16, #tpu.memory_space<vmem>>, vector<1x32x8xbf16>,
    %93 = vector.extract_strided_slice %36 {offsets = [0, 0, 24], sizes = [1, 32, 8], strides = [1, 1, 1]} : vector<1x32x32xbf16> to vector<1x32x8xbf16>
    %94 = vector.extract_strided_slice %37 {offsets = [0, 0, 24], sizes = [1, 8, 8], strides = [1, 1, 1]} : vector<1x8x32xbf16> to vector<1x8x8xbf16>
    %95 = vector.extract_strided_slice %38 {offsets = [0, 0, 24], sizes = [1, 8, 8], strides = [1, 1, 1]} : vector<1x8x32xbf16> to vector<1x8x8xbf16>
    "tpu.trace_start"() <{level = 10 : i32, message = "bqd,bkd->bqk"}> : () -> ()
    %cst_53 = arith.constant dense<0.000000e+00> : vector<1x32x8xf32>
    %96 = tpu.matmul %93, %94, %cst_53 {dimension_numbers = #tpu.dot_dimension_numbers<[2], [2], [1], [1], [0, 0, 0, 1, 1, 1], [0], [0]>} : vector<1x32x8xbf16>, vector<1x8x8xbf16>, vector<1x32x8xf32> -> vector<1x32x8xf32>
    "tpu.trace_stop"() : () -> ()
    %cst_54 = arith.constant dense<0xFF800000> : vector<1x32xf32>
    %97 = vector.multi_reduction <maximumf>, %96, %cst_54 [2] : vector<1x32x8xf32> to vector<1x32xf32>
    %98 = vector.shape_cast %97 : vector<1x32xf32> to vector<1x32x1xf32>
    %99 = vector.broadcast %98 : vector<1x32x1xf32> to vector<1x32x8xf32>
    %100 = arith.subf %96, %99 : vector<1x32x8xf32>
    %101 = math.exp %100 : vector<1x32x8xf32>
    %cst_55 = arith.constant dense<0.000000e+00> : vector<1x32xf32>
    %102 = vector.multi_reduction <add>, %101, %cst_55 [2] : vector<1x32x8xf32> to vector<1x32xf32>
    %103 = vector.shape_cast %102 : vector<1x32xf32> to vector<1x32x1xf32>
    %104 = tpu.reciprocal %103 {approx = true} : vector<1x32x1xf32> -> vector<1x32x1xf32>
    %105 = vector.broadcast %104 : vector<1x32x1xf32> to vector<1x32x8xf32>
    %106 = arith.mulf %101, %105 : vector<1x32x8xf32>
    %107 = arith.truncf %106 : vector<1x32x8xf32> to vector<1x32x8xbf16>
    "tpu.trace_start"() <{level = 10 : i32, message = "bqk,bkd->bqd"}> : () -> ()
    %cst_56 = arith.constant dense<0.000000e+00> : vector<1x32x8xf32>
    %108 = tpu.matmul %107, %95, %cst_56 {dimension_numbers = #tpu.dot_dimension_numbers<[2], [1], [1], [2], [0, 0, 0, 1, 1, 2], [0], [0]>} : vector<1x32x8xbf16>, vector<1x8x8xbf16>, vector<1x32x8xf32> -> vector<1x32x8xf32>
    "tpu.trace_stop"() : () -> ()
    %109 = arith.truncf %108 : vector<1x32x8xf32> to vector<1x32x8xbf16>
    %c0_57 = arith.constant 0 : index
    %c0_58 = arith.constant 0 : index
    %c24 = arith.constant 24 : index
    %110 = vector.load %arg15[%c0_57, %c0_58, %c24] : memref<1x32x32xbf16, #tpu.memory_space<vmem>>, vector<1x32x8xbf16>
    tpu.vector_store %arg15[%c0_57, %c0_58, %c24], %109 {strides = array<i32>} : memref<1x32x32xbf16, #tpu.memory_space<vmem>>, vector<1x32x8xbf16>,
    %c0_59 = arith.constant 0 : index
    %c0_60 = arith.constant 0 : index
    %c0_61 = arith.constant 0 : index
    %111 = vector.load %arg15[%c0_59, %c0_60, %c0_61] : memref<1x32x32xbf16, #tpu.memory_space<vmem>>, vector<1x32x32xbf16>
    %112 = vector.shape_cast %111 : vector<1x32x32xbf16> to vector<32x32xbf16>
    %c0_62 = arith.constant 0 : index
    %c0_63 = arith.constant 0 : index
    %113 = vector.load %arg10[%c0_62, %c0_63] : memref<32x32xbf16, #tpu.memory_space<vmem>>, vector<32x32xbf16>
    %cst_64 = arith.constant dense<0.000000e+00> : vector<32x32xf32>
    %114 = tpu.matmul %112, %113, %cst_64 {dimension_numbers = #tpu.dot_dimension_numbers<[1], [0], [0], [1], [0, 0, 1, 1], [], []>} : vector<32x32xbf16>, vector<32x32xbf16>, vector<32x32xf32> -> vector<32x32xf32>
    %c0_65 = arith.constant 0 : index
    %c0_66 = arith.constant 0 : index
    %115 = vector.load %arg11[%c0_65, %c0_66] : memref<1x32xf32, #tpu.memory_space<vmem>>, vector<1x32xf32>
    %116 = vector.broadcast %115 : vector<1x32xf32> to vector<32x32xf32>
    %117 = arith.addf %114, %116 : vector<32x32xf32>
    %118 = vector.shape_cast %117 : vector<32x32xf32> to vector<1x32x32xf32>
    %c0_67 = arith.constant 0 : index
    %c0_68 = arith.constant 0 : index
    %c0_69 = arith.constant 0 : index
    %119 = vector.load %arg12[%c0_67, %c0_68, %c0_69] : memref<1x32x32xf32, #tpu.memory_space<vmem>>, vector<1x32x32xf32>
    tpu.vector_store %arg12[%c0_67, %c0_68, %c0_69], %118 {strides = array<i32>} : memref<1x32x32xf32, #tpu.memory_space<vmem>>, vector<1x32x32xf32>,
    return
  }
  func.func @transform_0(%arg0: i32) -> (i32, i32, i32) {
    %c0_i32 = arith.constant 0 : i32
    %c0_i32_0 = arith.constant 0 : i32
    %c0_i32_1 = arith.constant 0 : i32
    return %arg0, %c0_i32, %c0_i32_0 : i32, i32, i32
  }
  func.func @transform_1(%arg0: i32) -> (i32, i32) {
    %c0_i32 = arith.constant 0 : i32
    %c0_i32_0 = arith.constant 0 : i32
    %c0_i32_1 = arith.constant 0 : i32
    return %c0_i32, %c0_i32_0 : i32, i32
  }
  func.func @transform_2(%arg0: i32) -> (i32, i32) {
    %c0_i32 = arith.constant 0 : i32
    %c0_i32_0 = arith.constant 0 : i32
    %c0_i32_1 = arith.constant 0 : i32
    return %c0_i32, %c0_i32_0 : i32, i32
  }
  func.func @transform_3(%arg0: i32) -> (i32, i32) {
    %c0_i32 = arith.constant 0 : i32
    %c0_i32_0 = arith.constant 0 : i32
    %c0_i32_1 = arith.constant 0 : i32
    return %c0_i32, %c0_i32_0 : i32, i32
  }
  func.func @transform_4(%arg0: i32) -> (i32, i32) {
    %c0_i32 = arith.constant 0 : i32
    %c0_i32_0 = arith.constant 0 : i32
    %c0_i32_1 = arith.constant 0 : i32
    return %c0_i32, %c0_i32_0 : i32, i32
  }
  func.func @transform_5(%arg0: i32) -> (i32, i32) {
    %c0_i32 = arith.constant 0 : i32
    %c0_i32_0 = arith.constant 0 : i32
    %c0_i32_1 = arith.constant 0 : i32
    return %c0_i32, %c0_i32_0 : i32, i32
  }
  func.func @transform_6(%arg0: i32) -> (i32, i32) {
    %c0_i32 = arith.constant 0 : i32
    %c0_i32_0 = arith.constant 0 : i32
    %c0_i32_1 = arith.constant 0 : i32
    return %c0_i32, %c0_i32_0 : i32, i32
  }
  func.func @transform_7(%arg0: i32) -> (i32, i32) {
    %c0_i32 = arith.constant 0 : i32
    %c0_i32_0 = arith.constant 0 : i32
    %c0_i32_1 = arith.constant 0 : i32
    return %c0_i32, %c0_i32_0 : i32, i32
  }
  func.func @transform_8(%arg0: i32) -> (i32, i32) {
    %c0_i32 = arith.constant 0 : i32
    %c0_i32_0 = arith.constant 0 : i32
    %c0_i32_1 = arith.constant 0 : i32
    return %c0_i32, %c0_i32_0 : i32, i32
  }
  func.func @transform_9(%arg0: i32) -> (i32, i32) {
    %c0_i32 = arith.constant 0 : i32
    %c0_i32_0 = arith.constant 0 : i32
    %c0_i32_1 = arith.constant 0 : i32
    return %c0_i32, %c0_i32_0 : i32, i32
  }
  func.func @transform_10(%arg0: i32) -> (i32, i32) {
    %c0_i32 = arith.constant 0 : i32
    %c0_i32_0 = arith.constant 0 : i32
    %c0_i32_1 = arith.constant 0 : i32
    return %c0_i32, %c0_i32_0 : i32, i32
  }
  func.func @transform_11(%arg0: i32) -> (i32, i32, i32) {
    %c0_i32 = arith.constant 0 : i32
    %c0_i32_0 = arith.constant 0 : i32
    %c0_i32_1 = arith.constant 0 : i32
    return %arg0, %c0_i32, %c0_i32_0 : i32, i32, i32
  }
}

</mosaic_0001>

<bundles_post_ra>
// kernel: tpu_custom_call.1
= control target key start
LH: loop header
LB: loop body
LE: loop exit
PB: predicated region body
PF: predicated region fallthrough
CT: control target
= control target key end

     0   :  { %s3035_s0 = inlined_call_operand.hbm [shape: bf16[2,32,32], index: 0, kind: input, shape index: {}]   ;;  %s3036_s1 = inlined_call_operand.hbm [shape: bf16[32,32], index: 1, kind: input, shape index: {}]   ;;  %s3037_s2 = inlined_call_operand.vmem [shape: f32[1,32], index: 2, kind: input, shape index: {}]   ;;  %s3038_s3 = inlined_call_operand.hbm [shape: bf16[32,32], index: 3, kind: input, shape index: {}]   ;;  %s3039_s4 = inlined_call_operand.vmem [shape: f32[1,32], index: 4, kind: input, shape index: {}]   ;;  %s3040_s5 = inlined_call_operand.vmem [shape: bf16[32,32], index: 5, kind: input, shape index: {}]   ;;  %s3041_s6 = inlined_call_operand.hbm [shape: f32[1,32], index: 6, kind: input, shape index: {}]   ;;  %s3042_s7 = inlined_call_operand.hbm [shape: bf16[8,32], index: 7, kind: input, shape index: {}]   ;;  %s3043_s8 = inlined_call_operand.hbm [shape: bf16[8,32], index: 8, kind: input, shape index: {}]   ;;  %s3044_s9 = inlined_call_operand.vmem [shape: bf16[32,32], index: 9, kind: input, shape index: {}]   ;;  %s3045_s10 = inlined_call_operand.vmem [shape: f32[1,32], index: 10, kind: input, shape index: {}]   ;;  %s3046_s11 = inlined_call_operand.hbm [shape: f32[2,32,32], index: 11, kind: output, shape index: {}]  }
   0x1   :  { %3053 = sst [smem:[#allocation22_spill]] %s3036_s1 }
   0x2   :  { %3054 = sst [smem:[#allocation23_spill]] %s3044_s9 }
   0x3   :  { %3055 = sst [smem:[#allocation24_spill]] %s3045_s10 }
   0x4   :  { %3056 = sst [smem:[#allocation25_spill]] %s3046_s11 }
   0x5   :  { %16 = vsyncpa [#allocation6], 0 }
   0x6   :  { %18 = vsyncpa [#allocation6 + $0x1], 0 }
   0x7   :  { %19 = vsyncpa [#allocation9], 0 }
   0x8   :  { %20 = vsyncpa [#allocation12], 0 }
   0x9   :  { %21 = vsyncpa [#allocation15], 0 }
   0xa   :  { %22 = vsyncpa [#allocation7], 0 }
   0xb   :  { %24 = vsyncpa [#allocation7 + $0x1], 0  ;;  %s2485_s17 = smov 0   ;;  %s2487_s18 = smov 0  }
   0xc   :  { %s2489_s19 = smov 0   ;;  %s2491_s20 = smov 0  }
   0xd LB: > { %s2407_s21 = smov [#allocation8]   ;;  %s2506_s23 = sadd.s32 4294967295, %s2405_s20   ;;  %s2405_s20 = sphi %s2491_s20, %s3083_s20   ;;  %s2401_s19 = sphi %s2489_s19, %s3082_s19   ;;  %s2397_s18 = sphi %s2487_s18, %s3081_s18   ;;  %s2393_s17 = sphi %s2485_s17, %s3080_s17  }
   0xe   : > { %s309_s22 = sshll.u32 %s2407_s21, 4  ;;  %p1756_p0 = scmp.ge.s32.totalorder %s2405_s20, 1  ;;  %s2511_s22 = int_to_ptr.vmem [resolvable:$true] %s309_s22 }
   0xf   : > { %p3049_p1 = scmp.eq.s32.totalorder %s2506_s23, 0  ;;  %p297_p2 = scmp.lt.s32.totalorder %s2405_s20, 3 }
  0x10   : > { %s2408_s25 = smov [#allocation11]   ;;  %s2409_s28 = smov [#allocation10]  }
  0x11   : > { %p2513_p3 = pnand %p1756_p0, %p297_p2  ;;  %s345_s26 = sshll.u32 %s2408_s25, 4  ;;  %s2526_s26 = int_to_ptr.vmem [resolvable:$true] %s345_s26 }
  0x12   : > { %s325_s29 = sshll.u32 %s2409_s28, 4  ;;  %s3059_s1 = sld [smem:[#allocation22_spill]]  ;;  %s2528_s29 = int_to_ptr.vmem [resolvable:$true] %s325_s29 }
  0x13   : > { %s3057_s24 = scalar_select %p2513_p3, 1, 0 }
  0x14   : > { %p1997_p5 = pneg %p2513_p3 }
  0x16   : > { %p2522_p6 = pnand %p1997_p5, %p3049_p1 }
  0x18   : > { %s2157_s13 = scalar_lea.hbm %s3059_s1, 256  ;;  %p2538_p8 = pneg %p2522_p6 }
  0x19   : > { %p2158_p7 = scmp.ne.s32.totalorder %s3059_s1, %s2157_s13  ;;  %p2164_p11 = scmp.lt.u32.totalorder %s2157_s13, %s3059_s1 }
  0x1b   : > { %p2160_p9 = pnand %p2538_p8, %p2158_p7 }
  0x1d   : > { %p2161_p10 = pneg %p2160_p9 }
  0x1f   : > { %p2166_p12 = pnand %p2164_p11, %p2161_p10 }
  0x21   : > { %2169 = shalt.err (!%p2166_p12)
}
  0x22   : > { %s2170_s28 = scalar_lea.vmem %s2511_s22, 256  ;;  %p2178_p5 = scmp.lt.s32.totalorder %s2511_s22, %s2511_s22 }
  0x23   : > { %p2171_p13 = scmp.ne.s32.totalorder %s2511_s22, %s2170_s28  ;;  %p2179_p4 = scmp.lt.s32.totalorder %s2170_s28, %s2170_s28 }
  0x25   : > { %p2173_p0 = pnand %p2171_p13, %p2538_p8  ;;  %p2180_p7 = por %p2179_p4, %p2178_p5 }
  0x27   : > { %p2174_p2 = pneg %p2173_p0 }
  0x29   : > { %p2181_p9 = pnand %p2180_p7, %p2174_p2 }
  0x2b   : > { %2184 = shalt.err (!%p2181_p9)
}
  0x2c   : > { %s3051_s30 = smov 64   ;;  %s2411_s12 = smov 4  }
  0x2d   : > { %2000 = dma.hbm_to_vmem [thread:$0]  (!%p2522_p6), %s3059_s1, 256, %s2511_s22, [#allocation9], %s3051_s30, %s3051_s30, %s2411_s12  }
  0x2e   : > { %s2185_s25 = scalar_lea.hbm %s3041_s6, 16 }
  0x2f   : > { %p2186_p4 = scmp.ne.s32.totalorder %s3041_s6, %s2185_s25  ;;  %p2192_p12 = scmp.lt.u32.totalorder %s2185_s25, %s3041_s6 }
  0x31   : > { %p2188_p10 = pnand %p2186_p4, %p2538_p8 }
  0x33   : > { %p2189_p11 = pneg %p2188_p10 }
  0x35   : > { %p2194_p13 = pnand %p2192_p12, %p2189_p11 }
  0x37   : > { %2197 = shalt.err (!%p2194_p13)
}
  0x38   : > { %s2198_s22 = scalar_lea.vmem %s2526_s26, 16  ;;  %s2205_s11 = scalar_lea.vmem %s2526_s26, 32 }
  0x39   : > { %p2199_p0 = scmp.ne.s32.totalorder %s2526_s26, %s2198_s22  ;;  %p2206_p7 = scmp.lt.s32.totalorder %s2526_s26, %s2526_s26 }
  0x3a   : > { %p2207_p9 = scmp.lt.s32.totalorder %s2205_s11, %s2198_s22 }
  0x3b   : > { %p2201_p2 = pnand %p2199_p0, %p2538_p8 }
  0x3c   : > { %p2208_p4 = por %p2207_p9, %p2206_p7 }
  0x3d   : > { %p2202_p5 = pneg %p2201_p2 }
  0x3f   : > { %p2209_p10 = pnand %p2208_p4, %p2202_p5 }
  0x41   : > { %2212 = shalt.err (!%p2209_p10)
}
  0x42   : > { %2006 = dma.hbm_to_vmem [thread:$0]  (!%p2522_p6), %s3041_s6, 16, %s2526_s26, [#allocation12]  }
  0x43   : > { %s2213_s15 = scalar_lea.hbm %s3038_s3, 256 }
  0x44   : > { %p2214_p11 = scmp.ne.s32.totalorder %s3038_s3, %s2213_s15  ;;  %p2220_p0 = scmp.lt.u32.totalorder %s2213_s15, %s3038_s3 }
  0x46   : > { %p2216_p12 = pnand %p2214_p11, %p2538_p8 }
  0x48   : > { %p2217_p13 = pneg %p2216_p12 }
  0x4a   : > { %p2222_p2 = pnand %p2220_p0, %p2217_p13 }
  0x4c   : > { %2225 = shalt.err (!%p2222_p2)
}
  0x4d   : > { %s2226_s26 = scalar_lea.vmem %s2528_s29, 256  ;;  %p2234_p4 = scmp.lt.s32.totalorder %s2528_s29, %s2528_s29 }
  0x4e   : > { %p2227_p5 = scmp.ne.s32.totalorder %s2528_s29, %s2226_s26  ;;  %p2235_p10 = scmp.lt.s32.totalorder %s2226_s26, %s2226_s26 }
  0x50   : > { %p2229_p7 = pnand %p2227_p5, %p2538_p8  ;;  %p2236_p11 = por %p2235_p10, %p2234_p4 }
  0x52   : > { %p2230_p9 = pneg %p2229_p7 }
  0x54   : > { %p2237_p12 = pnand %p2236_p11, %p2230_p9 }
  0x56   : > { %2240 = shalt.err (!%p2237_p12)
}
  0x57   : > { %2003 = dma.hbm_to_vmem [thread:$0]  (!%p2522_p6), %s3038_s3, 256, %s2528_s29, [#allocation9], %s3051_s30, %s3051_s30, %s2411_s12  }
  0x58   : > { %s2412_s10 = smov [#allocation13]   ;;  %s2413_s14 = smov [#allocation14]  }
  0x59   : > { %s356_s13 = sshll.u32 %s2412_s10, 4  ;;  %s367_s15 = sshll.u32 %s2413_s14, 4  ;;  %s357_s13 = int_to_ptr.vmem [resolvable:$true] %s356_s13  ;;  %s368_s15 = int_to_ptr.vmem [resolvable:$true] %s367_s15 }
  0x5a   : > { %s2241_s28 = scalar_lea.hbm %s3042_s7, 64 }
  0x5b   : > { %p2242_p13 = scmp.ne.s32.totalorder %s3042_s7, %s2241_s28  ;;  %p2248_p5 = scmp.lt.u32.totalorder %s2241_s28, %s3042_s7 }
  0x5d   : > { %p2244_p0 = pnand %p2242_p13, %p2538_p8 }
  0x5f   : > { %p2245_p2 = pneg %p2244_p0 }
  0x61   : > { %p2250_p7 = pnand %p2248_p5, %p2245_p2 }
  0x63   : > { %2253 = shalt.err (!%p2250_p7)
}
  0x64   : > { %s2254_s29 = scalar_lea.vmem %s357_s13, 64  ;;  %p2262_p11 = scmp.lt.s32.totalorder %s357_s13, %s357_s13 }
  0x65   : > { %p2255_p9 = scmp.ne.s32.totalorder %s357_s13, %s2254_s29  ;;  %p2263_p12 = scmp.lt.s32.totalorder %s2254_s29, %s2254_s29 }
  0x67   : > { %p2257_p4 = pnand %p2255_p9, %p2538_p8  ;;  %p2264_p1 = por %p2263_p12, %p2262_p11 }
  0x69   : > { %p2258_p10 = pneg %p2257_p4 }
  0x6b   : > { %p2265_p3 = pnand %p2264_p1, %p2258_p10 }
  0x6d   : > { %2268 = shalt.err (!%p2265_p3)
}
  0x6e   : > { %2009 = dma.hbm_to_vmem [thread:$0]  (!%p2522_p6), %s3042_s7, 64, %s357_s13, [#allocation12]  }
  0x6f   : > { %s2269_s21 = scalar_lea.hbm %s3043_s8, 64 }
  0x70   : > { %p2270_p13 = scmp.ne.s32.totalorder %s3043_s8, %s2269_s21  ;;  %p2276_p3 = scmp.lt.u32.totalorder %s2269_s21, %s3043_s8 }
  0x72   : > { %p2272_p0 = pnand %p2270_p13, %p2538_p8 }
  0x74   : > { %p2273_p1 = pneg %p2272_p0 }
  0x76   : > { %p2278_p2 = pnand %p2276_p3, %p2273_p1 }
  0x78   : > { %2281 = shalt.err (!%p2278_p2)
}
  0x79   : > { %s2282_s11 = scalar_lea.vmem %s368_s15, 64  ;;  %p2290_p4 = scmp.lt.s32.totalorder %s368_s15, %s368_s15 }
  0x7a   : > { %p2283_p5 = scmp.ne.s32.totalorder %s368_s15, %s2282_s11  ;;  %p2291_p10 = scmp.lt.s32.totalorder %s2282_s11, %s2282_s11 }
  0x7c   : > { %p2285_p7 = pnand %p2283_p5, %p2538_p8  ;;  %p2292_p11 = por %p2291_p10, %p2290_p4 }
  0x7e   : > { %p2286_p9 = pneg %p2285_p7 }
  0x80   : > { %p2293_p12 = pnand %p2292_p11, %p2286_p9 }
  0x82   : > { %2296 = shalt.err (!%p2293_p12)
}
  0x83   : > { %2012 = dma.hbm_to_vmem [thread:$0]  (!%p2522_p6), %s3043_s8, 64, %s368_s15, [#allocation15]  }
  0x84   : > { %s1755_s16 = sadd.s32 4294967294, %s2405_s20   ;;  %s2650_s27 = sadd.s32 1, %s2405_s20  }
  0x85   : > { %s37_s9 = sadd.s32 1, %s2401_s19  ;;  %s34_s10 = ssub.s32 %s2405_s20, %s2650_s27 }
  0x86   : > { %p44_p8 = scmp.ne.s32.totalorder %s2401_s19, %s2397_s18  ;;  %p35_p13 = scmp.eq.s32.totalorder %s34_s10, 0 }
  0x87   : > { %p45_p0 = scmp.eq.s32.totalorder %s2405_s20, 0  ;;  %p50_p1 = scmp.ne.s32.totalorder %s2397_s18, %s2393_s17 }
  0x88   : > { %p284_p3 = scmp.eq.s32.totalorder %s2506_s23, 1  ;;  %p3061_p5 = scmp.eq.s32.totalorder %s2506_s23, 0 }
  0x89   : > { %s2662_s1 = scalar_select %p35_p13, %s2401_s19, %s37_s9  }
  0x8a   : > { %p46_p2 = por %p45_p0, %p44_p8  ;;  %p2666_p7 = por %p3061_p5, %p50_p1 }
  0x8b   : > { %p2670_p6 = por %p284_p3, %p44_p8  ;;  %p290_p9 = scmp.eq.s32.totalorder %s1755_s16, 1 }
  0x8c   : > { %p2026_p4 = scmp.lt.s32.totalorder %s2405_s20, 2  ;;  %s384_s21 = sand.u32 1, %s2401_s19  }
  0x8d   : > { %s3063_s15 = scalar_select %p2670_p6, 1, 0 }
  0x8e   : > { %p2676_p10 = por %p290_p9, %p50_p1  ;;  %s1763_s28 = sshll.u32 %s384_s21, 4 }
  0x8f   : > { %s1821_s22 = sshll.u32 %s2405_s20, 8  ;;  %s388_s29 = scalar_lea.vmem [#allocation5], %s1763_s28 }
  0x90   : > { %s3064_s25 = scalar_select %p2676_p10, 1, 0 }
  0x91   : > { %s2684_s13 = scalar_lea.hbm %s3035_s0, %s1821_s22  ;;  %s395_s9 = sshll.u32 %s388_s29, 4  ;;  %s2690_s9 = int_to_ptr.vmem [resolvable:$true] %s395_s9 }
  0x92   : > { %p2686_p11 = pnand %p2026_p4, %p46_p2  ;;  %s2692_s10 = scalar_lea.sflag [#allocation6], %s384_s21 }
  0x93   : > { %s2297_s30 = scalar_lea.hbm %s2684_s13, 256  ;;  %s2302_s26 = scalar_lea.hbm %s3035_s0, 512 }
  0x94   : > { %p2298_p12 = scmp.ne.s32.totalorder %s2684_s13, %s2297_s30  ;;  %p2299_p8 = pneg %p2686_p11 }
  0x95   : > { %p2303_p1 = scmp.lt.u32.totalorder %s2684_s13, %s3035_s0  ;;  %p2304_p3 = scmp.lt.u32.totalorder %s2302_s26, %s2297_s30 }
  0x96   : > { %p2300_p13 = pnand %p2299_p8, %p2298_p12  ;;  %p2306_p5 = scmp.lt.u32.totalorder %s2297_s30, %s2684_s13 }
  0x97   : > { %p2305_p2 = por %p2304_p3, %p2303_p1 }
  0x98   : > { %p2301_p0 = pneg %p2300_p13 }
  0x99   : > { %p2307_p9 = por %p2306_p5, %p2305_p2 }
  0x9b   : > { %p2308_p4 = pnand %p2307_p9, %p2301_p0 }
  0x9d   : > { %2311 = shalt.err (!%p2308_p4)
}
  0x9e   : > { %s2312_s21 = scalar_lea.vmem %s2690_s9, 256  ;;  %s2414_s28 = smov [#allocation5]  }
  0x9f   : > { %p2313_p12 = scmp.ne.s32.totalorder %s2690_s9, %s2312_s21  ;;  %s2317_s22 = sshll.u32 %s2414_s28, 4  ;;  %s2318_s22 = int_to_ptr.vmem [resolvable:$false] %s2317_s22 }
  0xa0   : > { %s2319_s11 = scalar_lea.vmem %s2318_s22, 512  ;;  %p2320_p6 = scmp.lt.s32.totalorder %s2690_s9, %s2318_s22 }
  0xa1   : > { %p2315_p13 = pnand %p2313_p12, %p2299_p8  ;;  %p2321_p1 = scmp.lt.s32.totalorder %s2319_s11, %s2312_s21 }
  0xa3   : > { %p2316_p10 = pneg %p2315_p13  ;;  %p2322_p3 = por %p2321_p1, %p2320_p6 }
  0xa5   : > { %p2323_p2 = pnand %p2322_p3, %p2316_p10 }
  0xa7   : > { %2326 = shalt.err (!%p2323_p2)
}
  0xa8   : > { %s3066_s30 = smov 64   ;;  %p3067_p8 = scmp.ne.s32.totalorder %s3057_s24, 0 }
  0xa9   : > { %2016 = dma.hbm_to_vmem [thread:$0]  (!%p2686_p11), %s2684_s13, 256, %s2690_s9, %s2692_s10, %s3066_s30, %s3066_s30, %s2411_s12  }
  0xaa   : > { %407 = sbr.rel (%p3067_p8) target bundleno = 1943 (0x797), region = 64  ;;  %s2726_s26 = sand.u32 (!%p3067_p8), 1, %s2397_s18  }
  0xab   : > { %s1767_s29 = sshll.u32 (!%p3067_p8), %s2726_s26, 4  ;;  %s410_s21 = scalar_lea.sflag (!%p3067_p8), [#allocation6], %s2726_s26 }
  0xac   : > { %s413_s28 = scalar_lea.vmem (!%p3067_p8), [#allocation5], %s1767_s29 }
  0xb1   : > { %2372 = dma.done.wait (%p2666_p7), %s410_s21, 256  }
  0xb2   : > { %2374 = vsyncadd (%p2666_p7), %s410_s21, 4294967040  ;;  %p3068_p6 = scmp.eq.s32.totalorder %s2506_s23, 0 }
  0xb4   : > { %2376 = dma.done.wait (%p3068_p6), [#allocation9], 512   ;;  %p3069_p10 = pmov %p3068_p6 }
  0xb5   : > { %p3070_p11 = pmov %p3068_p6 }
  0xb6   : > { %2378 = vsyncadd (%p3069_p10), [#allocation9], 4294966784 }
  0xb7   : > { %2380 = dma.done.wait (%p3070_p11), [#allocation12], 80   ;;  %p3071_p0 = pmov %p3068_p6 }
  0xb9   : > { %2382 = vsyncadd (%p3071_p0), [#allocation12], 4294967216  ;;  %p3072_p5 = pmov %p3071_p0 }
  0xba   : > { %p3073_p9 = pmov %p3071_p0 }
  0xbb   : > { %2384 = dma.done.wait (%p3072_p5), [#allocation15], 64  }
  0xbc   : > { %2386 = vsyncadd (%p3073_p9), [#allocation15], 4294967232  ;;  %v2081_v0 = vld [vmem:[#allocation10] sm:$0xff]   ;;  %v2082_v1 = vld [vmem:[#allocation10 + $0x8] sm:$0xff]   ;;  %vm512_vm0 = vcmask 261120   ;;  %v2415_v6 = vmov 0.0  }
  0xbd   : > { %1869 = vmatprep.subr.bf16.mxu0 %v2081_v0  ;;  %v2083_v2 = vld [vmem:[%s413_s28] sm:$0xff]   ;;  %v2084_v3 = vld [vmem:[%s413_s28 + $0x8] sm:$0xff]   ;;  %1877 = vmatprep.subr.bf16.mxu1 %v2415_v6  ;;  %vm2416_vm1 = vmmov 0   ;;  %s2417_s11 = smov 120   ;;  %vm811_vm2 = vcmask 64512   ;;  %vm614_vm3 = vcmask 257024  }
  0xbe   : > { %1870 = vmatpush3.bf16.msra.mxu0 %v2081_v0  ;;  %1873 = vmatprep.mubr.msk.bf16.mxu0 %vm512_vm0, %v2083_v2  ;;  %v2085_v4 = vld [vmem:[%s3040_s5] sm:$0xff]   ;;  %v2086_v5 = vld [vmem:[%s3040_s5 + $0x8] sm:$0xff]   ;;  %v2087_v7 = vld [vmem:[#allocation8] sm:$0xff]   ;;  %s2418_s30 = smov 112   ;;  %s2419_s29 = smov 104   ;;  %vm922_vm4 = vcmask 1043456  }
  0xbf   : > { %1871 = vmatprep.subr.bf16.mxu0 %v2082_v1  ;;  %v2088_v8 = vld [vmem:[#allocation8 + $0x8] sm:$0xff]   ;;  %1881 = vmatprep.mubr.msk.bf16.mxu1 %vm2416_vm1, %v2415_v6  ;;  %v477_v20 = vld [vmem:[#allocation13] sm:$0xf]  ;;  %v1782_v21 = vld [vmem:[#allocation11] ss:$0 sm:$0xff]  ;;  %s2420_s21 = smov 8  }
  0xc0   : > { %v1774_v10 = vld [vmem:[%s3039_s4] ss:$0 sm:$0xff]  ;;  %s2421_s28 = smov 16   ;;  %s3074_s14 = sld [smem:[#allocation23_spill]]  ;;  %vm1167_vm5 = vcmask 130112   ;;  %vm1350_vm6 = vcmask 195712  }
  0xc1   : > { %v1788_v33 = vld [vmem:[%s3037_s2] ss:$0 sm:$0xff]  ;;  %s2422_s16 = smov 24   ;;  %vm1533_vm7 = vcmask 261312   ;;  %s1773_s10 = sshll.u32 %s2726_s26, 5 }
  0xc2   : > { %1872 = vmatpush3.bf16.msra.mxu0 %v2082_v1  ;;  %v478_v35 = vld [vmem:[#allocation14] sm:$0xf]  ;;  %s1822_s24 = sshll.u32 %s2506_s23, 9  ;;  %s3076_s9 = sld [smem:[#allocation25_spill]] }
  0xc3   : > { %1885 = vmatprep.subr.bf16.mxu0 %v2085_v4  ;;  %s1621_s23 = scalar_lea.sflag [#allocation7], %s2726_s26  ;;  %p3077_p4 = scmp.ne.s32.totalorder %s3063_s15, 0 }
  0xc4   : > { %s2423_s22 = smov [#allocation16]  }
  0xc5   : > { %1874 = vmatmul.mubr.msk.bf16.vlgmr.msra.gmra.mrb[0].mxu0 %vm512_vm0, %v2084_v3 }
  0xc6   : > { %1886 = vmatpush3.bf16.msra.mxu0 %v2085_v4  ;;  %1889 = vmatprep.mubr.msk.bf16.mxu0 %vm512_vm0, %v2083_v2 }
  0xc7   : > { %1887 = vmatprep.subr.bf16.mxu0 %v2086_v5 }
  0xca   : > { %1888 = vmatpush3.bf16.msra.mxu0 %v2086_v5 }
  0xcb   : > { %1901 = vmatprep.subr.bf16.mxu0 %v2087_v7 }
  0xcd   : > { %1890 = vmatmul.mubr.msk.bf16.vlgmr.msra.gmra.mrb[4].mxu0 %vm512_vm0, %v2084_v3 }
  0xce   : > { %1905 = vmatprep.mubr.msk.bf16.mxu0 %vm512_vm0, %v2083_v2  ;;  %1902 = vmatpush3.bf16.msra.mxu0 %v2087_v7 }
  0xcf   : > { %1903 = vmatprep.subr.bf16.mxu0 %v2088_v8 }
  0xd2   : > { %1904 = vmatpush3.bf16.msra.mxu0 %v2088_v8 }
  0xd5   : > { %1906 = vmatmul.mubr.msk.bf16.vlgmr.msra.gmra.mrb[8].mxu0 %vm512_vm0, %v2084_v3 }
 0x198   : > { %v1875_v9 = vpop.f32.mrb[0].mxu0 }
 0x199   : > { %v553_v11 = vpop.f32.mrb[1].mxu0  ;;  %v562_v13 = vadd.f32 %v1875_v9, %v1774_v10 }
 0x19a   : > { %v1876_v12 = vpop.f32.mrb[2].mxu0  ;;  %v554_v16 = vadd.f32 %v1774_v10, %v553_v11 }
 0x19b   : > { %v565_v14 = vadd.f32 %v1876_v12, %v1774_v10  ;;  %v556_v15 = vpop.f32.mrb[3].mxu0 }
 0x19c   : > { %v557_v17 = vadd.f32 %v1774_v10, %v556_v15 }
 0x19d   : > { %v569_v18 = vpack.c.bf16 %v565_v14, %v562_v13 }
 0x19e   : > { %v568_v19 = vpack.c.bf16 %v557_v17, %v554_v16 }
 0x1a0   : > { %1878 = vmatpush3.bf16.msra.mxu1 %v568_v19  ;;  %v1891_v22 = vpop.f32.mrb[4].mxu0 }
 0x1a1   : > { %1879 = vmatprep.subr.bf16.mxu1 %v2415_v6  ;;  %v682_v23 = vadd.f32 %v1891_v22, %v1782_v21  ;;  %v673_v24 = vpop.f32.mrb[5].mxu0 }
 0x1a2   : > { %v674_v25 = vadd.f32 %v1782_v21, %v673_v24  ;;  %v1892_v26 = vpop.f32.mrb[6].mxu0 }
 0x1a3   : > { %v685_v27 = vadd.f32 %v1892_v26, %v1782_v21  ;;  %v676_v28 = vpop.f32.mrb[7].mxu0 }
 0x1a4   : > { %1880 = vmatpush3.bf16.msra.mxu1 %v569_v18  ;;  %v677_v29 = vadd.f32 %v1782_v21, %v676_v28 }
 0x1a5   : > { %1893 = vmatprep.subr.bf16.mxu1 %v2415_v6  ;;  %v689_v30 = vpack.c.bf16 %v685_v27, %v682_v23 }
 0x1a6   : > { %v688_v31 = vpack.c.bf16 %v677_v29, %v674_v25 }
 0x1a7   : > { %1882 = vmatmul.mubr.msk.bf16.vlgmr.msra.gmra.mrb[0].mxu1 %vm512_vm0, %v477_v20 }
 0x1a8   : > { %1897 = vmatprep.mubr.msk.bf16.mxu1 %vm2416_vm1, %v2415_v6  ;;  %1894 = vmatpush3.bf16.msra.mxu1 %v688_v31  ;;  %v1907_v32 = vpop.f32.mrb[8].mxu0 }
 0x1a9   : > { %1895 = vmatprep.subr.bf16.mxu1 %v2415_v6  ;;  %v792_v34 = vpop.f32.mrb[9].mxu0  ;;  %v801_v36 = vadd.f32 %v1907_v32, %v1788_v33 }
 0x1aa   : > { %v793_v37 = vadd.f32 %v1788_v33, %v792_v34  ;;  %v1908_v38 = vpop.f32.mrb[10].mxu0 }
 0x1ab   : > { %v804_v39 = vadd.f32 %v1908_v38, %v1788_v33  ;;  %v795_v40 = vpop.f32.mrb[11].mxu0 }
 0x1ac   : > { %1896 = vmatpush3.bf16.msra.mxu1 %v689_v30  ;;  %v796_v41 = vadd.f32 %v1788_v33, %v795_v40 }
 0x1ad   : > { %v808_v42 = vpack.c.bf16 %v804_v39, %v801_v36 }
 0x1ae   : > { %v807_v43 = vpack.c.bf16 %v796_v41, %v793_v37 }
 0x1af   : > { %1898 = vmatmul.mubr.msk.bf16.vlgmr.msra.gmra.mrb[4].mxu1 %vm512_vm0, %v478_v35  ;;  %983 = vrot.lane.b32.xlu1 %v808_v42, %s2417_s11 }
 0x1b0   : > { %1911 = vmatprep.mubr.msk.bf16.mxu1 %vm811_vm2, %v807_v43 }
 0x221   : > { %v984_v59 = vpop.permute.xlu1 %983 }
 0x27a   : > { %v607_v44 = vpop.f32.mrb[0].mxu1 }
 0x27b   : > { %v613_v45 = vpack.c.bf16 %v607_v44, %v607_v44  ;;  %v1883_v46 = vpop.f32.mrb[1].mxu1 }
 0x27c   : > { %v610_v47 = vpop.f32.mrb[2].mxu1 }
 0x27d   : > { %615 = vst.msk [vmem:[#allocation2] sm:$0xf] %vm614_vm3, %v613_v45  ;;  %v1884_v48 = vpop.f32.mrb[3].mxu1 }
 0x282   : > { %v727_v52 = vpop.f32.mrb[4].mxu1 }
 0x283   : > { %v733_v53 = vpack.c.bf16 %v727_v52, %v727_v52  ;;  %v1899_v54 = vpop.f32.mrb[5].mxu1 }
 0x284   : > { %v809_v49 = vld [vmem:[#allocation2] sm:$0xf]  ;;  %v730_v55 = vpop.f32.mrb[6].mxu1 }
 0x285   : > { %1965 = vmatprep.subr.msk.bf16.mxu1 %vm811_vm2, %v809_v49  ;;  %v819_v50 = vsel %vm811_vm2, %v809_v49, 0  ;;  %v1797_v51 = vcombine.low %v809_v49, %v809_v49  ;;  %734 = vst.msk [vmem:[#allocation3] sm:$0xf] %vm614_vm3, %v733_v53  ;;  %v1900_v56 = vpop.f32.mrb[7].mxu1 }
 0x286   : > { %1910 = vmatpush3.bf16.xpose.msra.mxu1 %v819_v50 }
 0x287   : > { %1174 = vrot.lane.b32.xlu1 %v1797_v51, %s2418_s30  ;;  %988 = vrot.lane.b32.xlu0 %v1797_v51, %s2417_s11 }
 0x28b   : > { %1172 = vrot.lane.b32.xlu1 %v808_v42, %s2418_s30  ;;  %981 = vrot.lane.b32.xlu0 %v807_v43, %s2417_s11 }
 0x28c   : > { %v2783_v57 = vld [vmem:[#allocation3] sm:$0xf] }
 0x28d   : > { %1912 = vmatmul.mubr.msk.bf16.vlgmr.msra.gmra.mrb[8].mxu1 %vm811_vm2, %v808_v42  ;;  %1966 = vmatprep.subr.msk.bf16.mxu0 %vm922_vm4, %v2783_v57  ;;  %v924_v58 = vsel %vm922_vm4, %v2783_v57, 0 }
 0x28e   : > { %1916 = vmatpush3.bf16.msra.mxu0 %v924_v58 }
 0x28f   : > { %1353 = vrot.lane.b32.xlu1 %v807_v43, %s2419_s29  ;;  %1170 = vrot.lane.b32.xlu0 %v807_v43, %s2418_s30 }
 0x293   : > { %1357 = vrot.lane.b32.xlu0 %v1797_v51, %s2419_s29 }
 0x297   : > { %1355 = vrot.lane.b32.xlu0 %v808_v42, %s2419_s29 }
 0x2f9   : > { %v989_v60 = vpop.permute.xlu0 %988  ;;  %v1175_v62 = vpop.permute.xlu1 %1174 }
 0x2fa   : > { %v997_v61 = vsel %vm811_vm2, %v989_v60, 0  ;;  %1967 = vmatprep.subr.msk.bf16.mxu1 %vm811_vm2, %v989_v60  ;;  %v1183_v1 = vsel %vm811_vm2, %v1175_v62, 0 }
 0x2fb   : > { %1922 = vmatpush3.bf16.xpose.msra.mxu1 %v997_v61 }
 0x2fc   : > { %1969 = vmatprep.subr.msk.bf16.mxu1 %vm811_vm2, %v1175_v62 }
 0x2fd   : > { %v982_v63 = vpop.permute.xlu0 %981  ;;  %v1173_v2 = vpop.permute.xlu1 %1172 }
 0x2fe   : > { %1923 = vmatprep.mubr.msk.bf16.mxu1 %vm811_vm2, %v982_v63 }
 0x301   : > { %v1171_v0 = vpop.permute.xlu0 %1170  ;;  %v1354_v4 = vpop.permute.xlu1 %1353 }
 0x302   : > { %1924 = vmatmul.mubr.msk.bf16.vlgmr.msra.gmra.mrb[12].mxu1 %vm811_vm2, %v984_v59 }
 0x303   : > { %1934 = vmatpush3.bf16.xpose.msra.mxu1 %v1183_v1  ;;  %1935 = vmatprep.mubr.msk.bf16.mxu1 %vm811_vm2, %v1171_v0 }
 0x305   : > { %v1358_v3 = vpop.permute.xlu0 %1357 }
 0x306   : > { %1971 = vmatprep.subr.msk.bf16.mxu1 %vm811_vm2, %v1358_v3  ;;  %v1366_v5 = vsel %vm811_vm2, %v1358_v3, 0 }
 0x309   : > { %v1356_v6 = vpop.permute.xlu0 %1355 }
 0x30a   : > { %1936 = vmatmul.mubr.msk.bf16.vlgmr.msra.gmra.mrb[16].mxu1 %vm811_vm2, %v1173_v2 }
 0x30b   : > { %1946 = vmatpush3.bf16.xpose.msra.mxu1 %v1366_v5  ;;  %1947 = vmatprep.mubr.msk.bf16.mxu1 %vm811_vm2, %v1354_v4 }
 0x312   : > { %1948 = vmatmul.mubr.msk.bf16.vlgmr.msra.gmra.mrb[20].mxu1 %vm811_vm2, %v1356_v6 }
 0x360   : > { %v1913_v7 = vpop.f32.mrb[8].mxu1 }
 0x361   : > { %v855_v8 = vpop.f32.mrb[9].mxu1  ;;  %v876_v14 = vsel %vm811_vm2, %v1913_v7, -inf }
 0x362   : > { %v1914_v9 = vpop.f32.mrb[10].mxu1  ;;  %v870_v10 = vsel %vm811_vm2, %v855_v8, -inf }
 0x363   : > { %871 = vmax.xlane.f32.xlu1 %v870_v10  ;;  %v858_v11 = vpop.f32.mrb[11].mxu1  ;;  %v879_v13 = vsel %vm811_vm2, %v1914_v9, -inf }
 0x364   : > { %v873_v12 = vsel %vm811_vm2, %v858_v11, -inf }
 0x365   : > { %874 = vmax.xlane.f32.xlu0 %v873_v12 }
 0x367   : > { %880 = vmax.xlane.f32.xlu1 %v879_v13 }
 0x369   : > { %877 = vmax.xlane.f32.xlu0 %v876_v14 }
 0x3d5   : > { %v2805_v15 = vpop.f32.mrb[12].mxu1 }
 0x3d6   : > { %v2807_v16 = vpop.f32.mrb[13].mxu1  ;;  %v1054_v21 = vsel %vm811_vm2, %v2805_v15, -inf }
 0x3d7   : > { %v2809_v17 = vpop.f32.mrb[14].mxu1  ;;  %v1048_v18 = vsel %vm811_vm2, %v2807_v16, -inf }
 0x3d8   : > { %v2813_v19 = vpop.f32.mrb[15].mxu1  ;;  %1049 = vmax.xlane.f32.xlu0 %v1048_v18  ;;  %v1057_v20 = vsel %vm811_vm2, %v2809_v17, -inf }
 0x3d9   : > { %1058 = vmax.xlane.f32.xlu1 %v1057_v20  ;;  %v1051_v22 = vsel %vm811_vm2, %v2813_v19, -inf }
 0x3dc   : > { %1055 = vmax.xlane.f32.xlu0 %v1054_v21 }
 0x3dd   : > { %v2821_v23 = vpop.f32.mrb[16].mxu1  ;;  %1052 = vmax.xlane.f32.xlu1 %v1051_v22 }
 0x3de   : > { %v2823_v24 = vpop.f32.mrb[17].mxu1  ;;  %v1240_v29 = vsel %vm811_vm2, %v2821_v23, -inf }
 0x3df   : > { %v2825_v25 = vpop.f32.mrb[18].mxu1  ;;  %v1234_v26 = vsel %vm811_vm2, %v2823_v24, -inf }
 0x3e0   : > { %v2829_v27 = vpop.f32.mrb[19].mxu1  ;;  %1235 = vmax.xlane.f32.xlu0 %v1234_v26  ;;  %v1243_v28 = vsel %vm811_vm2, %v2825_v25, -inf }
 0x3e1   : > { %1244 = vmax.xlane.f32.xlu1 %v1243_v28  ;;  %v1237_v30 = vsel %vm811_vm2, %v2829_v27, -inf }
 0x3e4   : > { %1241 = vmax.xlane.f32.xlu0 %v1240_v29 }
 0x3e5   : > { %v2837_v31 = vpop.f32.mrb[20].mxu1  ;;  %1238 = vmax.xlane.f32.xlu1 %v1237_v30 }
 0x3e6   : > { %v2839_v32 = vpop.f32.mrb[21].mxu1  ;;  %v1423_v37 = vsel %vm811_vm2, %v2837_v31, -inf }
 0x3e7   : > { %v2841_v33 = vpop.f32.mrb[22].mxu1  ;;  %v1417_v34 = vsel %vm811_vm2, %v2839_v32, -inf }
 0x3e8   : > { %v2845_v35 = vpop.f32.mrb[23].mxu1  ;;  %1418 = vmax.xlane.f32.xlu0 %v1417_v34  ;;  %v1426_v36 = vsel %vm811_vm2, %v2841_v33, -inf }
 0x3e9   : > { %1427 = vmax.xlane.f32.xlu1 %v1426_v36  ;;  %v1420_v38 = vsel %vm811_vm2, %v2845_v35, -inf }
 0x3ec   : > { %1424 = vmax.xlane.f32.xlu0 %v1423_v37 }
 0x3ed   : > { %1421 = vmax.xlane.f32.xlu1 %v1420_v38 }
 0x3f0   : > { %v872_v39 = vpop.xlane.xlu1 %871 }
 0x3f1   : > { %v882_v43 = vsub.f32 %v855_v8, %v872_v39 }
 0x3f2   : > { %v875_v40 = vpop.xlane.xlu0 %874 }
 0x3f3   : > { %v883_v41 = vsub.f32 %v858_v11, %v875_v40  ;;  %v886_v49 = vmul.f32 1.442695, %v882_v43 }
 0x3f4   : > { %v881_v42 = vpop.xlane.xlu1 %880 }
 0x3f5   : > { %v885_v44 = vsub.f32 %v1914_v9, %v881_v42  ;;  %v888_v45 = vmul.f32 1.442695, %v883_v41 }
 0x3f6   : > { %v878_v46 = vpop.xlane.xlu0 %877 }
 0x3f7   : > { %v892_v47 = vmul.f32 1.442695, %v885_v44  ;;  %v884_v48 = vsub.f32 %v1913_v7, %v878_v46 }
 0x3f9   : > { %2093 = vpow2.f32 %v892_v47  ;;  %v890_v50 = vmul.f32 1.442695, %v884_v48 }
 0x3fa   : > { %2095 = vpow2.f32 %v888_v45 }
 0x3fb   : > { %2097 = vpow2.f32 %v890_v50 }
 0x3fc   : > { %2099 = vpow2.f32 %v886_v49 }
 0x403   : > { %v2853_v51 = vpop.eup %2093 }
 0x404   : > { %v2855_v52 = vpop.eup %2095  ;;  %v903_v53 = vsel %vm811_vm2, %v2853_v51, 0.0 }
 0x405   : > { %v2859_v54 = vpop.eup %2097  ;;  %904 = vadd.xlane.f32.xlu1 %v903_v53  ;;  %v897_v58 = vsel %vm811_vm2, %v2855_v52, 0.0  ;;  %v1800_v53 = vcombine.low %v2783_v57, %v2783_v57 }
 0x406   : > { %v900_v55 = vsel %vm811_vm2, %v2859_v54, 0.0  ;;  %v2863_v56 = vpop.eup %2099 }
 0x407   : > { %901 = vadd.xlane.f32.xlu0 %v900_v55  ;;  %v894_v59 = vsel %vm811_vm2, %v2863_v56, 0.0 }
 0x409   : > { %898 = vadd.xlane.f32.xlu1 %v897_v58 }
 0x40b   : > { %895 = vadd.xlane.f32.xlu0 %v894_v59 }
 0x465   : > { %v1050_v60 = vpop.xlane.xlu0 %1049 }
 0x466   : > { %v1059_v61 = vpop.xlane.xlu1 %1058  ;;  %v1060_v63 = vsub.f32 %v2807_v16, %v1050_v60 }
 0x467   : > { %v1063_v62 = vsub.f32 %v2809_v17, %v1059_v61 }
 0x468   : > { %v1064_v5 = vmul.f32 1.442695, %v1060_v63 }
 0x469   : > { %v1070_v0 = vmul.f32 1.442695, %v1063_v62  ;;  %v1056_v1 = vpop.xlane.xlu0 %1055 }
 0x46a   : > { %v1062_v2 = vsub.f32 %v2805_v15, %v1056_v1  ;;  %v1053_v3 = vpop.xlane.xlu1 %1052 }
 0x46b   : > { %2101 = vpow2.f32 %v1070_v0  ;;  %v1061_v4 = vsub.f32 %v2813_v19, %v1053_v3 }
 0x46c   : > { %v1068_v6 = vmul.f32 1.442695, %v1062_v2 }
 0x46d   : > { %v1066_v7 = vmul.f32 1.442695, %v1061_v4  ;;  %v1236_v8 = vpop.xlane.xlu0 %1235 }
 0x46e   : > { %2103 = vpow2.f32 %v1068_v6  ;;  %v1245_v9 = vpop.xlane.xlu1 %1244  ;;  %v1246_v11 = vsub.f32 %v2823_v24, %v1236_v8 }
 0x46f   : > { %2105 = vpow2.f32 %v1066_v7  ;;  %v1249_v10 = vsub.f32 %v2825_v25, %v1245_v9 }
 0x470   : > { %2107 = vpow2.f32 %v1064_v5  ;;  %v1250_v17 = vmul.f32 1.442695, %v1246_v11 }
 0x471   : > { %v1256_v12 = vmul.f32 1.442695, %v1249_v10  ;;  %v1242_v13 = vpop.xlane.xlu0 %1241 }
 0x472   : > { %v1248_v14 = vsub.f32 %v2821_v23, %v1242_v13  ;;  %v1239_v15 = vpop.xlane.xlu1 %1238 }
 0x473   : > { %2109 = vpow2.f32 %v1256_v12  ;;  %v1247_v16 = vsub.f32 %v2829_v27, %v1239_v15 }
 0x474   : > { %v1254_v18 = vmul.f32 1.442695, %v1248_v14 }
 0x475   : > { %v2877_v19 = vpop.eup %2101  ;;  %v1252_v20 = vmul.f32 1.442695, %v1247_v16  ;;  %v1419_v21 = vpop.xlane.xlu0 %1418 }
 0x476   : > { %2111 = vpow2.f32 %v1254_v18  ;;  %v1081_v22 = vsel %vm811_vm2, %v2877_v19, 0.0  ;;  %v1429_v23 = vsub.f32 %v2839_v32, %v1419_v21  ;;  %v1428_v45 = vpop.xlane.xlu1 %1427 }
 0x477   : > { %2113 = vpow2.f32 %v1252_v20  ;;  %1082 = vadd.xlane.f32.xlu1 %v1081_v22  ;;  %v1432_v63 = vsub.f32 %v2841_v33, %v1428_v45 }
 0x478   : > { %v2881_v24 = vpop.eup %2103  ;;  %2115 = vpow2.f32 %v1250_v17  ;;  %v1433_v34 = vmul.f32 1.442695, %v1429_v23 }
 0x479   : > { %v2884_v25 = vpop.eup %2105  ;;  %v1425_v26 = vpop.xlane.xlu0 %1424  ;;  %v1078_v27 = vsel %vm811_vm2, %v2881_v24, 0.0  ;;  %v1439_v4 = vmul.f32 1.442695, %v1432_v63 }
 0x47a   : > { %v2888_v28 = vpop.eup %2107  ;;  %v1431_v29 = vsub.f32 %v2837_v31, %v1425_v26  ;;  %1079 = vadd.xlane.f32.xlu0 %v1078_v27  ;;  %v1075_v30 = vsel %vm811_vm2, %v2884_v25, 0.0  ;;  %v1422_v49 = vpop.xlane.xlu1 %1421 }
 0x47b   : > { %1076 = vadd.xlane.f32.xlu1 %v1075_v30  ;;  %v1072_v32 = vsel %vm811_vm2, %v2888_v28, 0.0  ;;  %v1430_v5 = vsub.f32 %v2845_v35, %v1422_v49 }
 0x47c   : > { %v1437_v36 = vmul.f32 1.442695, %v1431_v29 }
 0x47d   : > { %v2893_v37 = vpop.eup %2109  ;;  %v1435_v33 = vmul.f32 1.442695, %v1430_v5 }
 0x47e   : > { %2117 = vpow2.f32 %v1437_v36  ;;  %1073 = vadd.xlane.f32.xlu0 %v1072_v32  ;;  %v1267_v38 = vsel %vm811_vm2, %v2893_v37, 0.0 }
 0x47f   : > { %1268 = vadd.xlane.f32.xlu1 %v1267_v38  ;;  %2119 = vpow2.f32 %v1433_v34 }
 0x480   : > { %v2899_v39 = vpop.eup %2111 }
 0x481   : > { %v2901_v31 = vpop.eup %2113  ;;  %v1264_v40 = vsel %vm811_vm2, %v2899_v39, 0.0 }
 0x482   : > { %v2905_v41 = vpop.eup %2115  ;;  %1265 = vadd.xlane.f32.xlu0 %v1264_v40  ;;  %v1261_v42 = vsel %vm811_vm2, %v2901_v31, 0.0 }
 0x483   : > { %1262 = vadd.xlane.f32.xlu1 %v1261_v42  ;;  %v1258_v43 = vsel %vm811_vm2, %v2905_v41, 0.0 }
 0x486   : > { %1259 = vadd.xlane.f32.xlu0 %v1258_v43 }
 0x488   : > { %v2911_v44 = vpop.eup %2117 }
 0x489   : > { %v1447_v46 = vsel %vm811_vm2, %v2911_v44, 0.0  ;;  %v2915_v47 = vpop.eup %2119 }
 0x48a   : > { %1448 = vadd.xlane.f32.xlu0 %v1447_v46  ;;  %v1441_v48 = vsel %vm811_vm2, %v2915_v47, 0.0 }
 0x48e   : > { %1442 = vadd.xlane.f32.xlu0 %v1441_v48 }
 0x492   : > { %v905_v50 = vpop.xlane.xlu1 %904 }
 0x494   : > { %1280 = vrot.lane.b32.xlu1 %v1800_v53, %s2418_s30  ;;  %v902_v55 = vpop.xlane.xlu0 %901  ;;  %s3075_s30 = sld [smem:[#allocation24_spill]] }
 0x495   : > { %2121 = vrcp.f32 %v902_v55 }
 0x496   : > { %v899_v58 = vpop.xlane.xlu1 %898 }
 0x497   : > { %2123 = vrcp.f32 %v899_v58 }
 0x498   : > { %2125 = vrcp.f32 %v905_v50  ;;  %v896_v59 = vpop.xlane.xlu0 %895 }
 0x499   : > { %2127 = vrcp.f32 %v896_v59 }
 0x49a   : > { %2129 = vpow2.f32 %v1439_v4 }
 0x49b   : > { %2131 = vpow2.f32 %v1435_v33 }
 0x49f   : > { %v2122_v60 = vpop.eup %2121 }
 0x4a0   : > { %v912_v1 = vmul.f32 %v2122_v60, %v2859_v54 }
 0x4a1   : > { %v2124_v61 = vpop.eup %2123 }
 0x4a2   : > { %v2126_v62 = vpop.eup %2125  ;;  %v911_v2 = vmul.f32 %v2124_v61, %v2855_v52 }
 0x4a3   : > { %v2128_v0 = vpop.eup %2127  ;;  %v913_v3 = vmul.f32 %v2126_v62, %v2853_v51 }
 0x4a4   : > { %1097 = vrot.lane.b32.xlu0 %v1800_v53, %s2417_s11  ;;  %v910_v57 = vmul.f32 %v2128_v0, %v2863_v56  ;;  %v2931_v54 = vpop.eup %2129  ;;  %s2331_s11 = sshll.u32 %s2423_s22, 4  ;;  %s2332_s11 = int_to_ptr.vmem [resolvable:$false] %s2331_s11 }
 0x4a5   : > { %v915_v7 = vpack.c.bf16 %v913_v3, %v912_v1  ;;  %v1450_v56 = vsel %vm811_vm2, %v2931_v54, 0.0  ;;  %v2935_v52 = vpop.eup %2131 }
 0x4a6   : > { %v914_v6 = vpack.c.bf16 %v911_v2, %v910_v57  ;;  %v1444_v35 = vsel %vm811_vm2, %v2935_v52, 0.0 }
 0x4a8   : > { %1917 = vmatprep.mubr.msk.bf16.mxu0 %vm811_vm2, %v914_v6 }
 0x4a9   : > { %1918 = vmatmul.mubr.msk.bf16.vlgmr.msra.gmra.mrb[12].mxu0 %vm811_vm2, %v915_v7 }
 0x4b8   : > { %1451 = vadd.xlane.f32.xlu1 %v1450_v56 }
 0x4bc   : > { %1445 = vadd.xlane.f32.xlu1 %v1444_v35 }
 0x4cd   : > { %1463 = vrot.lane.b32.xlu1 %v1800_v53, %s2419_s29  ;;  %s471_s29 = scalar_lea.vmem [#allocation16], %s1773_s10 }
 0x504   : > { %v1083_v51 = vpop.xlane.xlu1 %1082 }
 0x507   : > { %v1080_v8 = vpop.xlane.xlu0 %1079 }
 0x508   : > { %v1077_v9 = vpop.xlane.xlu1 %1076 }
 0x509   : > { %2133 = vrcp.f32 %v1077_v9  ;;  %v2091_v9 = vld [vmem:[%s3074_s14] sm:$0xff]  }
 0x50a   : > { %1957 = vmatprep.subr.bf16.mxu1 %v2091_v9 }
 0x50b   : > { %v1074_v10 = vpop.xlane.xlu0 %1073  ;;  %1958 = vmatpush3.bf16.msra.mxu1 %v2091_v9 }
 0x50c   : > { %2135 = vrcp.f32 %v1074_v10  ;;  %v1269_v11 = vpop.xlane.xlu1 %1268  ;;  %v2092_v10 = vld [vmem:[%s3074_s14 + $0x8] sm:$0xff]  }
 0x50d   : > { %2137 = vrcp.f32 %v1080_v8  ;;  %1959 = vmatprep.subr.bf16.mxu1 %v2092_v10 }
 0x50e   : > { %2139 = vrcp.f32 %v1083_v51 }
 0x50f   : > { %v1266_v12 = vpop.xlane.xlu0 %1265  ;;  %1960 = vmatpush3.bf16.msra.mxu1 %v2092_v10 }
 0x510   : > { %v1263_v13 = vpop.xlane.xlu1 %1262 }
 0x511   : > { %2141 = vrcp.f32 %v1263_v13 }
 0x513   : > { %v1260_v14 = vpop.xlane.xlu0 %1259  ;;  %v2134_v15 = vpop.eup %2133 }
 0x514   : > { %2143 = vrcp.f32 %v1260_v14  ;;  %v1089_v20 = vmul.f32 %v2134_v15, %v2884_v25  ;;  %v1281_v25 = vpop.permute.xlu1 %1280 }
 0x515   : > { %2145 = vrcp.f32 %v1266_v12 }
 0x516   : > { %v2136_v16 = vpop.eup %2135  ;;  %2147 = vrcp.f32 %v1269_v11 }
 0x517   : > { %v1449_v17 = vpop.xlane.xlu0 %1448  ;;  %v1088_v18 = vmul.f32 %v2136_v16, %v2888_v28  ;;  %v2138_v22 = vpop.eup %2137 }
 0x518   : > { %v2140_v26 = vpop.eup %2139  ;;  %v1090_v30 = vmul.f32 %v2138_v22, %v2881_v24  ;;  %v1289_v24 = vsel %vm922_vm4, %v1281_v25, 0 }
 0x519   : > { %v1092_v21 = vpack.c.bf16 %v1089_v20, %v1088_v18  ;;  %v1091_v32 = vmul.f32 %v2140_v26, %v2877_v19 }
 0x51b   : > { %1929 = vmatprep.mubr.msk.bf16.mxu0 %vm811_vm2, %v1092_v21  ;;  %v1443_v23 = vpop.xlane.xlu0 %1442  ;;  %v2142_v27 = vpop.eup %2141  ;;  %v1093_v40 = vpack.c.bf16 %v1091_v32, %v1090_v30 }
 0x51c   : > { %v1275_v38 = vmul.f32 %v2142_v27, %v2901_v31 }
 0x51e   : > { %v2144_v29 = vpop.eup %2143 }
 0x51f   : > { %v1098_v34 = vpop.permute.xlu0 %1097  ;;  %v1274_v36 = vmul.f32 %v2144_v29, %v2905_v41  ;;  %v2146_v42 = vpop.eup %2145  ;;  %v1811_v29 = vld [vmem:[%s3075_s30] ss:$0 sm:$0xff]  ;;  %s2333_s30 = scalar_lea.vmem %s2332_s11, 1024 }
 0x520   : > { %v1106_v28 = vsel %vm922_vm4, %v1098_v34, 0  ;;  %1968 = vmatprep.subr.msk.bf16.mxu0 %vm922_vm4, %v1098_v34  ;;  %v2148_v41 = vpop.eup %2147  ;;  %v1276_v19 = vmul.f32 %v2146_v42, %v2899_v39 }
 0x521   : > { %1928 = vmatpush3.bf16.msra.mxu0 %v1106_v28  ;;  %v1278_v43 = vpack.c.bf16 %v1275_v38, %v1274_v36  ;;  %v1277_v45 = vmul.f32 %v2148_v41, %v2893_v37 }
 0x522   : > { %1970 = vmatprep.subr.msk.bf16.mxu0 %vm922_vm4, %v1281_v25 }
 0x523   : > { %v1279_v46 = vpack.c.bf16 %v1277_v45, %v1276_v19 }
 0x524   : > { %1930 = vmatmul.mubr.msk.bf16.vlgmr.msra.gmra.mrb[16].mxu0 %vm811_vm2, %v1093_v40 }
 0x525   : > { %1940 = vmatpush3.bf16.msra.mxu0 %v1289_v24  ;;  %1941 = vmatprep.mubr.msk.bf16.mxu0 %vm811_vm2, %v1278_v43 }
 0x52c   : > { %1942 = vmatmul.mubr.msk.bf16.vlgmr.msra.gmra.mrb[20].mxu0 %vm811_vm2, %v1279_v46 }
 0x545   : > { %v1452_v31 = vpop.xlane.xlu1 %1451 }
 0x546   : > { %2149 = vrcp.f32 %v1452_v31 }
 0x547   : > { %2151 = vrcp.f32 %v1443_v23 }
 0x548   : > { %2153 = vrcp.f32 %v1449_v17 }
 0x549   : > { %v1446_v48 = vpop.xlane.xlu1 %1445 }
 0x54a   : > { %2155 = vrcp.f32 %v1446_v48 }
 0x54d   : > { %v1464_v49 = vpop.permute.xlu1 %1463 }
 0x54e   : > { %v1472_v50 = vsel %vm922_vm4, %v1464_v49, 0  ;;  %1972 = vmatprep.subr.msk.bf16.mxu0 %vm922_vm4, %v1464_v49 }
 0x54f   : > { %1952 = vmatpush3.bf16.msra.mxu0 %v1472_v50 }
 0x550   : > { %v2150_v53 = vpop.eup %2149 }
 0x551   : > { %v2152_v55 = vpop.eup %2151  ;;  %v1460_v37 = vmul.f32 %v2150_v53, %v2931_v54 }
 0x552   : > { %v2154_v39 = vpop.eup %2153  ;;  %v1457_v59 = vmul.f32 %v2152_v55, %v2915_v47 }
 0x553   : > { %v1459_v61 = vmul.f32 %v2154_v39, %v2911_v44 }
 0x554   : > { %v2156_v58 = vpop.eup %2155 }
 0x555   : > { %v1458_v60 = vmul.f32 %v2156_v58, %v2935_v52  ;;  %v1462_v63 = vpack.c.bf16 %v1460_v37, %v1459_v61 }
 0x557   : > { %v1461_v62 = vpack.c.bf16 %v1458_v60, %v1457_v59 }
 0x559   : > { %1953 = vmatprep.mubr.msk.bf16.mxu0 %vm811_vm2, %v1461_v62 }
 0x55a   : > { %1954 = vmatmul.mubr.msk.bf16.vlgmr.msra.gmra.mrb[24].mxu0 %vm811_vm2, %v1462_v63 }
 0x57c   : > { %v1919_v0 = vpop.f32.mrb[12].mxu0 }
 0x57d   : > { %v960_v1 = vpop.f32.mrb[13].mxu0 }
 0x57e   : > { %v1920_v57 = vpop.f32.mrb[14].mxu0 }
 0x57f   : > { %v976_v2 = vpack.c.bf16 %v1920_v57, %v1919_v0  ;;  %v963_v3 = vpop.f32.mrb[15].mxu0 }
 0x580   : > { %v975_v4 = vpack.c.bf16 %v963_v3, %v960_v1 }
 0x581   : > { %978 = vst.msk [vmem:[#allocation4 + $0x8] sm:$0xff] %vm811_vm2, %v976_v2 }
 0x582   : > { %977 = vst.msk [vmem:[#allocation4] sm:$0xff] %vm811_vm2, %v975_v4 }
 0x5f7   : > { %v1931_v47 = vpop.f32.mrb[16].mxu0 }
 0x5f8   : > { %v1142_v5 = vpop.f32.mrb[17].mxu0 }
 0x5f9   : > { %v1932_v6 = vpop.f32.mrb[18].mxu0 }
 0x5fa   : > { %v1158_v44 = vpack.c.bf16 %v1932_v6, %v1931_v47  ;;  %v1145_v7 = vpop.f32.mrb[19].mxu0 }
 0x5fb   : > { %v1157_v33 = vpack.c.bf16 %v1145_v7, %v1142_v5 }
 0x5fc   : > { %1163 = vrot.lane.b32.xlu1 %v1158_v44, %s2420_s21 }
 0x5fd   : > { %1161 = vrot.lane.b32.xlu0 %v1157_v33, %s2420_s21 }
 0x5ff   : > { %v1943_v54 = vpop.f32.mrb[20].mxu0 }
 0x600   : > { %v1325_v56 = vpop.f32.mrb[21].mxu0 }
 0x601   : > { %v1944_v52 = vpop.f32.mrb[22].mxu0 }
 0x602   : > { %v1341_v35 = vpack.c.bf16 %v1944_v52, %v1943_v54  ;;  %v1328_v51 = vpop.f32.mrb[23].mxu0 }
 0x603   : > { %v1340_v8 = vpack.c.bf16 %v1328_v51, %v1325_v56 }
 0x604   : > { %1346 = vrot.lane.b32.xlu1 %v1341_v35, %s2421_s28 }
 0x605   : > { %1344 = vrot.lane.b32.xlu0 %v1340_v8, %s2421_s28  ;;  %s1634_s28 = sshll.u32 %s471_s29, 4  ;;  %s2982_s28 = int_to_ptr.vmem [resolvable:$true] %s1634_s28 }
 0x606   : > { %s2327_s10 = scalar_lea.vmem %s2982_s28, 512  ;;  %p2334_p1 = scmp.lt.s32.totalorder %s2982_s28, %s2332_s11 }
 0x607   : > { %p2328_p7 = scmp.ne.s32.totalorder %s2982_s28, %s2327_s10  ;;  %p2335_p3 = scmp.lt.s32.totalorder %s2333_s30, %s2327_s10 }
 0x609   : > { %p2329_p12 = pnand %p2328_p7, %p3077_p4  ;;  %p2336_p2 = por %p2335_p3, %p2334_p1 }
 0x60b   : > { %p2330_p13 = pneg %p2329_p12 }
 0x60d   : > { %p2337_p8 = pnand %p2336_p2, %p2330_p13 }
 0x62d   : > { %v1955_v11 = vpop.f32.mrb[24].mxu0 }
 0x62e   : > { %v1508_v12 = vpop.f32.mrb[25].mxu0 }
 0x62f   : > { %v1956_v13 = vpop.f32.mrb[26].mxu0 }
 0x630   : > { %v1524_v14 = vpack.c.bf16 %v1956_v13, %v1955_v11  ;;  %v1511_v15 = vpop.f32.mrb[27].mxu0 }
 0x631   : > { %v1523_v16 = vpack.c.bf16 %v1511_v15, %v1508_v12 }
 0x632   : > { %1529 = vrot.lane.b32.xlu1 %v1524_v14, %s2422_s16 }
 0x633   : > { %1527 = vrot.lane.b32.xlu0 %v1523_v16, %s2422_s16  ;;  %s2988_s16 = scalar_lea.hbm %s3076_s9, %s1822_s24 }
 0x66e   : > { %v1164_v17 = vpop.permute.xlu1 %1163 }
 0x66f   : > { %1169 = vst.msk [vmem:[#allocation4 + $0x8] sm:$0xff] %vm1167_vm5, %v1164_v17  ;;  %v1162_v18 = vpop.permute.xlu0 %1161 }
 0x670   : > { %1168 = vst.msk [vmem:[#allocation4] sm:$0xff] %vm1167_vm5, %v1162_v18 }
 0x676   : > { %v1347_v20 = vpop.permute.xlu1 %1346 }
 0x677   : > { %1352 = vst.msk [vmem:[#allocation4 + $0x8] sm:$0xff] %vm1350_vm6, %v1347_v20  ;;  %v1345_v21 = vpop.permute.xlu0 %1344 }
 0x678   : > { %1351 = vst.msk [vmem:[#allocation4] sm:$0xff] %vm1350_vm6, %v1345_v21 }
 0x6a4   : > { %v1530_v22 = vpop.permute.xlu1 %1529 }
 0x6a5   : > { %1535 = vst.msk [vmem:[#allocation4 + $0x8] sm:$0xff] %vm1533_vm7, %v1530_v22  ;;  %v1528_v23 = vpop.permute.xlu0 %1527 }
 0x6a6   : > { %1534 = vst.msk [vmem:[#allocation4] sm:$0xff] %vm1533_vm7, %v1528_v23 }
 0x6ac   : > { %v1537_v27 = vld [vmem:[#allocation4 + $0x8] sm:$0xff] }
 0x6ad   : > { %v1536_v26 = vld [vmem:[#allocation4] sm:$0xff] }
 0x6ae   : > { %1961 = vmatprep.mubr.msk.bf16.mxu1 %vm512_vm0, %v1536_v26 }
 0x6af   : > { %1962 = vmatmul.mubr.msk.bf16.vlgmr.msra.gmra.mrb[24].mxu1 %vm512_vm0, %v1537_v27 }
 0x782   : > { %v1963_v30 = vpop.f32.mrb[24].mxu1 }
 0x783   : > { %v1610_v34 = vadd.f32 %v1963_v30, %v1811_v29  ;;  %v1601_v36 = vpop.f32.mrb[25].mxu1 }
 0x784   : > { %v1602_v32 = vadd.f32 %v1811_v29, %v1601_v36  ;;  %v1964_v28 = vpop.f32.mrb[26].mxu1 }
 0x785   : > { %1618 = vst.msk [vmem:[%s471_s29 + $0x10] sm:$0xff] %vm512_vm0, %v1610_v34  ;;  %v1613_v25 = vadd.f32 %v1964_v28, %v1811_v29  ;;  %v1604_v38 = vpop.f32.mrb[27].mxu1 }
 0x786   : > { %1616 = vst.msk [vmem:[%s471_s29] sm:$0xff] %vm512_vm0, %v1602_v32  ;;  %v1605_v40 = vadd.f32 %v1811_v29, %v1604_v38 }
 0x787   : > { %1619 = vst.msk [vmem:[%s471_s29 + $0x18] sm:$0xff] %vm512_vm0, %v1613_v25 }
 0x788   : > { %1617 = vst.msk [vmem:[%s471_s29 + $0x8] sm:$0xff] %vm512_vm0, %v1605_v40 }
 0x789   : > { %2340 = shalt.err (!%p2337_p8)
}
 0x78a   : > { %s2341_s29 = scalar_lea.hbm %s2988_s16, 512  ;;  %s2345_s13 = scalar_lea.hbm %s3076_s9, 1024 }
 0x78b   : > { %p2342_p6 = scmp.ne.s32.totalorder %s2988_s16, %s2341_s29  ;;  %p2346_p0 = scmp.lt.u32.totalorder %s2988_s16, %s3076_s9 }
 0x78c   : > { %p2347_p5 = scmp.lt.u32.totalorder %s2345_s13, %s2341_s29  ;;  %p2349_p7 = scmp.lt.u32.totalorder %s2341_s29, %s2988_s16 }
 0x78d   : > { %p2343_p10 = pnand %p2342_p6, %p3077_p4 }
 0x78e   : > { %p2348_p9 = por %p2347_p5, %p2346_p0 }
 0x78f   : > { %p2344_p11 = pneg %p2343_p10 }
 0x790   : > { %p2350_p12 = por %p2349_p7, %p2348_p9 }
 0x792   : > { %p2351_p13 = pnand %p2350_p12, %p2344_p11 }
 0x794   : > { %2354 = shalt.err (!%p2351_p13)
}
 0x795   : > { %s2424_s10 = smov 128  }
 0x796   : > { %1995 = dma.vmem_to_hbm [thread:$0]  (%p3077_p4), %s2982_s28, 512, %s2988_s16, %s1621_s23, %s2424_s10, %s2424_s10, %s2420_s21  }
 0x797 PF: > { %s1649_s30 = sand.u32 1, %s2393_s17   ;;  %p3078_p1 = scmp.ne.s32.totalorder %s3064_s25, 0 }
 0x798   : > { %p3079_p3 = scmp.ge.s32.totalorder %s2405_s20, 2  ;;  %s1650_s29 = scalar_lea.sflag [#allocation7], %s1649_s30 }
 0x79a   : > { %p2018_p2 = pnand %p3079_p3, %p3078_p1 }
 0x79c   : > { %2388 = dma.done.wait (!%p2018_p2), %s1650_s29, 512  }
 0x79d   : > { %2390 = vsyncadd (!%p2018_p2), %s1650_s29, 4294966784  ;;  %p27_p8 = scmp.ge.s32.totalorder %s2650_s27, 4   ;;  %s3080_s17 = smov %s2397_s18 }
 0x79e   : > { %s3081_s18 = smov %s2401_s19  ;;  %s3082_s19 = smov %s2662_s1 }
 0x79f   : > { %s3083_s20 = smov %s2650_s27  ;;  %29 = sbr.rel (!%p27_p8) target bundleno = 13 (0xd), region = 129 }
 0x7a6   :  { %1655 = vsyncpa [#allocation6], 1 }
 0x7a7   :  { %1657 = vsyncpa [#allocation6 + $0x1], 1 }
 0x7a8   :  { %1658 = vsyncpa [#allocation9], 1 }
 0x7a9   :  { %1659 = vsyncpa [#allocation12], 1 }
 0x7aa   :  { %1660 = vsyncpa [#allocation15], 1 }
 0x7ab   :  { %1661 = vsyncpa [#allocation7], 1 }
 0x7ac   :  { %1663 = vsyncpa [#allocation7 + $0x1], 1 }

// kernel: tpu_custom_call.1
= control target key start
LH: loop header
LB: loop body
LE: loop exit
PB: predicated region body
PF: predicated region fallthrough
CT: control target
= control target key end

     0   :  { %s3035_s0 = inlined_call_operand.hbm [shape: bf16[2,32,32], index: 0, kind: input, shape index: {}]   ;;  %s3036_s1 = inlined_call_operand.hbm [shape: bf16[32,32], index: 1, kind: input, shape index: {}]   ;;  %s3037_s2 = inlined_call_operand.vmem [shape: f32[1,32], index: 2, kind: input, shape index: {}]   ;;  %s3038_s3 = inlined_call_operand.hbm [shape: bf16[32,32], index: 3, kind: input, shape index: {}]   ;;  %s3039_s4 = inlined_call_operand.vmem [shape: f32[1,32], index: 4, kind: input, shape index: {}]   ;;  %s3040_s5 = inlined_call_operand.vmem [shape: bf16[32,32], index: 5, kind: input, shape index: {}]   ;;  %s3041_s6 = inlined_call_operand.hbm [shape: f32[1,32], index: 6, kind: input, shape index: {}]   ;;  %s3042_s7 = inlined_call_operand.hbm [shape: bf16[8,32], index: 7, kind: input, shape index: {}]   ;;  %s3043_s8 = inlined_call_operand.hbm [shape: bf16[8,32], index: 8, kind: input, shape index: {}]   ;;  %s3044_s9 = inlined_call_operand.vmem [shape: bf16[32,32], index: 9, kind: input, shape index: {}]   ;;  %s3045_s10 = inlined_call_operand.vmem [shape: f32[1,32], index: 10, kind: input, shape index: {}]   ;;  %s3046_s11 = inlined_call_operand.hbm [shape: f32[2,32,32], index: 11, kind: output, shape index: {}]  }
   0x1   :  { %3053 = sst [smem:[#allocation22_spill]] %s3036_s1 }
   0x2   :  { %3054 = sst [smem:[#allocation23_spill]] %s3044_s9 }
   0x3   :  { %3055 = sst [smem:[#allocation24_spill]] %s3045_s10 }
   0x4   :  { %3056 = sst [smem:[#allocation25_spill]] %s3046_s11 }
   0x5   :  { %16 = vsyncpa [#allocation6], 0 }
   0x6   :  { %18 = vsyncpa [#allocation6 + $0x1], 0 }
   0x7   :  { %19 = vsyncpa [#allocation9], 0 }
   0x8   :  { %20 = vsyncpa [#allocation12], 0 }
   0x9   :  { %21 = vsyncpa [#allocation15], 0 }
   0xa   :  { %22 = vsyncpa [#allocation7], 0 }
   0xb   :  { %24 = vsyncpa [#allocation7 + $0x1], 0  ;;  %s2485_s17 = smov 0   ;;  %s2487_s18 = smov 0  }
   0xc   :  { %s2489_s19 = smov 0   ;;  %s2491_s20 = smov 0  }
   0xd LB: > { %s2407_s21 = smov [#allocation8]   ;;  %s2506_s23 = sadd.s32 4294967295, %s2405_s20   ;;  %s2405_s20 = sphi %s2491_s20, %s3083_s20   ;;  %s2401_s19 = sphi %s2489_s19, %s3082_s19   ;;  %s2397_s18 = sphi %s2487_s18, %s3081_s18   ;;  %s2393_s17 = sphi %s2485_s17, %s3080_s17  }
   0xe   : > { %s309_s22 = sshll.u32 %s2407_s21, 4  ;;  %p1756_p0 = scmp.ge.s32.totalorder %s2405_s20, 1  ;;  %s2511_s22 = int_to_ptr.vmem [resolvable:$true] %s309_s22 }
   0xf   : > { %p3049_p1 = scmp.eq.s32.totalorder %s2506_s23, 0  ;;  %p297_p2 = scmp.lt.s32.totalorder %s2405_s20, 3 }
  0x10   : > { %s2408_s25 = smov [#allocation11]   ;;  %s2409_s28 = smov [#allocation10]  }
  0x11   : > { %p2513_p3 = pnand %p1756_p0, %p297_p2  ;;  %s345_s26 = sshll.u32 %s2408_s25, 4  ;;  %s2526_s26 = int_to_ptr.vmem [resolvable:$true] %s345_s26 }
  0x12   : > { %s325_s29 = sshll.u32 %s2409_s28, 4  ;;  %s3059_s1 = sld [smem:[#allocation22_spill]]  ;;  %s2528_s29 = int_to_ptr.vmem [resolvable:$true] %s325_s29 }
  0x13   : > { %s3057_s24 = scalar_select %p2513_p3, 1, 0 }
  0x14   : > { %p1997_p5 = pneg %p2513_p3 }
  0x16   : > { %p2522_p6 = pnand %p1997_p5, %p3049_p1 }
  0x18   : > { %s2157_s13 = scalar_lea.hbm %s3059_s1, 256  ;;  %p2538_p8 = pneg %p2522_p6 }
  0x19   : > { %p2158_p7 = scmp.ne.s32.totalorder %s3059_s1, %s2157_s13  ;;  %p2164_p11 = scmp.lt.u32.totalorder %s2157_s13, %s3059_s1 }
  0x1b   : > { %p2160_p9 = pnand %p2538_p8, %p2158_p7 }
  0x1d   : > { %p2161_p10 = pneg %p2160_p9 }
  0x1f   : > { %p2166_p12 = pnand %p2164_p11, %p2161_p10 }
  0x21   : > { %2169 = shalt.err (!%p2166_p12)
}
  0x22   : > { %s2170_s28 = scalar_lea.vmem %s2511_s22, 256  ;;  %p2178_p5 = scmp.lt.s32.totalorder %s2511_s22, %s2511_s22 }
  0x23   : > { %p2171_p13 = scmp.ne.s32.totalorder %s2511_s22, %s2170_s28  ;;  %p2179_p4 = scmp.lt.s32.totalorder %s2170_s28, %s2170_s28 }
  0x25   : > { %p2173_p0 = pnand %p2171_p13, %p2538_p8  ;;  %p2180_p7 = por %p2179_p4, %p2178_p5 }
  0x27   : > { %p2174_p2 = pneg %p2173_p0 }
  0x29   : > { %p2181_p9 = pnand %p2180_p7, %p2174_p2 }
  0x2b   : > { %2184 = shalt.err (!%p2181_p9)
}
  0x2c   : > { %s3051_s30 = smov 64   ;;  %s2411_s12 = smov 4  }
  0x2d   : > { %2000 = dma.hbm_to_vmem [thread:$0]  (!%p2522_p6), %s3059_s1, 256, %s2511_s22, [#allocation9], %s3051_s30, %s3051_s30, %s2411_s12  }
  0x2e   : > { %s2185_s25 = scalar_lea.hbm %s3041_s6, 16 }
  0x2f   : > { %p2186_p4 = scmp.ne.s32.totalorder %s3041_s6, %s2185_s25  ;;  %p2192_p12 = scmp.lt.u32.totalorder %s2185_s25, %s3041_s6 }
  0x31   : > { %p2188_p10 = pnand %p2186_p4, %p2538_p8 }
  0x33   : > { %p2189_p11 = pneg %p2188_p10 }
  0x35   : > { %p2194_p13 = pnand %p2192_p12, %p2189_p11 }
  0x37   : > { %2197 = shalt.err (!%p2194_p13)
}
  0x38   : > { %s2198_s22 = scalar_lea.vmem %s2526_s26, 16  ;;  %s2205_s11 = scalar_lea.vmem %s2526_s26, 32 }
  0x39   : > { %p2199_p0 = scmp.ne.s32.totalorder %s2526_s26, %s2198_s22  ;;  %p2206_p7 = scmp.lt.s32.totalorder %s2526_s26, %s2526_s26 }
  0x3a   : > { %p2207_p9 = scmp.lt.s32.totalorder %s2205_s11, %s2198_s22 }
  0x3b   : > { %p2201_p2 = pnand %p2199_p0, %p2538_p8 }
  0x3c   : > { %p2208_p4 = por %p2207_p9, %p2206_p7 }
  0x3d   : > { %p2202_p5 = pneg %p2201_p2 }
  0x3f   : > { %p2209_p10 = pnand %p2208_p4, %p2202_p5 }
  0x41   : > { %2212 = shalt.err (!%p2209_p10)
}
  0x42   : > { %2006 = dma.hbm_to_vmem [thread:$0]  (!%p2522_p6), %s3041_s6, 16, %s2526_s26, [#allocation12]  }
  0x43   : > { %s2213_s15 = scalar_lea.hbm %s3038_s3, 256 }
  0x44   : > { %p2214_p11 = scmp.ne.s32.totalorder %s3038_s3, %s2213_s15  ;;  %p2220_p0 = scmp.lt.u32.totalorder %s2213_s15, %s3038_s3 }
  0x46   : > { %p2216_p12 = pnand %p2214_p11, %p2538_p8 }
  0x48   : > { %p2217_p13 = pneg %p2216_p12 }
  0x4a   : > { %p2222_p2 = pnand %p2220_p0, %p2217_p13 }
  0x4c   : > { %2225 = shalt.err (!%p2222_p2)
}
  0x4d   : > { %s2226_s26 = scalar_lea.vmem %s2528_s29, 256  ;;  %p2234_p4 = scmp.lt.s32.totalorder %s2528_s29, %s2528_s29 }
  0x4e   : > { %p2227_p5 = scmp.ne.s32.totalorder %s2528_s29, %s2226_s26  ;;  %p2235_p10 = scmp.lt.s32.totalorder %s2226_s26, %s2226_s26 }
  0x50   : > { %p2229_p7 = pnand %p2227_p5, %p2538_p8  ;;  %p2236_p11 = por %p2235_p10, %p2234_p4 }
  0x52   : > { %p2230_p9 = pneg %p2229_p7 }
  0x54   : > { %p2237_p12 = pnand %p2236_p11, %p2230_p9 }
  0x56   : > { %2240 = shalt.err (!%p2237_p12)
}
  0x57   : > { %2003 = dma.hbm_to_vmem [thread:$0]  (!%p2522_p6), %s3038_s3, 256, %s2528_s29, [#allocation9], %s3051_s30, %s3051_s30, %s2411_s12  }
  0x58   : > { %s2412_s10 = smov [#allocation13]   ;;  %s2413_s14 = smov [#allocation14]  }
  0x59   : > { %s356_s13 = sshll.u32 %s2412_s10, 4  ;;  %s367_s15 = sshll.u32 %s2413_s14, 4  ;;  %s357_s13 = int_to_ptr.vmem [resolvable:$true] %s356_s13  ;;  %s368_s15 = int_to_ptr.vmem [resolvable:$true] %s367_s15 }
  0x5a   : > { %s2241_s28 = scalar_lea.hbm %s3042_s7, 64 }
  0x5b   : > { %p2242_p13 = scmp.ne.s32.totalorder %s3042_s7, %s2241_s28  ;;  %p2248_p5 = scmp.lt.u32.totalorder %s2241_s28, %s3042_s7 }
  0x5d   : > { %p2244_p0 = pnand %p2242_p13, %p2538_p8 }
  0x5f   : > { %p2245_p2 = pneg %p2244_p0 }
  0x61   : > { %p2250_p7 = pnand %p2248_p5, %p2245_p2 }
  0x63   : > { %2253 = shalt.err (!%p2250_p7)
}
  0x64   : > { %s2254_s29 = scalar_lea.vmem %s357_s13, 64  ;;  %p2262_p11 = scmp.lt.s32.totalorder %s357_s13, %s357_s13 }
  0x65   : > { %p2255_p9 = scmp.ne.s32.totalorder %s357_s13, %s2254_s29  ;;  %p2263_p12 = scmp.lt.s32.totalorder %s2254_s29, %s2254_s29 }
  0x67   : > { %p2257_p4 = pnand %p2255_p9, %p2538_p8  ;;  %p2264_p1 = por %p2263_p12, %p2262_p11 }
  0x69   : > { %p2258_p10 = pneg %p2257_p4 }
  0x6b   : > { %p2265_p3 = pnand %p2264_p1, %p2258_p10 }
  0x6d   : > { %2268 = shalt.err (!%p2265_p3)
}
  0x6e   : > { %2009 = dma.hbm_to_vmem [thread:$0]  (!%p2522_p6), %s3042_s7, 64, %s357_s13, [#allocation12]  }
  0x6f   : > { %s2269_s21 = scalar_lea.hbm %s3043_s8, 64 }
  0x70   : > { %p2270_p13 = scmp.ne.s32.totalorder %s3043_s8, %s2269_s21  ;;  %p2276_p3 = scmp.lt.u32.totalorder %s2269_s21, %s3043_s8 }
  0x72   : > { %p2272_p0 = pnand %p2270_p13, %p2538_p8 }
  0x74   : > { %p2273_p1 = pneg %p2272_p0 }
  0x76   : > { %p2278_p2 = pnand %p2276_p3, %p2273_p1 }
  0x78   : > { %2281 = shalt.err (!%p2278_p2)
}
  0x79   : > { %s2282_s11 = scalar_lea.vmem %s368_s15, 64  ;;  %p2290_p4 = scmp.lt.s32.totalorder %s368_s15, %s368_s15 }
  0x7a   : > { %p2283_p5 = scmp.ne.s32.totalorder %s368_s15, %s2282_s11  ;;  %p2291_p10 = scmp.lt.s32.totalorder %s2282_s11, %s2282_s11 }
  0x7c   : > { %p2285_p7 = pnand %p2283_p5, %p2538_p8  ;;  %p2292_p11 = por %p2291_p10, %p2290_p4 }
  0x7e   : > { %p2286_p9 = pneg %p2285_p7 }
  0x80   : > { %p2293_p12 = pnand %p2292_p11, %p2286_p9 }
  0x82   : > { %2296 = shalt.err (!%p2293_p12)
}
  0x83   : > { %2012 = dma.hbm_to_vmem [thread:$0]  (!%p2522_p6), %s3043_s8, 64, %s368_s15, [#allocation15]  }
  0x84   : > { %s1755_s16 = sadd.s32 4294967294, %s2405_s20   ;;  %s2650_s27 = sadd.s32 1, %s2405_s20  }
  0x85   : > { %s37_s9 = sadd.s32 1, %s2401_s19  ;;  %s34_s10 = ssub.s32 %s2405_s20, %s2650_s27 }
  0x86   : > { %p44_p8 = scmp.ne.s32.totalorder %s2401_s19, %s2397_s18  ;;  %p35_p13 = scmp.eq.s32.totalorder %s34_s10, 0 }
  0x87   : > { %p45_p0 = scmp.eq.s32.totalorder %s2405_s20, 0  ;;  %p50_p1 = scmp.ne.s32.totalorder %s2397_s18, %s2393_s17 }
  0x88   : > { %p284_p3 = scmp.eq.s32.totalorder %s2506_s23, 1  ;;  %p3061_p5 = scmp.eq.s32.totalorder %s2506_s23, 0 }
  0x89   : > { %s2662_s1 = scalar_select %p35_p13, %s2401_s19, %s37_s9  }
  0x8a   : > { %p46_p2 = por %p45_p0, %p44_p8  ;;  %p2666_p7 = por %p3061_p5, %p50_p1 }
  0x8b   : > { %p2670_p6 = por %p284_p3, %p44_p8  ;;  %p290_p9 = scmp.eq.s32.totalorder %s1755_s16, 1 }
  0x8c   : > { %p2026_p4 = scmp.lt.s32.totalorder %s2405_s20, 2  ;;  %s384_s21 = sand.u32 1, %s2401_s19  }
  0x8d   : > { %s3063_s15 = scalar_select %p2670_p6, 1, 0 }
  0x8e   : > { %p2676_p10 = por %p290_p9, %p50_p1  ;;  %s1763_s28 = sshll.u32 %s384_s21, 4 }
  0x8f   : > { %s1821_s22 = sshll.u32 %s2405_s20, 8  ;;  %s388_s29 = scalar_lea.vmem [#allocation5], %s1763_s28 }
  0x90   : > { %s3064_s25 = scalar_select %p2676_p10, 1, 0 }
  0x91   : > { %s2684_s13 = scalar_lea.hbm %s3035_s0, %s1821_s22  ;;  %s395_s9 = sshll.u32 %s388_s29, 4  ;;  %s2690_s9 = int_to_ptr.vmem [resolvable:$true] %s395_s9 }
  0x92   : > { %p2686_p11 = pnand %p2026_p4, %p46_p2  ;;  %s2692_s10 = scalar_lea.sflag [#allocation6], %s384_s21 }
  0x93   : > { %s2297_s30 = scalar_lea.hbm %s2684_s13, 256  ;;  %s2302_s26 = scalar_lea.hbm %s3035_s0, 512 }
  0x94   : > { %p2298_p12 = scmp.ne.s32.totalorder %s2684_s13, %s2297_s30  ;;  %p2299_p8 = pneg %p2686_p11 }
  0x95   : > { %p2303_p1 = scmp.lt.u32.totalorder %s2684_s13, %s3035_s0  ;;  %p2304_p3 = scmp.lt.u32.totalorder %s2302_s26, %s2297_s30 }
  0x96   : > { %p2300_p13 = pnand %p2299_p8, %p2298_p12  ;;  %p2306_p5 = scmp.lt.u32.totalorder %s2297_s30, %s2684_s13 }
  0x97   : > { %p2305_p2 = por %p2304_p3, %p2303_p1 }
  0x98   : > { %p2301_p0 = pneg %p2300_p13 }
  0x99   : > { %p2307_p9 = por %p2306_p5, %p2305_p2 }
  0x9b   : > { %p2308_p4 = pnand %p2307_p9, %p2301_p0 }
  0x9d   : > { %2311 = shalt.err (!%p2308_p4)
}
  0x9e   : > { %s2312_s21 = scalar_lea.vmem %s2690_s9, 256  ;;  %s2414_s28 = smov [#allocation5]  }
  0x9f   : > { %p2313_p12 = scmp.ne.s32.totalorder %s2690_s9, %s2312_s21  ;;  %s2317_s22 = sshll.u32 %s2414_s28, 4  ;;  %s2318_s22 = int_to_ptr.vmem [resolvable:$false] %s2317_s22 }
  0xa0   : > { %s2319_s11 = scalar_lea.vmem %s2318_s22, 512  ;;  %p2320_p6 = scmp.lt.s32.totalorder %s2690_s9, %s2318_s22 }
  0xa1   : > { %p2315_p13 = pnand %p2313_p12, %p2299_p8  ;;  %p2321_p1 = scmp.lt.s32.totalorder %s2319_s11, %s2312_s21 }
  0xa3   : > { %p2316_p10 = pneg %p2315_p13  ;;  %p2322_p3 = por %p2321_p1, %p2320_p6 }
  0xa5   : > { %p2323_p2 = pnand %p2322_p3, %p2316_p10 }
  0xa7   : > { %2326 = shalt.err (!%p2323_p2)
}
  0xa8   : > { %s3066_s30 = smov 64   ;;  %p3067_p8 = scmp.ne.s32.totalorder %s3057_s24, 0 }
  0xa9   : > { %2016 = dma.hbm_to_vmem [thread:$0]  (!%p2686_p11), %s2684_s13, 256, %s2690_s9, %s2692_s10, %s3066_s30, %s3066_s30, %s2411_s12  }
  0xaa   : > { %407 = sbr.rel (%p3067_p8) target bundleno = 1943 (0x797), region = 64  ;;  %s2726_s26 = sand.u32 (!%p3067_p8), 1, %s2397_s18  }
  0xab   : > { %s1767_s29 = sshll.u32 (!%p3067_p8), %s2726_s26, 4  ;;  %s410_s21 = scalar_lea.sflag (!%p3067_p8), [#allocation6], %s2726_s26 }
  0xac   : > { %s413_s28 = scalar_lea.vmem (!%p3067_p8), [#allocation5], %s1767_s29 }
  0xb1   : > { %2372 = dma.done.wait (%p2666_p7), %s410_s21, 256  }
  0xb2   : > { %2374 = vsyncadd (%p2666_p7), %s410_s21, 4294967040  ;;  %p3068_p6 = scmp.eq.s32.totalorder %s2506_s23, 0 }
  0xb4   : > { %2376 = dma.done.wait (%p3068_p6), [#allocation9], 512   ;;  %p3069_p10 = pmov %p3068_p6 }
  0xb5   : > { %p3070_p11 = pmov %p3068_p6 }
  0xb6   : > { %2378 = vsyncadd (%p3069_p10), [#allocation9], 4294966784 }
  0xb7   : > { %2380 = dma.done.wait (%p3070_p11), [#allocation12], 80   ;;  %p3071_p0 = pmov %p3068_p6 }
  0xb9   : > { %2382 = vsyncadd (%p3071_p0), [#allocation12], 4294967216  ;;  %p3072_p5 = pmov %p3071_p0 }
  0xba   : > { %p3073_p9 = pmov %p3071_p0 }
  0xbb   : > { %2384 = dma.done.wait (%p3072_p5), [#allocation15], 64  }
  0xbc   : > { %2386 = vsyncadd (%p3073_p9), [#allocation15], 4294967232  ;;  %v2081_v0 = vld [vmem:[#allocation10] sm:$0xff]   ;;  %v2082_v1 = vld [vmem:[#allocation10 + $0x8] sm:$0xff]   ;;  %vm512_vm0 = vcmask 261120   ;;  %v2415_v6 = vmov 0.0  }
  0xbd   : > { %1869 = vmatprep.subr.bf16.mxu0 %v2081_v0  ;;  %v2083_v2 = vld [vmem:[%s413_s28] sm:$0xff]   ;;  %v2084_v3 = vld [vmem:[%s413_s28 + $0x8] sm:$0xff]   ;;  %1877 = vmatprep.subr.bf16.mxu1 %v2415_v6  ;;  %vm2416_vm1 = vmmov 0   ;;  %s2417_s11 = smov 120   ;;  %vm811_vm2 = vcmask 64512   ;;  %vm614_vm3 = vcmask 257024  }
  0xbe   : > { %1870 = vmatpush3.bf16.msra.mxu0 %v2081_v0  ;;  %1873 = vmatprep.mubr.msk.bf16.mxu0 %vm512_vm0, %v2083_v2  ;;  %v2085_v4 = vld [vmem:[%s3040_s5] sm:$0xff]   ;;  %v2086_v5 = vld [vmem:[%s3040_s5 + $0x8] sm:$0xff]   ;;  %v2087_v7 = vld [vmem:[#allocation8] sm:$0xff]   ;;  %s2418_s30 = smov 112   ;;  %s2419_s29 = smov 104   ;;  %vm922_vm4 = vcmask 1043456  }
  0xbf   : > { %1871 = vmatprep.subr.bf16.mxu0 %v2082_v1  ;;  %v2088_v8 = vld [vmem:[#allocation8 + $0x8] sm:$0xff]   ;;  %1881 = vmatprep.mubr.msk.bf16.mxu1 %vm2416_vm1, %v2415_v6  ;;  %v477_v20 = vld [vmem:[#allocation13] sm:$0xf]  ;;  %v1782_v21 = vld [vmem:[#allocation11] ss:$0 sm:$0xff]  ;;  %s2420_s21 = smov 8  }
  0xc0   : > { %v1774_v10 = vld [vmem:[%s3039_s4] ss:$0 sm:$0xff]  ;;  %s2421_s28 = smov 16   ;;  %s3074_s14 = sld [smem:[#allocation23_spill]]  ;;  %vm1167_vm5 = vcmask 130112   ;;  %vm1350_vm6 = vcmask 195712  }
  0xc1   : > { %v1788_v33 = vld [vmem:[%s3037_s2] ss:$0 sm:$0xff]  ;;  %s2422_s16 = smov 24   ;;  %vm1533_vm7 = vcmask 261312   ;;  %s1773_s10 = sshll.u32 %s2726_s26, 5 }
  0xc2   : > { %1872 = vmatpush3.bf16.msra.mxu0 %v2082_v1  ;;  %v478_v35 = vld [vmem:[#allocation14] sm:$0xf]  ;;  %s1822_s24 = sshll.u32 %s2506_s23, 9  ;;  %s3076_s9 = sld [smem:[#allocation25_spill]] }
  0xc3   : > { %1885 = vmatprep.subr.bf16.mxu0 %v2085_v4  ;;  %s1621_s23 = scalar_lea.sflag [#allocation7], %s2726_s26  ;;  %p3077_p4 = scmp.ne.s32.totalorder %s3063_s15, 0 }
  0xc4   : > { %s2423_s22 = smov [#allocation16]  }
  0xc5   : > { %1874 = vmatmul.mubr.msk.bf16.vlgmr.msra.gmra.mrb[0].mxu0 %vm512_vm0, %v2084_v3 }
  0xc6   : > { %1886 = vmatpush3.bf16.msra.mxu0 %v2085_v4  ;;  %1889 = vmatprep.mubr.msk.bf16.mxu0 %vm512_vm0, %v2083_v2 }
  0xc7   : > { %1887 = vmatprep.subr.bf16.mxu0 %v2086_v5 }
  0xca   : > { %1888 = vmatpush3.bf16.msra.mxu0 %v2086_v5 }
  0xcb   : > { %1901 = vmatprep.subr.bf16.mxu0 %v2087_v7 }
  0xcd   : > { %1890 = vmatmul.mubr.msk.bf16.vlgmr.msra.gmra.mrb[4].mxu0 %vm512_vm0, %v2084_v3 }
  0xce   : > { %1905 = vmatprep.mubr.msk.bf16.mxu0 %vm512_vm0, %v2083_v2  ;;  %1902 = vmatpush3.bf16.msra.mxu0 %v2087_v7 }
  0xcf   : > { %1903 = vmatprep.subr.bf16.mxu0 %v2088_v8 }
  0xd2   : > { %1904 = vmatpush3.bf16.msra.mxu0 %v2088_v8 }
  0xd5   : > { %1906 = vmatmul.mubr.msk.bf16.vlgmr.msra.gmra.mrb[8].mxu0 %vm512_vm0, %v2084_v3 }
 0x198   : > { %v1875_v9 = vpop.f32.mrb[0].mxu0 }
 0x199   : > { %v553_v11 = vpop.f32.mrb[1].mxu0  ;;  %v562_v13 = vadd.f32 %v1875_v9, %v1774_v10 }
 0x19a   : > { %v1876_v12 = vpop.f32.mrb[2].mxu0  ;;  %v554_v16 = vadd.f32 %v1774_v10, %v553_v11 }
 0x19b   : > { %v565_v14 = vadd.f32 %v1876_v12, %v1774_v10  ;;  %v556_v15 = vpop.f32.mrb[3].mxu0 }
 0x19c   : > { %v557_v17 = vadd.f32 %v1774_v10, %v556_v15 }
 0x19d   : > { %v569_v18 = vpack.c.bf16 %v565_v14, %v562_v13 }
 0x19e   : > { %v568_v19 = vpack.c.bf16 %v557_v17, %v554_v16 }
 0x1a0   : > { %1878 = vmatpush3.bf16.msra.mxu1 %v568_v19  ;;  %v1891_v22 = vpop.f32.mrb[4].mxu0 }
 0x1a1   : > { %1879 = vmatprep.subr.bf16.mxu1 %v2415_v6  ;;  %v682_v23 = vadd.f32 %v1891_v22, %v1782_v21  ;;  %v673_v24 = vpop.f32.mrb[5].mxu0 }
 0x1a2   : > { %v674_v25 = vadd.f32 %v1782_v21, %v673_v24  ;;  %v1892_v26 = vpop.f32.mrb[6].mxu0 }
 0x1a3   : > { %v685_v27 = vadd.f32 %v1892_v26, %v1782_v21  ;;  %v676_v28 = vpop.f32.mrb[7].mxu0 }
 0x1a4   : > { %1880 = vmatpush3.bf16.msra.mxu1 %v569_v18  ;;  %v677_v29 = vadd.f32 %v1782_v21, %v676_v28 }
 0x1a5   : > { %1893 = vmatprep.subr.bf16.mxu1 %v2415_v6  ;;  %v689_v30 = vpack.c.bf16 %v685_v27, %v682_v23 }
 0x1a6   : > { %v688_v31 = vpack.c.bf16 %v677_v29, %v674_v25 }
 0x1a7   : > { %1882 = vmatmul.mubr.msk.bf16.vlgmr.msra.gmra.mrb[0].mxu1 %vm512_vm0, %v477_v20 }
 0x1a8   : > { %1897 = vmatprep.mubr.msk.bf16.mxu1 %vm2416_vm1, %v2415_v6  ;;  %1894 = vmatpush3.bf16.msra.mxu1 %v688_v31  ;;  %v1907_v32 = vpop.f32.mrb[8].mxu0 }
 0x1a9   : > { %1895 = vmatprep.subr.bf16.mxu1 %v2415_v6  ;;  %v792_v34 = vpop.f32.mrb[9].mxu0  ;;  %v801_v36 = vadd.f32 %v1907_v32, %v1788_v33 }
 0x1aa   : > { %v793_v37 = vadd.f32 %v1788_v33, %v792_v34  ;;  %v1908_v38 = vpop.f32.mrb[10].mxu0 }
 0x1ab   : > { %v804_v39 = vadd.f32 %v1908_v38, %v1788_v33  ;;  %v795_v40 = vpop.f32.mrb[11].mxu0 }
 0x1ac   : > { %1896 = vmatpush3.bf16.msra.mxu1 %v689_v30  ;;  %v796_v41 = vadd.f32 %v1788_v33, %v795_v40 }
 0x1ad   : > { %v808_v42 = vpack.c.bf16 %v804_v39, %v801_v36 }
 0x1ae   : > { %v807_v43 = vpack.c.bf16 %v796_v41, %v793_v37 }
 0x1af   : > { %1898 = vmatmul.mubr.msk.bf16.vlgmr.msra.gmra.mrb[4].mxu1 %vm512_vm0, %v478_v35  ;;  %983 = vrot.lane.b32.xlu1 %v808_v42, %s2417_s11 }
 0x1b0   : > { %1911 = vmatprep.mubr.msk.bf16.mxu1 %vm811_vm2, %v807_v43 }
 0x221   : > { %v984_v59 = vpop.permute.xlu1 %983 }
 0x27a   : > { %v607_v44 = vpop.f32.mrb[0].mxu1 }
 0x27b   : > { %v613_v45 = vpack.c.bf16 %v607_v44, %v607_v44  ;;  %v1883_v46 = vpop.f32.mrb[1].mxu1 }
 0x27c   : > { %v610_v47 = vpop.f32.mrb[2].mxu1 }
 0x27d   : > { %615 = vst.msk [vmem:[#allocation2] sm:$0xf] %vm614_vm3, %v613_v45  ;;  %v1884_v48 = vpop.f32.mrb[3].mxu1 }
 0x282   : > { %v727_v52 = vpop.f32.mrb[4].mxu1 }
 0x283   : > { %v733_v53 = vpack.c.bf16 %v727_v52, %v727_v52  ;;  %v1899_v54 = vpop.f32.mrb[5].mxu1 }
 0x284   : > { %v809_v49 = vld [vmem:[#allocation2] sm:$0xf]  ;;  %v730_v55 = vpop.f32.mrb[6].mxu1 }
 0x285   : > { %1965 = vmatprep.subr.msk.bf16.mxu1 %vm811_vm2, %v809_v49  ;;  %v819_v50 = vsel %vm811_vm2, %v809_v49, 0  ;;  %v1797_v51 = vcombine.low %v809_v49, %v809_v49  ;;  %734 = vst.msk [vmem:[#allocation3] sm:$0xf] %vm614_vm3, %v733_v53  ;;  %v1900_v56 = vpop.f32.mrb[7].mxu1 }
 0x286   : > { %1910 = vmatpush3.bf16.xpose.msra.mxu1 %v819_v50 }
 0x287   : > { %1174 = vrot.lane.b32.xlu1 %v1797_v51, %s2418_s30  ;;  %988 = vrot.lane.b32.xlu0 %v1797_v51, %s2417_s11 }
 0x28b   : > { %1172 = vrot.lane.b32.xlu1 %v808_v42, %s2418_s30  ;;  %981 = vrot.lane.b32.xlu0 %v807_v43, %s2417_s11 }
 0x28c   : > { %v2783_v57 = vld [vmem:[#allocation3] sm:$0xf] }
 0x28d   : > { %1912 = vmatmul.mubr.msk.bf16.vlgmr.msra.gmra.mrb[8].mxu1 %vm811_vm2, %v808_v42  ;;  %1966 = vmatprep.subr.msk.bf16.mxu0 %vm922_vm4, %v2783_v57  ;;  %v924_v58 = vsel %vm922_vm4, %v2783_v57, 0 }
 0x28e   : > { %1916 = vmatpush3.bf16.msra.mxu0 %v924_v58 }
 0x28f   : > { %1353 = vrot.lane.b32.xlu1 %v807_v43, %s2419_s29  ;;  %1170 = vrot.lane.b32.xlu0 %v807_v43, %s2418_s30 }
 0x293   : > { %1357 = vrot.lane.b32.xlu0 %v1797_v51, %s2419_s29 }
 0x297   : > { %1355 = vrot.lane.b32.xlu0 %v808_v42, %s2419_s29 }
 0x2f9   : > { %v989_v60 = vpop.permute.xlu0 %988  ;;  %v1175_v62 = vpop.permute.xlu1 %1174 }
 0x2fa   : > { %v997_v61 = vsel %vm811_vm2, %v989_v60, 0  ;;  %1967 = vmatprep.subr.msk.bf16.mxu1 %vm811_vm2, %v989_v60  ;;  %v1183_v1 = vsel %vm811_vm2, %v1175_v62, 0 }
 0x2fb   : > { %1922 = vmatpush3.bf16.xpose.msra.mxu1 %v997_v61 }
 0x2fc   : > { %1969 = vmatprep.subr.msk.bf16.mxu1 %vm811_vm2, %v1175_v62 }
 0x2fd   : > { %v982_v63 = vpop.permute.xlu0 %981  ;;  %v1173_v2 = vpop.permute.xlu1 %1172 }
 0x2fe   : > { %1923 = vmatprep.mubr.msk.bf16.mxu1 %vm811_vm2, %v982_v63 }
 0x301   : > { %v1171_v0 = vpop.permute.xlu0 %1170  ;;  %v1354_v4 = vpop.permute.xlu1 %1353 }
 0x302   : > { %1924 = vmatmul.mubr.msk.bf16.vlgmr.msra.gmra.mrb[12].mxu1 %vm811_vm2, %v984_v59 }
 0x303   : > { %1934 = vmatpush3.bf16.xpose.msra.mxu1 %v1183_v1  ;;  %1935 = vmatprep.mubr.msk.bf16.mxu1 %vm811_vm2, %v1171_v0 }
 0x305   : > { %v1358_v3 = vpop.permute.xlu0 %1357 }
 0x306   : > { %1971 = vmatprep.subr.msk.bf16.mxu1 %vm811_vm2, %v1358_v3  ;;  %v1366_v5 = vsel %vm811_vm2, %v1358_v3, 0 }
 0x309   : > { %v1356_v6 = vpop.permute.xlu0 %1355 }
 0x30a   : > { %1936 = vmatmul.mubr.msk.bf16.vlgmr.msra.gmra.mrb[16].mxu1 %vm811_vm2, %v1173_v2 }
 0x30b   : > { %1946 = vmatpush3.bf16.xpose.msra.mxu1 %v1366_v5  ;;  %1947 = vmatprep.mubr.msk.bf16.mxu1 %vm811_vm2, %v1354_v4 }
 0x312   : > { %1948 = vmatmul.mubr.msk.bf16.vlgmr.msra.gmra.mrb[20].mxu1 %vm811_vm2, %v1356_v6 }
 0x360   : > { %v1913_v7 = vpop.f32.mrb[8].mxu1 }
 0x361   : > { %v855_v8 = vpop.f32.mrb[9].mxu1  ;;  %v876_v14 = vsel %vm811_vm2, %v1913_v7, -inf }
 0x362   : > { %v1914_v9 = vpop.f32.mrb[10].mxu1  ;;  %v870_v10 = vsel %vm811_vm2, %v855_v8, -inf }
 0x363   : > { %871 = vmax.xlane.f32.xlu1 %v870_v10  ;;  %v858_v11 = vpop.f32.mrb[11].mxu1  ;;  %v879_v13 = vsel %vm811_vm2, %v1914_v9, -inf }
 0x364   : > { %v873_v12 = vsel %vm811_vm2, %v858_v11, -inf }
 0x365   : > { %874 = vmax.xlane.f32.xlu0 %v873_v12 }
 0x367   : > { %880 = vmax.xlane.f32.xlu1 %v879_v13 }
 0x369   : > { %877 = vmax.xlane.f32.xlu0 %v876_v14 }
 0x3d5   : > { %v2805_v15 = vpop.f32.mrb[12].mxu1 }
 0x3d6   : > { %v2807_v16 = vpop.f32.mrb[13].mxu1  ;;  %v1054_v21 = vsel %vm811_vm2, %v2805_v15, -inf }
 0x3d7   : > { %v2809_v17 = vpop.f32.mrb[14].mxu1  ;;  %v1048_v18 = vsel %vm811_vm2, %v2807_v16, -inf }
 0x3d8   : > { %v2813_v19 = vpop.f32.mrb[15].mxu1  ;;  %1049 = vmax.xlane.f32.xlu0 %v1048_v18  ;;  %v1057_v20 = vsel %vm811_vm2, %v2809_v17, -inf }
 0x3d9   : > { %1058 = vmax.xlane.f32.xlu1 %v1057_v20  ;;  %v1051_v22 = vsel %vm811_vm2, %v2813_v19, -inf }
 0x3dc   : > { %1055 = vmax.xlane.f32.xlu0 %v1054_v21 }
 0x3dd   : > { %v2821_v23 = vpop.f32.mrb[16].mxu1  ;;  %1052 = vmax.xlane.f32.xlu1 %v1051_v22 }
 0x3de   : > { %v2823_v24 = vpop.f32.mrb[17].mxu1  ;;  %v1240_v29 = vsel %vm811_vm2, %v2821_v23, -inf }
 0x3df   : > { %v2825_v25 = vpop.f32.mrb[18].mxu1  ;;  %v1234_v26 = vsel %vm811_vm2, %v2823_v24, -inf }
 0x3e0   : > { %v2829_v27 = vpop.f32.mrb[19].mxu1  ;;  %1235 = vmax.xlane.f32.xlu0 %v1234_v26  ;;  %v1243_v28 = vsel %vm811_vm2, %v2825_v25, -inf }
 0x3e1   : > { %1244 = vmax.xlane.f32.xlu1 %v1243_v28  ;;  %v1237_v30 = vsel %vm811_vm2, %v2829_v27, -inf }
 0x3e4   : > { %1241 = vmax.xlane.f32.xlu0 %v1240_v29 }
 0x3e5   : > { %v2837_v31 = vpop.f32.mrb[20].mxu1  ;;  %1238 = vmax.xlane.f32.xlu1 %v1237_v30 }
 0x3e6   : > { %v2839_v32 = vpop.f32.mrb[21].mxu1  ;;  %v1423_v37 = vsel %vm811_vm2, %v2837_v31, -inf }
 0x3e7   : > { %v2841_v33 = vpop.f32.mrb[22].mxu1  ;;  %v1417_v34 = vsel %vm811_vm2, %v2839_v32, -inf }
 0x3e8   : > { %v2845_v35 = vpop.f32.mrb[23].mxu1  ;;  %1418 = vmax.xlane.f32.xlu0 %v1417_v34  ;;  %v1426_v36 = vsel %vm811_vm2, %v2841_v33, -inf }
 0x3e9   : > { %1427 = vmax.xlane.f32.xlu1 %v1426_v36  ;;  %v1420_v38 = vsel %vm811_vm2, %v2845_v35, -inf }
 0x3ec   : > { %1424 = vmax.xlane.f32.xlu0 %v1423_v37 }
 0x3ed   : > { %1421 = vmax.xlane.f32.xlu1 %v1420_v38 }
 0x3f0   : > { %v872_v39 = vpop.xlane.xlu1 %871 }
 0x3f1   : > { %v882_v43 = vsub.f32 %v855_v8, %v872_v39 }
 0x3f2   : > { %v875_v40 = vpop.xlane.xlu0 %874 }
 0x3f3   : > { %v883_v41 = vsub.f32 %v858_v11, %v875_v40  ;;  %v886_v49 = vmul.f32 1.442695, %v882_v43 }
 0x3f4   : > { %v881_v42 = vpop.xlane.xlu1 %880 }
 0x3f5   : > { %v885_v44 = vsub.f32 %v1914_v9, %v881_v42  ;;  %v888_v45 = vmul.f32 1.442695, %v883_v41 }
 0x3f6   : > { %v878_v46 = vpop.xlane.xlu0 %877 }
 0x3f7   : > { %v892_v47 = vmul.f32 1.442695, %v885_v44  ;;  %v884_v48 = vsub.f32 %v1913_v7, %v878_v46 }
 0x3f9   : > { %2093 = vpow2.f32 %v892_v47  ;;  %v890_v50 = vmul.f32 1.442695, %v884_v48 }
 0x3fa   : > { %2095 = vpow2.f32 %v888_v45 }
 0x3fb   : > { %2097 = vpow2.f32 %v890_v50 }
 0x3fc   : > { %2099 = vpow2.f32 %v886_v49 }
 0x403   : > { %v2853_v51 = vpop.eup %2093 }
 0x404   : > { %v2855_v52 = vpop.eup %2095  ;;  %v903_v53 = vsel %vm811_vm2, %v2853_v51, 0.0 }
 0x405   : > { %v2859_v54 = vpop.eup %2097  ;;  %904 = vadd.xlane.f32.xlu1 %v903_v53  ;;  %v897_v58 = vsel %vm811_vm2, %v2855_v52, 0.0  ;;  %v1800_v53 = vcombine.low %v2783_v57, %v2783_v57 }
 0x406   : > { %v900_v55 = vsel %vm811_vm2, %v2859_v54, 0.0  ;;  %v2863_v56 = vpop.eup %2099 }
 0x407   : > { %901 = vadd.xlane.f32.xlu0 %v900_v55  ;;  %v894_v59 = vsel %vm811_vm2, %v2863_v56, 0.0 }
 0x409   : > { %898 = vadd.xlane.f32.xlu1 %v897_v58 }
 0x40b   : > { %895 = vadd.xlane.f32.xlu0 %v894_v59 }
 0x465   : > { %v1050_v60 = vpop.xlane.xlu0 %1049 }
 0x466   : > { %v1059_v61 = vpop.xlane.xlu1 %1058  ;;  %v1060_v63 = vsub.f32 %v2807_v16, %v1050_v60 }
 0x467   : > { %v1063_v62 = vsub.f32 %v2809_v17, %v1059_v61 }
 0x468   : > { %v1064_v5 = vmul.f32 1.442695, %v1060_v63 }
 0x469   : > { %v1070_v0 = vmul.f32 1.442695, %v1063_v62  ;;  %v1056_v1 = vpop.xlane.xlu0 %1055 }
 0x46a   : > { %v1062_v2 = vsub.f32 %v2805_v15, %v1056_v1  ;;  %v1053_v3 = vpop.xlane.xlu1 %1052 }
 0x46b   : > { %2101 = vpow2.f32 %v1070_v0  ;;  %v1061_v4 = vsub.f32 %v2813_v19, %v1053_v3 }
 0x46c   : > { %v1068_v6 = vmul.f32 1.442695, %v1062_v2 }
 0x46d   : > { %v1066_v7 = vmul.f32 1.442695, %v1061_v4  ;;  %v1236_v8 = vpop.xlane.xlu0 %1235 }
 0x46e   : > { %2103 = vpow2.f32 %v1068_v6  ;;  %v1245_v9 = vpop.xlane.xlu1 %1244  ;;  %v1246_v11 = vsub.f32 %v2823_v24, %v1236_v8 }
 0x46f   : > { %2105 = vpow2.f32 %v1066_v7  ;;  %v1249_v10 = vsub.f32 %v2825_v25, %v1245_v9 }
 0x470   : > { %2107 = vpow2.f32 %v1064_v5  ;;  %v1250_v17 = vmul.f32 1.442695, %v1246_v11 }
 0x471   : > { %v1256_v12 = vmul.f32 1.442695, %v1249_v10  ;;  %v1242_v13 = vpop.xlane.xlu0 %1241 }
 0x472   : > { %v1248_v14 = vsub.f32 %v2821_v23, %v1242_v13  ;;  %v1239_v15 = vpop.xlane.xlu1 %1238 }
 0x473   : > { %2109 = vpow2.f32 %v1256_v12  ;;  %v1247_v16 = vsub.f32 %v2829_v27, %v1239_v15 }
 0x474   : > { %v1254_v18 = vmul.f32 1.442695, %v1248_v14 }
 0x475   : > { %v2877_v19 = vpop.eup %2101  ;;  %v1252_v20 = vmul.f32 1.442695, %v1247_v16  ;;  %v1419_v21 = vpop.xlane.xlu0 %1418 }
 0x476   : > { %2111 = vpow2.f32 %v1254_v18  ;;  %v1081_v22 = vsel %vm811_vm2, %v2877_v19, 0.0  ;;  %v1429_v23 = vsub.f32 %v2839_v32, %v1419_v21  ;;  %v1428_v45 = vpop.xlane.xlu1 %1427 }
 0x477   : > { %2113 = vpow2.f32 %v1252_v20  ;;  %1082 = vadd.xlane.f32.xlu1 %v1081_v22  ;;  %v1432_v63 = vsub.f32 %v2841_v33, %v1428_v45 }
 0x478   : > { %v2881_v24 = vpop.eup %2103  ;;  %2115 = vpow2.f32 %v1250_v17  ;;  %v1433_v34 = vmul.f32 1.442695, %v1429_v23 }
 0x479   : > { %v2884_v25 = vpop.eup %2105  ;;  %v1425_v26 = vpop.xlane.xlu0 %1424  ;;  %v1078_v27 = vsel %vm811_vm2, %v2881_v24, 0.0  ;;  %v1439_v4 = vmul.f32 1.442695, %v1432_v63 }
 0x47a   : > { %v2888_v28 = vpop.eup %2107  ;;  %v1431_v29 = vsub.f32 %v2837_v31, %v1425_v26  ;;  %1079 = vadd.xlane.f32.xlu0 %v1078_v27  ;;  %v1075_v30 = vsel %vm811_vm2, %v2884_v25, 0.0  ;;  %v1422_v49 = vpop.xlane.xlu1 %1421 }
 0x47b   : > { %1076 = vadd.xlane.f32.xlu1 %v1075_v30  ;;  %v1072_v32 = vsel %vm811_vm2, %v2888_v28, 0.0  ;;  %v1430_v5 = vsub.f32 %v2845_v35, %v1422_v49 }
 0x47c   : > { %v1437_v36 = vmul.f32 1.442695, %v1431_v29 }
 0x47d   : > { %v2893_v37 = vpop.eup %2109  ;;  %v1435_v33 = vmul.f32 1.442695, %v1430_v5 }
 0x47e   : > { %2117 = vpow2.f32 %v1437_v36  ;;  %1073 = vadd.xlane.f32.xlu0 %v1072_v32  ;;  %v1267_v38 = vsel %vm811_vm2, %v2893_v37, 0.0 }
 0x47f   : > { %1268 = vadd.xlane.f32.xlu1 %v1267_v38  ;;  %2119 = vpow2.f32 %v1433_v34 }
 0x480   : > { %v2899_v39 = vpop.eup %2111 }
 0x481   : > { %v2901_v31 = vpop.eup %2113  ;;  %v1264_v40 = vsel %vm811_vm2, %v2899_v39, 0.0 }
 0x482   : > { %v2905_v41 = vpop.eup %2115  ;;  %1265 = vadd.xlane.f32.xlu0 %v1264_v40  ;;  %v1261_v42 = vsel %vm811_vm2, %v2901_v31, 0.0 }
 0x483   : > { %1262 = vadd.xlane.f32.xlu1 %v1261_v42  ;;  %v1258_v43 = vsel %vm811_vm2, %v2905_v41, 0.0 }
 0x486   : > { %1259 = vadd.xlane.f32.xlu0 %v1258_v43 }
 0x488   : > { %v2911_v44 = vpop.eup %2117 }
 0x489   : > { %v1447_v46 = vsel %vm811_vm2, %v2911_v44, 0.0  ;;  %v2915_v47 = vpop.eup %2119 }
 0x48a   : > { %1448 = vadd.xlane.f32.xlu0 %v1447_v46  ;;  %v1441_v48 = vsel %vm811_vm2, %v2915_v47, 0.0 }
 0x48e   : > { %1442 = vadd.xlane.f32.xlu0 %v1441_v48 }
 0x492   : > { %v905_v50 = vpop.xlane.xlu1 %904 }
 0x494   : > { %1280 = vrot.lane.b32.xlu1 %v1800_v53, %s2418_s30  ;;  %v902_v55 = vpop.xlane.xlu0 %901  ;;  %s3075_s30 = sld [smem:[#allocation24_spill]] }
 0x495   : > { %2121 = vrcp.f32 %v902_v55 }
 0x496   : > { %v899_v58 = vpop.xlane.xlu1 %898 }
 0x497   : > { %2123 = vrcp.f32 %v899_v58 }
 0x498   : > { %2125 = vrcp.f32 %v905_v50  ;;  %v896_v59 = vpop.xlane.xlu0 %895 }
 0x499   : > { %2127 = vrcp.f32 %v896_v59 }
 0x49a   : > { %2129 = vpow2.f32 %v1439_v4 }
 0x49b   : > { %2131 = vpow2.f32 %v1435_v33 }
 0x49f   : > { %v2122_v60 = vpop.eup %2121 }
 0x4a0   : > { %v912_v1 = vmul.f32 %v2122_v60, %v2859_v54 }
 0x4a1   : > { %v2124_v61 = vpop.eup %2123 }
 0x4a2   : > { %v2126_v62 = vpop.eup %2125  ;;  %v911_v2 = vmul.f32 %v2124_v61, %v2855_v52 }
 0x4a3   : > { %v2128_v0 = vpop.eup %2127  ;;  %v913_v3 = vmul.f32 %v2126_v62, %v2853_v51 }
 0x4a4   : > { %1097 = vrot.lane.b32.xlu0 %v1800_v53, %s2417_s11  ;;  %v910_v57 = vmul.f32 %v2128_v0, %v2863_v56  ;;  %v2931_v54 = vpop.eup %2129  ;;  %s2331_s11 = sshll.u32 %s2423_s22, 4  ;;  %s2332_s11 = int_to_ptr.vmem [resolvable:$false] %s2331_s11 }
 0x4a5   : > { %v915_v7 = vpack.c.bf16 %v913_v3, %v912_v1  ;;  %v1450_v56 = vsel %vm811_vm2, %v2931_v54, 0.0  ;;  %v2935_v52 = vpop.eup %2131 }
 0x4a6   : > { %v914_v6 = vpack.c.bf16 %v911_v2, %v910_v57  ;;  %v1444_v35 = vsel %vm811_vm2, %v2935_v52, 0.0 }
 0x4a8   : > { %1917 = vmatprep.mubr.msk.bf16.mxu0 %vm811_vm2, %v914_v6 }
 0x4a9   : > { %1918 = vmatmul.mubr.msk.bf16.vlgmr.msra.gmra.mrb[12].mxu0 %vm811_vm2, %v915_v7 }
 0x4b8   : > { %1451 = vadd.xlane.f32.xlu1 %v1450_v56 }
 0x4bc   : > { %1445 = vadd.xlane.f32.xlu1 %v1444_v35 }
 0x4cd   : > { %1463 = vrot.lane.b32.xlu1 %v1800_v53, %s2419_s29  ;;  %s471_s29 = scalar_lea.vmem [#allocation16], %s1773_s10 }
 0x504   : > { %v1083_v51 = vpop.xlane.xlu1 %1082 }
 0x507   : > { %v1080_v8 = vpop.xlane.xlu0 %1079 }
 0x508   : > { %v1077_v9 = vpop.xlane.xlu1 %1076 }
 0x509   : > { %2133 = vrcp.f32 %v1077_v9  ;;  %v2091_v9 = vld [vmem:[%s3074_s14] sm:$0xff]  }
 0x50a   : > { %1957 = vmatprep.subr.bf16.mxu1 %v2091_v9 }
 0x50b   : > { %v1074_v10 = vpop.xlane.xlu0 %1073  ;;  %1958 = vmatpush3.bf16.msra.mxu1 %v2091_v9 }
 0x50c   : > { %2135 = vrcp.f32 %v1074_v10  ;;  %v1269_v11 = vpop.xlane.xlu1 %1268  ;;  %v2092_v10 = vld [vmem:[%s3074_s14 + $0x8] sm:$0xff]  }
 0x50d   : > { %2137 = vrcp.f32 %v1080_v8  ;;  %1959 = vmatprep.subr.bf16.mxu1 %v2092_v10 }
 0x50e   : > { %2139 = vrcp.f32 %v1083_v51 }
 0x50f   : > { %v1266_v12 = vpop.xlane.xlu0 %1265  ;;  %1960 = vmatpush3.bf16.msra.mxu1 %v2092_v10 }
 0x510   : > { %v1263_v13 = vpop.xlane.xlu1 %1262 }
 0x511   : > { %2141 = vrcp.f32 %v1263_v13 }
 0x513   : > { %v1260_v14 = vpop.xlane.xlu0 %1259  ;;  %v2134_v15 = vpop.eup %2133 }
 0x514   : > { %2143 = vrcp.f32 %v1260_v14  ;;  %v1089_v20 = vmul.f32 %v2134_v15, %v2884_v25  ;;  %v1281_v25 = vpop.permute.xlu1 %1280 }
 0x515   : > { %2145 = vrcp.f32 %v1266_v12 }
 0x516   : > { %v2136_v16 = vpop.eup %2135  ;;  %2147 = vrcp.f32 %v1269_v11 }
 0x517   : > { %v1449_v17 = vpop.xlane.xlu0 %1448  ;;  %v1088_v18 = vmul.f32 %v2136_v16, %v2888_v28  ;;  %v2138_v22 = vpop.eup %2137 }
 0x518   : > { %v2140_v26 = vpop.eup %2139  ;;  %v1090_v30 = vmul.f32 %v2138_v22, %v2881_v24  ;;  %v1289_v24 = vsel %vm922_vm4, %v1281_v25, 0 }
 0x519   : > { %v1092_v21 = vpack.c.bf16 %v1089_v20, %v1088_v18  ;;  %v1091_v32 = vmul.f32 %v2140_v26, %v2877_v19 }
 0x51b   : > { %1929 = vmatprep.mubr.msk.bf16.mxu0 %vm811_vm2, %v1092_v21  ;;  %v1443_v23 = vpop.xlane.xlu0 %1442  ;;  %v2142_v27 = vpop.eup %2141  ;;  %v1093_v40 = vpack.c.bf16 %v1091_v32, %v1090_v30 }
 0x51c   : > { %v1275_v38 = vmul.f32 %v2142_v27, %v2901_v31 }
 0x51e   : > { %v2144_v29 = vpop.eup %2143 }
 0x51f   : > { %v1098_v34 = vpop.permute.xlu0 %1097  ;;  %v1274_v36 = vmul.f32 %v2144_v29, %v2905_v41  ;;  %v2146_v42 = vpop.eup %2145  ;;  %v1811_v29 = vld [vmem:[%s3075_s30] ss:$0 sm:$0xff]  ;;  %s2333_s30 = scalar_lea.vmem %s2332_s11, 1024 }
 0x520   : > { %v1106_v28 = vsel %vm922_vm4, %v1098_v34, 0  ;;  %1968 = vmatprep.subr.msk.bf16.mxu0 %vm922_vm4, %v1098_v34  ;;  %v2148_v41 = vpop.eup %2147  ;;  %v1276_v19 = vmul.f32 %v2146_v42, %v2899_v39 }
 0x521   : > { %1928 = vmatpush3.bf16.msra.mxu0 %v1106_v28  ;;  %v1278_v43 = vpack.c.bf16 %v1275_v38, %v1274_v36  ;;  %v1277_v45 = vmul.f32 %v2148_v41, %v2893_v37 }
 0x522   : > { %1970 = vmatprep.subr.msk.bf16.mxu0 %vm922_vm4, %v1281_v25 }
 0x523   : > { %v1279_v46 = vpack.c.bf16 %v1277_v45, %v1276_v19 }
 0x524   : > { %1930 = vmatmul.mubr.msk.bf16.vlgmr.msra.gmra.mrb[16].mxu0 %vm811_vm2, %v1093_v40 }
 0x525   : > { %1940 = vmatpush3.bf16.msra.mxu0 %v1289_v24  ;;  %1941 = vmatprep.mubr.msk.bf16.mxu0 %vm811_vm2, %v1278_v43 }
 0x52c   : > { %1942 = vmatmul.mubr.msk.bf16.vlgmr.msra.gmra.mrb[20].mxu0 %vm811_vm2, %v1279_v46 }
 0x545   : > { %v1452_v31 = vpop.xlane.xlu1 %1451 }
 0x546   : > { %2149 = vrcp.f32 %v1452_v31 }
 0x547   : > { %2151 = vrcp.f32 %v1443_v23 }
 0x548   : > { %2153 = vrcp.f32 %v1449_v17 }
 0x549   : > { %v1446_v48 = vpop.xlane.xlu1 %1445 }
 0x54a   : > { %2155 = vrcp.f32 %v1446_v48 }
 0x54d   : > { %v1464_v49 = vpop.permute.xlu1 %1463 }
 0x54e   : > { %v1472_v50 = vsel %vm922_vm4, %v1464_v49, 0  ;;  %1972 = vmatprep.subr.msk.bf16.mxu0 %vm922_vm4, %v1464_v49 }
 0x54f   : > { %1952 = vmatpush3.bf16.msra.mxu0 %v1472_v50 }
 0x550   : > { %v2150_v53 = vpop.eup %2149 }
 0x551   : > { %v2152_v55 = vpop.eup %2151  ;;  %v1460_v37 = vmul.f32 %v2150_v53, %v2931_v54 }
 0x552   : > { %v2154_v39 = vpop.eup %2153  ;;  %v1457_v59 = vmul.f32 %v2152_v55, %v2915_v47 }
 0x553   : > { %v1459_v61 = vmul.f32 %v2154_v39, %v2911_v44 }
 0x554   : > { %v2156_v58 = vpop.eup %2155 }
 0x555   : > { %v1458_v60 = vmul.f32 %v2156_v58, %v2935_v52  ;;  %v1462_v63 = vpack.c.bf16 %v1460_v37, %v1459_v61 }
 0x557   : > { %v1461_v62 = vpack.c.bf16 %v1458_v60, %v1457_v59 }
 0x559   : > { %1953 = vmatprep.mubr.msk.bf16.mxu0 %vm811_vm2, %v1461_v62 }
 0x55a   : > { %1954 = vmatmul.mubr.msk.bf16.vlgmr.msra.gmra.mrb[24].mxu0 %vm811_vm2, %v1462_v63 }
 0x57c   : > { %v1919_v0 = vpop.f32.mrb[12].mxu0 }
 0x57d   : > { %v960_v1 = vpop.f32.mrb[13].mxu0 }
 0x57e   : > { %v1920_v57 = vpop.f32.mrb[14].mxu0 }
 0x57f   : > { %v976_v2 = vpack.c.bf16 %v1920_v57, %v1919_v0  ;;  %v963_v3 = vpop.f32.mrb[15].mxu0 }
 0x580   : > { %v975_v4 = vpack.c.bf16 %v963_v3, %v960_v1 }
 0x581   : > { %978 = vst.msk [vmem:[#allocation4 + $0x8] sm:$0xff] %vm811_vm2, %v976_v2 }
 0x582   : > { %977 = vst.msk [vmem:[#allocation4] sm:$0xff] %vm811_vm2, %v975_v4 }
 0x5f7   : > { %v1931_v47 = vpop.f32.mrb[16].mxu0 }
 0x5f8   : > { %v1142_v5 = vpop.f32.mrb[17].mxu0 }
 0x5f9   : > { %v1932_v6 = vpop.f32.mrb[18].mxu0 }
 0x5fa   : > { %v1158_v44 = vpack.c.bf16 %v1932_v6, %v1931_v47  ;;  %v1145_v7 = vpop.f32.mrb[19].mxu0 }
 0x5fb   : > { %v1157_v33 = vpack.c.bf16 %v1145_v7, %v1142_v5 }
 0x5fc   : > { %1163 = vrot.lane.b32.xlu1 %v1158_v44, %s2420_s21 }
 0x5fd   : > { %1161 = vrot.lane.b32.xlu0 %v1157_v33, %s2420_s21 }
 0x5ff   : > { %v1943_v54 = vpop.f32.mrb[20].mxu0 }
 0x600   : > { %v1325_v56 = vpop.f32.mrb[21].mxu0 }
 0x601   : > { %v1944_v52 = vpop.f32.mrb[22].mxu0 }
 0x602   : > { %v1341_v35 = vpack.c.bf16 %v1944_v52, %v1943_v54  ;;  %v1328_v51 = vpop.f32.mrb[23].mxu0 }
 0x603   : > { %v1340_v8 = vpack.c.bf16 %v1328_v51, %v1325_v56 }
 0x604   : > { %1346 = vrot.lane.b32.xlu1 %v1341_v35, %s2421_s28 }
 0x605   : > { %1344 = vrot.lane.b32.xlu0 %v1340_v8, %s2421_s28  ;;  %s1634_s28 = sshll.u32 %s471_s29, 4  ;;  %s2982_s28 = int_to_ptr.vmem [resolvable:$true] %s1634_s28 }
 0x606   : > { %s2327_s10 = scalar_lea.vmem %s2982_s28, 512  ;;  %p2334_p1 = scmp.lt.s32.totalorder %s2982_s28, %s2332_s11 }
 0x607   : > { %p2328_p7 = scmp.ne.s32.totalorder %s2982_s28, %s2327_s10  ;;  %p2335_p3 = scmp.lt.s32.totalorder %s2333_s30, %s2327_s10 }
 0x609   : > { %p2329_p12 = pnand %p2328_p7, %p3077_p4  ;;  %p2336_p2 = por %p2335_p3, %p2334_p1 }
 0x60b   : > { %p2330_p13 = pneg %p2329_p12 }
 0x60d   : > { %p2337_p8 = pnand %p2336_p2, %p2330_p13 }
 0x62d   : > { %v1955_v11 = vpop.f32.mrb[24].mxu0 }
 0x62e   : > { %v1508_v12 = vpop.f32.mrb[25].mxu0 }
 0x62f   : > { %v1956_v13 = vpop.f32.mrb[26].mxu0 }
 0x630   : > { %v1524_v14 = vpack.c.bf16 %v1956_v13, %v1955_v11  ;;  %v1511_v15 = vpop.f32.mrb[27].mxu0 }
 0x631   : > { %v1523_v16 = vpack.c.bf16 %v1511_v15, %v1508_v12 }
 0x632   : > { %1529 = vrot.lane.b32.xlu1 %v1524_v14, %s2422_s16 }
 0x633   : > { %1527 = vrot.lane.b32.xlu0 %v1523_v16, %s2422_s16  ;;  %s2988_s16 = scalar_lea.hbm %s3076_s9, %s1822_s24 }
 0x66e   : > { %v1164_v17 = vpop.permute.xlu1 %1163 }
 0x66f   : > { %1169 = vst.msk [vmem:[#allocation4 + $0x8] sm:$0xff] %vm1167_vm5, %v1164_v17  ;;  %v1162_v18 = vpop.permute.xlu0 %1161 }
 0x670   : > { %1168 = vst.msk [vmem:[#allocation4] sm:$0xff] %vm1167_vm5, %v1162_v18 }
 0x676   : > { %v1347_v20 = vpop.permute.xlu1 %1346 }
 0x677   : > { %1352 = vst.msk [vmem:[#allocation4 + $0x8] sm:$0xff] %vm1350_vm6, %v1347_v20  ;;  %v1345_v21 = vpop.permute.xlu0 %1344 }
 0x678   : > { %1351 = vst.msk [vmem:[#allocation4] sm:$0xff] %vm1350_vm6, %v1345_v21 }
 0x6a4   : > { %v1530_v22 = vpop.permute.xlu1 %1529 }
 0x6a5   : > { %1535 = vst.msk [vmem:[#allocation4 + $0x8] sm:$0xff] %vm1533_vm7, %v1530_v22  ;;  %v1528_v23 = vpop.permute.xlu0 %1527 }
 0x6a6   : > { %1534 = vst.msk [vmem:[#allocation4] sm:$0xff] %vm1533_vm7, %v1528_v23 }
 0x6ac   : > { %v1537_v27 = vld [vmem:[#allocation4 + $0x8] sm:$0xff] }
 0x6ad   : > { %v1536_v26 = vld [vmem:[#allocation4] sm:$0xff] }
 0x6ae   : > { %1961 = vmatprep.mubr.msk.bf16.mxu1 %vm512_vm0, %v1536_v26 }
 0x6af   : > { %1962 = vmatmul.mubr.msk.bf16.vlgmr.msra.gmra.mrb[24].mxu1 %vm512_vm0, %v1537_v27 }
 0x782   : > { %v1963_v30 = vpop.f32.mrb[24].mxu1 }
 0x783   : > { %v1610_v34 = vadd.f32 %v1963_v30, %v1811_v29  ;;  %v1601_v36 = vpop.f32.mrb[25].mxu1 }
 0x784   : > { %v1602_v32 = vadd.f32 %v1811_v29, %v1601_v36  ;;  %v1964_v28 = vpop.f32.mrb[26].mxu1 }
 0x785   : > { %1618 = vst.msk [vmem:[%s471_s29 + $0x10] sm:$0xff] %vm512_vm0, %v1610_v34  ;;  %v1613_v25 = vadd.f32 %v1964_v28, %v1811_v29  ;;  %v1604_v38 = vpop.f32.mrb[27].mxu1 }
 0x786   : > { %1616 = vst.msk [vmem:[%s471_s29] sm:$0xff] %vm512_vm0, %v1602_v32  ;;  %v1605_v40 = vadd.f32 %v1811_v29, %v1604_v38 }
 0x787   : > { %1619 = vst.msk [vmem:[%s471_s29 + $0x18] sm:$0xff] %vm512_vm0, %v1613_v25 }
 0x788   : > { %1617 = vst.msk [vmem:[%s471_s29 + $0x8] sm:$0xff] %vm512_vm0, %v1605_v40 }
 0x789   : > { %2340 = shalt.err (!%p2337_p8)
}
 0x78a   : > { %s2341_s29 = scalar_lea.hbm %s2988_s16, 512  ;;  %s2345_s13 = scalar_lea.hbm %s3076_s9, 1024 }
 0x78b   : > { %p2342_p6 = scmp.ne.s32.totalorder %s2988_s16, %s2341_s29  ;;  %p2346_p0 = scmp.lt.u32.totalorder %s2988_s16, %s3076_s9 }
 0x78c   : > { %p2347_p5 = scmp.lt.u32.totalorder %s2345_s13, %s2341_s29  ;;  %p2349_p7 = scmp.lt.u32.totalorder %s2341_s29, %s2988_s16 }
 0x78d   : > { %p2343_p10 = pnand %p2342_p6, %p3077_p4 }
 0x78e   : > { %p2348_p9 = por %p2347_p5, %p2346_p0 }
 0x78f   : > { %p2344_p11 = pneg %p2343_p10 }
 0x790   : > { %p2350_p12 = por %p2349_p7, %p2348_p9 }
 0x792   : > { %p2351_p13 = pnand %p2350_p12, %p2344_p11 }
 0x794   : > { %2354 = shalt.err (!%p2351_p13)
}
 0x795   : > { %s2424_s10 = smov 128  }
 0x796   : > { %1995 = dma.vmem_to_hbm [thread:$0]  (%p3077_p4), %s2982_s28, 512, %s2988_s16, %s1621_s23, %s2424_s10, %s2424_s10, %s2420_s21  }
 0x797 PF: > { %s1649_s30 = sand.u32 1, %s2393_s17   ;;  %p3078_p1 = scmp.ne.s32.totalorder %s3064_s25, 0 }
 0x798   : > { %p3079_p3 = scmp.ge.s32.totalorder %s2405_s20, 2  ;;  %s1650_s29 = scalar_lea.sflag [#allocation7], %s1649_s30 }
 0x79a   : > { %p2018_p2 = pnand %p3079_p3, %p3078_p1 }
 0x79c   : > { %2388 = dma.done.wait (!%p2018_p2), %s1650_s29, 512  }
 0x79d   : > { %2390 = vsyncadd (!%p2018_p2), %s1650_s29, 4294966784  ;;  %p27_p8 = scmp.ge.s32.totalorder %s2650_s27, 4   ;;  %s3080_s17 = smov %s2397_s18 }
 0x79e   : > { %s3081_s18 = smov %s2401_s19  ;;  %s3082_s19 = smov %s2662_s1 }
 0x79f   : > { %s3083_s20 = smov %s2650_s27  ;;  %29 = sbr.rel (!%p27_p8) target bundleno = 13 (0xd), region = 129 }
 0x7a6   :  { %1655 = vsyncpa [#allocation6], 1 }
 0x7a7   :  { %1657 = vsyncpa [#allocation6 + $0x1], 1 }
 0x7a8   :  { %1658 = vsyncpa [#allocation9], 1 }
 0x7a9   :  { %1659 = vsyncpa [#allocation12], 1 }
 0x7aa   :  { %1660 = vsyncpa [#allocation15], 1 }
 0x7ab   :  { %1661 = vsyncpa [#allocation7], 1 }
 0x7ac   :  { %1663 = vsyncpa [#allocation7 + $0x1], 1 }

</bundles_post_ra>
